<compile_context>
chip_gen: v7x
topology: tpu7x:2x2x1
jax: 0.10.0
libtpu: 0.0.40
codegen_flags: <defaults>
</compile_context>

<pallas_src>
import jax
import jax.numpy as jnp
from jax import lax
from jax.experimental import pallas as pl
from jax.experimental.pallas import tpu as pltpu


# ----------------------------------------------------------------------------
# Pallas kernel
# ----------------------------------------------------------------------------
def gru_mlp_kernel(emb_ref,                                   # (T, Bb, E)
                   wx_ref, bx_ref,                            # fused fwd|bwd x-proj
                   whf_ref, bhnf_ref,                         # fwd hidden weights
                   whb_ref, bhnb_ref,                         # bwd hidden weights
                   w1a_ref, w1b_ref, b1_ref,                  # fc1 split fwd/bwd
                   w2_ref, b2_ref, w3_ref, b3_ref,            # fc2, fc3
                   out_ref,                                    # (Bb, O)
                   xp_ref, accf_ref, accb_ref):                # VMEM scratch
    T, Bb, E = emb_ref.shape
    Hp = bhnf_ref.shape[-1]          # lane-aligned (padded) hidden size
    GH = 3 * Hp
    cdt = wx_ref.dtype               # compute dtype (bf16 or f32)

    # ---- Fused input projection: one tall MXU matmul for BOTH directions --
    emb2d = emb_ref[...].reshape(T * Bb, E)                    # (T*Bb, E)
    xp = (jnp.dot(emb2d, wx_ref[...], preferred_element_type=jnp.float32)
          + bx_ref[...])                                       # (T*Bb, 6Hp) f32
    xp_ref[...] = xp.reshape(T, Bb, 2 * GH).astype(xp_ref.dtype)

    # ---- Loop-invariant loads / broadcasts hoisted out of the loop --------
    whf = whf_ref[...]                                         # (Hp, 3Hp)
    whb = whb_ref[...]
    bhnf = jnp.broadcast_to(bhnf_ref[...], (Bb, Hp))           # (Bb, Hp) f32
    bhnb = jnp.broadcast_to(bhnb_ref[...], (Bb, Hp))

    accf_ref[...] = jnp.zeros_like(accf_ref)
    accb_ref[...] = jnp.zeros_like(accb_ref)

    def gate_update(gx, gh, bhn, h):
        # gx already contains (b_ir + b_hr), (b_iz + b_hz), b_in folded in.
        # All gate slices start at lane offsets that are multiples of 128.
        r = jax.nn.sigmoid(gx[:, 0:Hp] + gh[:, 0:Hp])
        z = jax.nn.sigmoid(gx[:, Hp:2 * Hp] + gh[:, Hp:2 * Hp])
        n = jnp.tanh(gx[:, 2 * Hp:GH] + r * (gh[:, 2 * Hp:GH] + bhn))
        return (1.0 - z) * n + z * h

    # ---- Interleaved fwd/bwd recurrence (two independent dep chains) ------
    def step(t, carry):
        h_f, h_b = carry
        gx_f = xp_ref[t, :, 0:GH].astype(jnp.float32)          # (Bb, 3Hp)
        gx_b = xp_ref[T - 1 - t, :, GH:2 * GH].astype(jnp.float32)
        gh_f = jnp.dot(h_f.astype(cdt), whf,
                       preferred_element_type=jnp.float32)     # fused 3 gates
        gh_b = jnp.dot(h_b.astype(cdt), whb,
                       preferred_element_type=jnp.float32)
        h_f = gate_update(gx_f, gh_f, bhnf, h_f)
        h_b = gate_update(gx_b, gh_b, bhnb, h_b)
        accf_ref[...] += h_f                                   # VMEM accumulators
        accb_ref[...] += h_b
        return h_f, h_b

    zeros = jnp.zeros((Bb, Hp), jnp.float32)
    unroll = T if T <= 16 else 8
    lax.fori_loop(0, T, step, (zeros, zeros), unroll=unroll)

    inv_t = jnp.float32(1.0 / T)
    mean_f = accf_ref[...] * inv_t                             # (Bb, Hp)
    mean_b = accb_ref[...] * inv_t

    # ---- MLP head: fc1 (split fwd/bwd halves), fc2, fc3 --------------------
    h1 = jnp.maximum(
        jnp.dot(mean_f.astype(cdt), w1a_ref[...],
                preferred_element_type=jnp.float32)
        + jnp.dot(mean_b.astype(cdt), w1b_ref[...],
                  preferred_element_type=jnp.float32)
        + b1_ref[...], 0.0)
    h2 = jnp.maximum(
        jnp.dot(h1.astype(cdt), w2_ref[...],
                preferred_element_type=jnp.float32)
        + b2_ref[...], 0.0)
    out_ref[...] = (
        jnp.dot(h2.astype(cdt), w3_ref[...],
                preferred_element_type=jnp.float32)
        + b3_ref[...]).astype(out_ref.dtype)


# ----------------------------------------------------------------------------
# Wrapper (glue: embedding gather, weight layout/padding, pallas_call)
# ----------------------------------------------------------------------------
def rnn_gru_forward(token_ids, p, compute_dtype=jnp.bfloat16):
    B, T = token_ids.shape
    E = p["embedding"].shape[1]
    H = p["w_hh_f"].shape[1]
    O = p["fc3_w"].shape[0]
    Hp = ((H + 127) // 128) * 128          # lane-aligned per-gate width

    # Gather directly into time-major order: (T, B, E).
    emb_tbe = jnp.take(p["embedding"], token_ids.T, axis=0).astype(compute_dtype)

    def pad_gate_cols(w):
        # (in_dim, 3H) -> (in_dim, 3Hp); gate g placed at [g*Hp : g*Hp+H].
        out = jnp.zeros((w.shape[0], 3 * Hp), w.dtype)
        for g in range(3):
            out = out.at[:, g * Hp:g * Hp + H].set(w[:, g * H:(g + 1) * H])
        return out

    def pad_rows(w, rows):
        out = jnp.zeros((rows, w.shape[1]), w.dtype)
        return out.at[:w.shape[0], :].set(w)

    def prep_dir(w_ih, w_hh, b_ih, b_hh):
        wx = pad_gate_cols(w_ih.T).astype(compute_dtype)                 # (E, 3Hp)
        wh = pad_rows(pad_gate_cols(w_hh.T), Hp).astype(compute_dtype)   # (Hp, 3Hp)
        # Fold biases: r,z gates get b_ih + b_hh; n gate gets b_ih only
        # (b_hn must stay inside the r*(...) term).  Padded columns get 0.
        bx = jnp.zeros((1, 3 * Hp), jnp.float32)
        bx = bx.at[0, 0:H].set(b_ih[0:H] + b_hh[0:H])
        bx = bx.at[0, Hp:Hp + H].set(b_ih[H:2 * H] + b_hh[H:2 * H])
        bx = bx.at[0, 2 * Hp:2 * Hp + H].set(b_ih[2 * H:3 * H])
        bhn = jnp.zeros((1, Hp), jnp.float32).at[0, 0:H].set(b_hh[2 * H:3 * H])
        return wx, bx, wh, bhn

    wxf, bxf, whf, bhnf = prep_dir(p["w_ih_f"], p["w_hh_f"], p["b_ih_f"], p["b_hh_f"])
    wxb, bxb, whb, bhnb = prep_dir(p["w_ih_b"], p["w_hh_b"], p["b_ih_b"], p["b_hh_b"])

    # Fused fwd|bwd input-projection weight / bias.
    wx_all = jnp.concatenate([wxf, wxb], axis=1)               # (E, 6Hp)
    bx_all = jnp.concatenate([bxf, bxb], axis=1)               # (1, 6Hp)

    w1t = p["fc1_w"].T                                         # (2H, H)
    w1a = pad_rows(w1t[0:H, :], Hp).astype(compute_dtype)      # (Hp, H)
    w1b = pad_rows(w1t[H:2 * H, :], Hp).astype(compute_dtype)
    w2 = p["fc2_w"].T.astype(compute_dtype)                    # (H, H//2)
    w3 = p["fc3_w"].T.astype(compute_dtype)                    # (H//2, O)
    b1 = p["fc1_b"].reshape(1, -1).astype(jnp.float32)
    b2 = p["fc2_b"].reshape(1, -1).astype(jnp.float32)
    b3 = p["fc3_b"].reshape(1, -1).astype(jnp.float32)

    args = [emb_tbe,
            wx_all, bx_all,
            whf, bhnf, whb, bhnb,
            w1a, w1b, b1, w2, b2, w3, b3]

    # Batch blocking: >=2 grid programs when B >= 16 (v7x has 2 TensorCores),
    # blocks kept a multiple of 8 sublanes, capped at 128.
    if B <= 8:
        block_b = B
    else:
        half = -(-B // 2)
        block_b = min(128, (-(-half // 8)) * 8)
    grid = (pl.cdiv(B, block_b),)

    def full_spec(a):
        nd = a.ndim
        return pl.BlockSpec(a.shape, lambda i, nd=nd: (0,) * nd)

    in_specs = [pl.BlockSpec((T, block_b, E), lambda i: (0, i, 0))]
    in_specs += [full_spec(a) for a in args[1:]]

    # Explicit VMEM budget: scratch + double-buffered emb/weights/out + headroom.
    itemsize = jnp.dtype(compute_dtype).itemsize
    weight_bytes = sum(int(a.size) * a.dtype.itemsize for a in args[1:])
    emb_block_bytes = T * block_b * E * itemsize
    scratch_bytes = T * block_b * 6 * Hp * itemsize + 2 * block_b * Hp * 4
    vmem_needed = scratch_bytes + 2 * (emb_block_bytes + weight_bytes + block_b * O * 4)
    vmem_limit = int(min(max(int(vmem_needed * 1.5) + (4 << 20), 32 << 20), 64 << 20))

    return pl.pallas_call(
        gru_mlp_kernel,
        out_shape=jax.ShapeDtypeStruct((B, O), jnp.float32),
        grid=grid,
        in_specs=in_specs,
        out_specs=pl.BlockSpec((block_b, O), lambda i: (i, 0)),
        scratch_shapes=[
            pltpu.VMEM((T, block_b, 6 * Hp), compute_dtype),   # fused x-projection
            pltpu.VMEM((block_b, Hp), jnp.float32),            # fwd mean accumulator
            pltpu.VMEM((block_b, Hp), jnp.float32),            # bwd mean accumulator
        ],
        compiler_params=pltpu.CompilerParams(
            dimension_semantics=("parallel",),
            vmem_limit_bytes=vmem_limit),
    )(*args)


# ----------------------------------------------------------------------------
# Deterministic parameter init (PyTorch layouts) + pure-JAX reference
# ----------------------------------------------------------------------------
def init_params(key, vocab_size, E, H, O):
    ks = jax.random.split(key, 20)

    def kaiming_normal(k, shape):
        fan_in = shape[1]
        return jax.random.normal(k, shape, jnp.float32) * jnp.sqrt(2.0 / fan_in)

    def kaiming_uniform(k, shape):
        fan_in = shape[1]
        bound = jnp.sqrt(6.0 / fan_in)
        return jax.random.uniform(k, shape, jnp.float32, -bound, bound)

    def uni(k, shape, bound):
        return jax.random.uniform(k, shape, jnp.float32, -bound, bound)

    b = 1.0 / jnp.sqrt(H)
    return {
        "embedding": jax.random.normal(ks[0], (vocab_size, E), jnp.float32),
        "w_ih_f": kaiming_normal(ks[1], (3 * H, E)),
        "w_hh_f": kaiming_normal(ks[2], (3 * H, H)),
        "b_ih_f": uni(ks[3], (3 * H,), b),
        "b_hh_f": uni(ks[4], (3 * H,), b),
        "w_ih_b": kaiming_normal(ks[5], (3 * H, E)),
        "w_hh_b": kaiming_normal(ks[6], (3 * H, H)),
        "b_ih_b": uni(ks[7], (3 * H,), b),
        "b_hh_b": uni(ks[8], (3 * H,), b),
        "fc1_w": kaiming_uniform(ks[9], (H, 2 * H)),
        "fc1_b": uni(ks[10], (H,), 1.0 / jnp.sqrt(2 * H)),
        "fc2_w": kaiming_uniform(ks[11], (H // 2, H)),
        "fc2_b": uni(ks[12], (H // 2,), 1.0 / jnp.sqrt(H)),
        "fc3_w": kaiming_uniform(ks[13], (O, H // 2)),
        "fc3_b": uni(ks[14], (O,), 1.0 / jnp.sqrt(H // 2)),
    }


def reference_forward(token_ids, p):
    """Pure-JAX replica of the PyTorch forward for correctness checking."""
    emb = jnp.take(p["embedding"], token_ids, axis=0)        # (B, T, E)
    B, T, _ = emb.shape
    H = p["w_hh_f"].shape[1]

    def gru_dir(w_ih, w_hh, b_ih, b_hh, reverse):
        def cell(h, x_t):
            gi = x_t @ w_ih.T + b_ih
            gh = h @ w_hh.T + b_hh
            i_r, i_z, i_n = jnp.split(gi, 3, axis=-1)
            h_r, h_z, h_n = jnp.split(gh, 3, axis=-1)
            r = jax.nn.sigmoid(i_r + h_r)
            z = jax.nn.sigmoid(i_z + h_z)
            n = jnp.tanh(i_n + r * h_n)
            h_new = (1.0 - z) * n + z * h
            return h_new, h_new

        xs = jnp.transpose(emb, (1, 0, 2))
        if reverse:
            xs = xs[::-1]
        _, hs = lax.scan(cell, jnp.zeros((B, H), jnp.float32), xs)
        if reverse:
            hs = hs[::-1]
        return jnp.transpose(hs, (1, 0, 2))                  # (B, T, H)

    out_f = gru_dir(p["w_ih_f"], p["w_hh_f"], p["b_ih_f"], p["b_hh_f"], False)
    out_b = gru_dir(p["w_ih_b"], p["w_hh_b"], p["b_ih_b"], p["b_hh_b"], True)
    pooled = jnp.concatenate([out_f, out_b], axis=-1).mean(axis=1)   # (B, 2H)
    h1 = jax.nn.relu(pooled @ p["fc1_w"].T + p["fc1_b"])
    h2 = jax.nn.relu(h1 @ p["fc2_w"].T + p["fc2_b"])
    return h2 @ p["fc3_w"].T + p["fc3_b"]


# ----------------------------------------------------------------------------
if __name__ == "__main__":
    vocab_size, E, H, O = 100, 32, 32, 4
    B, T = 2, 8

    key = jax.random.PRNGKey(0)
    k_tok, k_par = jax.random.split(key)
    token_ids = jax.random.randint(k_tok, (B, T), 0, vocab_size, dtype=jnp.int32)
    params = init_params(k_par, vocab_size, E, H, O)

    ref = reference_forward(token_ids, params)

    # f32 operands: strict check against the pure-JAX reference.
    out_f32 = jax.block_until_ready(
        rnn_gru_forward(token_ids, params, compute_dtype=jnp.float32))
    assert out_f32.shape == (B, O)
    if not bool(jnp.allclose(out_f32, ref, atol=1e-4, rtol=1e-4)):
        raise AssertionError("f32 Pallas kernel does not match pure-JAX reference")

    # Default path: bf16 MXU operands (f32 accumulation): loose-tolerance check.
    out_bf16 = jax.block_until_ready(rnn_gru_forward(token_ids, params))
    if not bool(jnp.all(jnp.isfinite(out_bf16))):
        raise AssertionError("bf16 Pallas kernel produced non-finite values")
    if not bool(jnp.allclose(out_bf16, ref, atol=2e-1, rtol=2e-1)):
        raise AssertionError("bf16 Pallas kernel diverged from reference")

    print("KERNEL_OK")
</pallas_src>

<mosaic_0001>
module attributes {stable_mosaic.version = 11 : i64} {
  func.func @gru_mlp_kernel(%arg0: i32, %arg1: memref<8x2x32xf32, #tpu.memory_space<vmem>>, %arg2: memref<32x768xf32, #tpu.memory_space<vmem>>, %arg3: memref<1x768xf32, #tpu.memory_space<vmem>>, %arg4: memref<128x384xf32, #tpu.memory_space<vmem>>, %arg5: memref<1x128xf32, #tpu.memory_space<vmem>>, %arg6: memref<128x384xf32, #tpu.memory_space<vmem>>, %arg7: memref<1x128xf32, #tpu.memory_space<vmem>>, %arg8: memref<128x32xf32, #tpu.memory_space<vmem>>, %arg9: memref<128x32xf32, #tpu.memory_space<vmem>>, %arg10: memref<1x32xf32, #tpu.memory_space<vmem>>, %arg11: memref<32x16xf32, #tpu.memory_space<vmem>>, %arg12: memref<1x16xf32, #tpu.memory_space<vmem>>, %arg13: memref<16x4xf32, #tpu.memory_space<vmem>>, %arg14: memref<1x4xf32, #tpu.memory_space<vmem>>, %arg15: memref<2x4xf32, #tpu.memory_space<vmem>>, %arg16: memref<8x2x768xf32, #tpu.memory_space<vmem>>, %arg17: memref<2x128xf32, #tpu.memory_space<vmem>>, %arg18: memref<2x128xf32, #tpu.memory_space<vmem>>) attributes {dimension_semantics = [#tpu.dimension_semantics<parallel>], iteration_bounds = array<i64: 1>, scalar_prefetch = 0 : i64, scratch_operands = 3 : i64, tpu.core_type = #tpu.core_type<tc>, window_params = [{transform_indices = @transform_0, window_bounds = array<i64: 8, 2, 32>}, {pipeline_mode = #tpu.pipeline_mode<synchronous>, transform_indices = @transform_1, window_bounds = array<i64: 32, 768>}, {pipeline_mode = #tpu.pipeline_mode<synchronous>, transform_indices = @transform_2, window_bounds = array<i64: 1, 768>}, {pipeline_mode = #tpu.pipeline_mode<synchronous>, transform_indices = @transform_3, window_bounds = array<i64: 128, 384>}, {pipeline_mode = #tpu.pipeline_mode<synchronous>, transform_indices = @transform_4, window_bounds = array<i64: 1, 128>}, {pipeline_mode = #tpu.pipeline_mode<synchronous>, transform_indices = @transform_5, window_bounds = array<i64: 128, 384>}, {pipeline_mode = #tpu.pipeline_mode<synchronous>, transform_indices = @transform_6, window_bounds = array<i64: 1, 128>}, {pipeline_mode = #tpu.pipeline_mode<synchronous>, transform_indices = @transform_7, window_bounds = array<i64: 128, 32>}, {pipeline_mode = #tpu.pipeline_mode<synchronous>, transform_indices = @transform_8, window_bounds = array<i64: 128, 32>}, {pipeline_mode = #tpu.pipeline_mode<synchronous>, transform_indices = @transform_9, window_bounds = array<i64: 1, 32>}, {pipeline_mode = #tpu.pipeline_mode<synchronous>, transform_indices = @transform_10, window_bounds = array<i64: 32, 16>}, {pipeline_mode = #tpu.pipeline_mode<synchronous>, transform_indices = @transform_11, window_bounds = array<i64: 1, 16>}, {pipeline_mode = #tpu.pipeline_mode<synchronous>, transform_indices = @transform_12, window_bounds = array<i64: 16, 4>}, {pipeline_mode = #tpu.pipeline_mode<synchronous>, transform_indices = @transform_13, window_bounds = array<i64: 1, 4>}, {transform_indices = @transform_14, window_bounds = array<i64: 2, 4>}]} {
    %c0 = arith.constant 0 : index
    %c0_0 = arith.constant 0 : index
    %c0_1 = arith.constant 0 : index
    %0 = vector.load %arg1[%c0, %c0_0, %c0_1] : memref<8x2x32xf32, #tpu.memory_space<vmem>>, vector<8x2x32xf32>
    %1 = vector.shape_cast %0 : vector<8x2x32xf32> to vector<16x32xf32>
    %c0_2 = arith.constant 0 : index
    %c0_3 = arith.constant 0 : index
    %2 = vector.load %arg2[%c0_2, %c0_3] : memref<32x768xf32, #tpu.memory_space<vmem>>, vector<32x768xf32>
    %cst = arith.constant dense<0.000000e+00> : vector<16x768xf32>
    %3 = tpu.matmul %1, %2, %cst {dimension_numbers = #tpu.dot_dimension_numbers<[1], [0], [0], [1], [0, 0, 1, 1], [], []>} : vector<16x32xf32>, vector<32x768xf32>, vector<16x768xf32> -> vector<16x768xf32>
    %c0_4 = arith.constant 0 : index
    %c0_5 = arith.constant 0 : index
    %4 = vector.load %arg3[%c0_4, %c0_5] : memref<1x768xf32, #tpu.memory_space<vmem>>, vector<1x768xf32>
    %5 = vector.broadcast %4 : vector<1x768xf32> to vector<16x768xf32>
    %6 = arith.addf %3, %5 : vector<16x768xf32>
    %7 = vector.shape_cast %6 : vector<16x768xf32> to vector<8x2x768xf32>
    %c0_6 = arith.constant 0 : index
    %c0_7 = arith.constant 0 : index
    %c0_8 = arith.constant 0 : index
    %8 = vector.load %arg16[%c0_6, %c0_7, %c0_8] : memref<8x2x768xf32, #tpu.memory_space<vmem>>, vector<8x2x768xf32>
    tpu.vector_store %arg16[%c0_6, %c0_7, %c0_8], %7 {strides = array<i32>} : memref<8x2x768xf32, #tpu.memory_space<vmem>>, vector<8x2x768xf32>,
    %c0_9 = arith.constant 0 : index
    %c0_10 = arith.constant 0 : index
    %9 = vector.load %arg4[%c0_9, %c0_10] : memref<128x384xf32, #tpu.memory_space<vmem>>, vector<128x384xf32>
    %c0_11 = arith.constant 0 : index
    %c0_12 = arith.constant 0 : index
    %10 = vector.load %arg6[%c0_11, %c0_12] : memref<128x384xf32, #tpu.memory_space<vmem>>, vector<128x384xf32>
    %c0_13 = arith.constant 0 : index
    %c0_14 = arith.constant 0 : index
    %11 = vector.load %arg5[%c0_13, %c0_14] : memref<1x128xf32, #tpu.memory_space<vmem>>, vector<1x128xf32>
    %12 = vector.shape_cast %11 : vector<1x128xf32> to vector<1x128xf32>
    %13 = vector.broadcast %12 : vector<1x128xf32> to vector<2x128xf32>
    %c0_15 = arith.constant 0 : index
    %c0_16 = arith.constant 0 : index
    %14 = vector.load %arg7[%c0_15, %c0_16] : memref<1x128xf32, #tpu.memory_space<vmem>>, vector<1x128xf32>
    %15 = vector.shape_cast %14 : vector<1x128xf32> to vector<1x128xf32>
    %16 = vector.broadcast %15 : vector<1x128xf32> to vector<2x128xf32>
    %cst_17 = arith.constant 0.000000e+00 : f32
    %17 = vector.broadcast %cst_17 : f32 to vector<2x128xf32>
    %c0_18 = arith.constant 0 : index
    %c0_19 = arith.constant 0 : index
    %18 = vector.load %arg17[%c0_18, %c0_19] : memref<2x128xf32, #tpu.memory_space<vmem>>, vector<2x128xf32>
    tpu.vector_store %arg17[%c0_18, %c0_19], %17 {strides = array<i32>} : memref<2x128xf32, #tpu.memory_space<vmem>>, vector<2x128xf32>,
    %cst_20 = arith.constant 0.000000e+00 : f32
    %19 = vector.broadcast %cst_20 : f32 to vector<2x128xf32>
    %c0_21 = arith.constant 0 : index
    %c0_22 = arith.constant 0 : index
    %20 = vector.load %arg18[%c0_21, %c0_22] : memref<2x128xf32, #tpu.memory_space<vmem>>, vector<2x128xf32>
    tpu.vector_store %arg18[%c0_21, %c0_22], %19 {strides = array<i32>} : memref<2x128xf32, #tpu.memory_space<vmem>>, vector<2x128xf32>,
    %cst_23 = arith.constant 0.000000e+00 : f32
    %21 = vector.broadcast %cst_23 : f32 to vector<2x128xf32>
    %c0_i32 = arith.constant 0 : i32
    %22 = arith.index_cast %c0_i32 : i32 to index
    %c0_24 = arith.constant 0 : index
    %c0_25 = arith.constant 0 : index
    %23 = vector.load %arg16[%22, %c0_24, %c0_25] : memref<8x2x768xf32, #tpu.memory_space<vmem>>, vector<1x2x384xf32>
    %24 = vector.shape_cast %23 : vector<1x2x384xf32> to vector<2x384xf32>
    %c7_i32 = arith.constant 7 : i32
    %25 = arith.subi %c7_i32, %c0_i32 : i32
    %26 = arith.index_cast %25 : i32 to index
    %c0_26 = arith.constant 0 : index
    %c384 = arith.constant 384 : index
    %27 = vector.load %arg16[%26, %c0_26, %c384] : memref<8x2x768xf32, #tpu.memory_space<vmem>>, vector<1x2x384xf32>
    %28 = vector.shape_cast %27 : vector<1x2x384xf32> to vector<2x384xf32>
    %cst_27 = arith.constant dense<0.000000e+00> : vector<2x384xf32>
    %29 = tpu.matmul %21, %9, %cst_27 {dimension_numbers = #tpu.dot_dimension_numbers<[1], [0], [0], [1], [0, 0, 1, 1], [], []>} : vector<2x128xf32>, vector<128x384xf32>, vector<2x384xf32> -> vector<2x384xf32>
    %cst_28 = arith.constant dense<0.000000e+00> : vector<2x384xf32>
    %30 = tpu.matmul %21, %10, %cst_28 {dimension_numbers = #tpu.dot_dimension_numbers<[1], [0], [0], [1], [0, 0, 1, 1], [], []>} : vector<2x128xf32>, vector<128x384xf32>, vector<2x384xf32> -> vector<2x384xf32>
    %31 = vector.extract_strided_slice %24 {offsets = [0, 0], sizes = [2, 128], strides = [1, 1]} : vector<2x384xf32> to vector<2x128xf32>
    %32 = vector.extract_strided_slice %29 {offsets = [0, 0], sizes = [2, 128], strides = [1, 1]} : vector<2x384xf32> to vector<2x128xf32>
    %33 = arith.addf %31, %32 : vector<2x128xf32>
    %34 = arith.negf %33 : vector<2x128xf32>
    %35 = math.exp %34 : vector<2x128xf32>
    %cst_29 = arith.constant 1.000000e+00 : f32
    %36 = vector.broadcast %cst_29 : f32 to vector<2x128xf32>
    %37 = arith.addf %36, %35 : vector<2x128xf32>
    %38 = arith.divf %36, %37 : vector<2x128xf32>
    %39 = vector.extract_strided_slice %24 {offsets = [0, 128], sizes = [2, 128], strides = [1, 1]} : vector<2x384xf32> to vector<2x128xf32>
    %40 = vector.extract_strided_slice %29 {offsets = [0, 128], sizes = [2, 128], strides = [1, 1]} : vector<2x384xf32> to vector<2x128xf32>
    %41 = arith.addf %39, %40 : vector<2x128xf32>
    %42 = arith.negf %41 : vector<2x128xf32>
    %43 = math.exp %42 : vector<2x128xf32>
    %cst_30 = arith.constant 1.000000e+00 : f32
    %44 = vector.broadcast %cst_30 : f32 to vector<2x128xf32>
    %45 = arith.addf %44, %43 : vector<2x128xf32>
    %46 = arith.divf %44, %45 : vector<2x128xf32>
    %47 = vector.extract_strided_slice %24 {offsets = [0, 256], sizes = [2, 128], strides = [1, 1]} : vector<2x384xf32> to vector<2x128xf32>
    %48 = vector.extract_strided_slice %29 {offsets = [0, 256], sizes = [2, 128], strides = [1, 1]} : vector<2x384xf32> to vector<2x128xf32>
    %49 = arith.addf %48, %13 : vector<2x128xf32>
    %50 = arith.mulf %38, %49 : vector<2x128xf32>
    %51 = arith.addf %47, %50 : vector<2x128xf32>
    %52 = math.tanh %51 : vector<2x128xf32>
    %cst_31 = arith.constant 1.000000e+00 : f32
    %53 = vector.broadcast %cst_31 : f32 to vector<2x128xf32>
    %54 = arith.subf %53, %46 : vector<2x128xf32>
    %55 = arith.mulf %54, %52 : vector<2x128xf32>
    %56 = arith.mulf %46, %21 : vector<2x128xf32>
    %57 = arith.addf %55, %56 : vector<2x128xf32>
    %58 = vector.extract_strided_slice %28 {offsets = [0, 0], sizes = [2, 128], strides = [1, 1]} : vector<2x384xf32> to vector<2x128xf32>
    %59 = vector.extract_strided_slice %30 {offsets = [0, 0], sizes = [2, 128], strides = [1, 1]} : vector<2x384xf32> to vector<2x128xf32>
    %60 = arith.addf %58, %59 : vector<2x128xf32>
    %61 = arith.negf %60 : vector<2x128xf32>
    %62 = math.exp %61 : vector<2x128xf32>
    %cst_32 = arith.constant 1.000000e+00 : f32
    %63 = vector.broadcast %cst_32 : f32 to vector<2x128xf32>
    %64 = arith.addf %63, %62 : vector<2x128xf32>
    %65 = arith.divf %63, %64 : vector<2x128xf32>
    %66 = vector.extract_strided_slice %28 {offsets = [0, 128], sizes = [2, 128], strides = [1, 1]} : vector<2x384xf32> to vector<2x128xf32>
    %67 = vector.extract_strided_slice %30 {offsets = [0, 128], sizes = [2, 128], strides = [1, 1]} : vector<2x384xf32> to vector<2x128xf32>
    %68 = arith.addf %66, %67 : vector<2x128xf32>
    %69 = arith.negf %68 : vector<2x128xf32>
    %70 = math.exp %69 : vector<2x128xf32>
    %cst_33 = arith.constant 1.000000e+00 : f32
    %71 = vector.broadcast %cst_33 : f32 to vector<2x128xf32>
    %72 = arith.addf %71, %70 : vector<2x128xf32>
    %73 = arith.divf %71, %72 : vector<2x128xf32>
    %74 = vector.extract_strided_slice %28 {offsets = [0, 256], sizes = [2, 128], strides = [1, 1]} : vector<2x384xf32> to vector<2x128xf32>
    %75 = vector.extract_strided_slice %30 {offsets = [0, 256], sizes = [2, 128], strides = [1, 1]} : vector<2x384xf32> to vector<2x128xf32>
    %76 = arith.addf %75, %16 : vector<2x128xf32>
    %77 = arith.mulf %65, %76 : vector<2x128xf32>
    %78 = arith.addf %74, %77 : vector<2x128xf32>
    %79 = math.tanh %78 : vector<2x128xf32>
    %cst_34 = arith.constant 1.000000e+00 : f32
    %80 = vector.broadcast %cst_34 : f32 to vector<2x128xf32>
    %81 = arith.subf %80, %73 : vector<2x128xf32>
    %82 = arith.mulf %81, %79 : vector<2x128xf32>
    %83 = arith.mulf %73, %21 : vector<2x128xf32>
    %84 = arith.addf %82, %83 : vector<2x128xf32>
    %c0_35 = arith.constant 0 : index
    %c0_36 = arith.constant 0 : index
    %85 = vector.load %arg17[%c0_35, %c0_36] : memref<2x128xf32, #tpu.memory_space<vmem>>, vector<2x128xf32>
    %86 = arith.addf %85, %57 : vector<2x128xf32>
    %c0_37 = arith.constant 0 : index
    %c0_38 = arith.constant 0 : index
    %87 = vector.load %arg17[%c0_37, %c0_38] : memref<2x128xf32, #tpu.memory_space<vmem>>, vector<2x128xf32>
    tpu.vector_store %arg17[%c0_37, %c0_38], %86 {strides = array<i32>} : memref<2x128xf32, #tpu.memory_space<vmem>>, vector<2x128xf32>,
    %c0_39 = arith.constant 0 : index
    %c0_40 = arith.constant 0 : index
    %88 = vector.load %arg18[%c0_39, %c0_40] : memref<2x128xf32, #tpu.memory_space<vmem>>, vector<2x128xf32>
    %89 = arith.addf %88, %84 : vector<2x128xf32>
    %c0_41 = arith.constant 0 : index
    %c0_42 = arith.constant 0 : index
    %90 = vector.load %arg18[%c0_41, %c0_42] : memref<2x128xf32, #tpu.memory_space<vmem>>, vector<2x128xf32>
    tpu.vector_store %arg18[%c0_41, %c0_42], %89 {strides = array<i32>} : memref<2x128xf32, #tpu.memory_space<vmem>>, vector<2x128xf32>,
    %c1_i32 = arith.constant 1 : i32
    %91 = arith.index_cast %c1_i32 : i32 to index
    %c0_43 = arith.constant 0 : index
    %c0_44 = arith.constant 0 : index
    %92 = vector.load %arg16[%91, %c0_43, %c0_44] : memref<8x2x768xf32, #tpu.memory_space<vmem>>, vector<1x2x384xf32>
    %93 = vector.shape_cast %92 : vector<1x2x384xf32> to vector<2x384xf32>
    %c7_i32_45 = arith.constant 7 : i32
    %94 = arith.subi %c7_i32_45, %c1_i32 : i32
    %95 = arith.index_cast %94 : i32 to index
    %c0_46 = arith.constant 0 : index
    %c384_47 = arith.constant 384 : index
    %96 = vector.load %arg16[%95, %c0_46, %c384_47] : memref<8x2x768xf32, #tpu.memory_space<vmem>>, vector<1x2x384xf32>
    %97 = vector.shape_cast %96 : vector<1x2x384xf32> to vector<2x384xf32>
    %cst_48 = arith.constant dense<0.000000e+00> : vector<2x384xf32>
    %98 = tpu.matmul %57, %9, %cst_48 {dimension_numbers = #tpu.dot_dimension_numbers<[1], [0], [0], [1], [0, 0, 1, 1], [], []>} : vector<2x128xf32>, vector<128x384xf32>, vector<2x384xf32> -> vector<2x384xf32>
    %cst_49 = arith.constant dense<0.000000e+00> : vector<2x384xf32>
    %99 = tpu.matmul %84, %10, %cst_49 {dimension_numbers = #tpu.dot_dimension_numbers<[1], [0], [0], [1], [0, 0, 1, 1], [], []>} : vector<2x128xf32>, vector<128x384xf32>, vector<2x384xf32> -> vector<2x384xf32>
    %100 = vector.extract_strided_slice %93 {offsets = [0, 0], sizes = [2, 128], strides = [1, 1]} : vector<2x384xf32> to vector<2x128xf32>
    %101 = vector.extract_strided_slice %98 {offsets = [0, 0], sizes = [2, 128], strides = [1, 1]} : vector<2x384xf32> to vector<2x128xf32>
    %102 = arith.addf %100, %101 : vector<2x128xf32>
    %103 = arith.negf %102 : vector<2x128xf32>
    %104 = math.exp %103 : vector<2x128xf32>
    %cst_50 = arith.constant 1.000000e+00 : f32
    %105 = vector.broadcast %cst_50 : f32 to vector<2x128xf32>
    %106 = arith.addf %105, %104 : vector<2x128xf32>
    %107 = arith.divf %105, %106 : vector<2x128xf32>
    %108 = vector.extract_strided_slice %93 {offsets = [0, 128], sizes = [2, 128], strides = [1, 1]} : vector<2x384xf32> to vector<2x128xf32>
    %109 = vector.extract_strided_slice %98 {offsets = [0, 128], sizes = [2, 128], strides = [1, 1]} : vector<2x384xf32> to vector<2x128xf32>
    %110 = arith.addf %108, %109 : vector<2x128xf32>
    %111 = arith.negf %110 : vector<2x128xf32>
    %112 = math.exp %111 : vector<2x128xf32>
    %cst_51 = arith.constant 1.000000e+00 : f32
    %113 = vector.broadcast %cst_51 : f32 to vector<2x128xf32>
    %114 = arith.addf %113, %112 : vector<2x128xf32>
    %115 = arith.divf %113, %114 : vector<2x128xf32>
    %116 = vector.extract_strided_slice %93 {offsets = [0, 256], sizes = [2, 128], strides = [1, 1]} : vector<2x384xf32> to vector<2x128xf32>
    %117 = vector.extract_strided_slice %98 {offsets = [0, 256], sizes = [2, 128], strides = [1, 1]} : vector<2x384xf32> to vector<2x128xf32>
    %118 = arith.addf %117, %13 : vector<2x128xf32>
    %119 = arith.mulf %107, %118 : vector<2x128xf32>
    %120 = arith.addf %116, %119 : vector<2x128xf32>
    %121 = math.tanh %120 : vector<2x128xf32>
    %cst_52 = arith.constant 1.000000e+00 : f32
    %122 = vector.broadcast %cst_52 : f32 to vector<2x128xf32>
    %123 = arith.subf %122, %115 : vector<2x128xf32>
    %124 = arith.mulf %123, %121 : vector<2x128xf32>
    %125 = arith.mulf %115, %57 : vector<2x128xf32>
    %126 = arith.addf %124, %125 : vector<2x128xf32>
    %127 = vector.extract_strided_slice %97 {offsets = [0, 0], sizes = [2, 128], strides = [1, 1]} : vector<2x384xf32> to vector<2x128xf32>
    %128 = vector.extract_strided_slice %99 {offsets = [0, 0], sizes = [2, 128], strides = [1, 1]} : vector<2x384xf32> to vector<2x128xf32>
    %129 = arith.addf %127, %128 : vector<2x128xf32>
    %130 = arith.negf %129 : vector<2x128xf32>
    %131 = math.exp %130 : vector<2x128xf32>
    %cst_53 = arith.constant 1.000000e+00 : f32
    %132 = vector.broadcast %cst_53 : f32 to vector<2x128xf32>
    %133 = arith.addf %132, %131 : vector<2x128xf32>
    %134 = arith.divf %132, %133 : vector<2x128xf32>
    %135 = vector.extract_strided_slice %97 {offsets = [0, 128], sizes = [2, 128], strides = [1, 1]} : vector<2x384xf32> to vector<2x128xf32>
    %136 = vector.extract_strided_slice %99 {offsets = [0, 128], sizes = [2, 128], strides = [1, 1]} : vector<2x384xf32> to vector<2x128xf32>
    %137 = arith.addf %135, %136 : vector<2x128xf32>
    %138 = arith.negf %137 : vector<2x128xf32>
    %139 = math.exp %138 : vector<2x128xf32>
    %cst_54 = arith.constant 1.000000e+00 : f32
    %140 = vector.broadcast %cst_54 : f32 to vector<2x128xf32>
    %141 = arith.addf %140, %139 : vector<2x128xf32>
    %142 = arith.divf %140, %141 : vector<2x128xf32>
    %143 = vector.extract_strided_slice %97 {offsets = [0, 256], sizes = [2, 128], strides = [1, 1]} : vector<2x384xf32> to vector<2x128xf32>
    %144 = vector.extract_strided_slice %99 {offsets = [0, 256], sizes = [2, 128], strides = [1, 1]} : vector<2x384xf32> to vector<2x128xf32>
    %145 = arith.addf %144, %16 : vector<2x128xf32>
    %146 = arith.mulf %134, %145 : vector<2x128xf32>
    %147 = arith.addf %143, %146 : vector<2x128xf32>
    %148 = math.tanh %147 : vector<2x128xf32>
    %cst_55 = arith.constant 1.000000e+00 : f32
    %149 = vector.broadcast %cst_55 : f32 to vector<2x128xf32>
    %150 = arith.subf %149, %142 : vector<2x128xf32>
    %151 = arith.mulf %150, %148 : vector<2x128xf32>
    %152 = arith.mulf %142, %84 : vector<2x128xf32>
    %153 = arith.addf %151, %152 : vector<2x128xf32>
    %c0_56 = arith.constant 0 : index
    %c0_57 = arith.constant 0 : index
    %154 = vector.load %arg17[%c0_56, %c0_57] : memref<2x128xf32, #tpu.memory_space<vmem>>, vector<2x128xf32>
    %155 = arith.addf %154, %126 : vector<2x128xf32>
    %c0_58 = arith.constant 0 : index
    %c0_59 = arith.constant 0 : index
    %156 = vector.load %arg17[%c0_58, %c0_59] : memref<2x128xf32, #tpu.memory_space<vmem>>, vector<2x128xf32>
    tpu.vector_store %arg17[%c0_58, %c0_59], %155 {strides = array<i32>} : memref<2x128xf32, #tpu.memory_space<vmem>>, vector<2x128xf32>,
    %c0_60 = arith.constant 0 : index
    %c0_61 = arith.constant 0 : index
    %157 = vector.load %arg18[%c0_60, %c0_61] : memref<2x128xf32, #tpu.memory_space<vmem>>, vector<2x128xf32>
    %158 = arith.addf %157, %153 : vector<2x128xf32>
    %c0_62 = arith.constant 0 : index
    %c0_63 = arith.constant 0 : index
    %159 = vector.load %arg18[%c0_62, %c0_63] : memref<2x128xf32, #tpu.memory_space<vmem>>, vector<2x128xf32>
    tpu.vector_store %arg18[%c0_62, %c0_63], %158 {strides = array<i32>} : memref<2x128xf32, #tpu.memory_space<vmem>>, vector<2x128xf32>,
    %c2_i32 = arith.constant 2 : i32
    %160 = arith.index_cast %c2_i32 : i32 to index
    %c0_64 = arith.constant 0 : index
    %c0_65 = arith.constant 0 : index
    %161 = vector.load %arg16[%160, %c0_64, %c0_65] : memref<8x2x768xf32, #tpu.memory_space<vmem>>, vector<1x2x384xf32>
    %162 = vector.shape_cast %161 : vector<1x2x384xf32> to vector<2x384xf32>
    %c7_i32_66 = arith.constant 7 : i32
    %163 = arith.subi %c7_i32_66, %c2_i32 : i32
    %164 = arith.index_cast %163 : i32 to index
    %c0_67 = arith.constant 0 : index
    %c384_68 = arith.constant 384 : index
    %165 = vector.load %arg16[%164, %c0_67, %c384_68] : memref<8x2x768xf32, #tpu.memory_space<vmem>>, vector<1x2x384xf32>
    %166 = vector.shape_cast %165 : vector<1x2x384xf32> to vector<2x384xf32>
    %cst_69 = arith.constant dense<0.000000e+00> : vector<2x384xf32>
    %167 = tpu.matmul %126, %9, %cst_69 {dimension_numbers = #tpu.dot_dimension_numbers<[1], [0], [0], [1], [0, 0, 1, 1], [], []>} : vector<2x128xf32>, vector<128x384xf32>, vector<2x384xf32> -> vector<2x384xf32>
    %cst_70 = arith.constant dense<0.000000e+00> : vector<2x384xf32>
    %168 = tpu.matmul %153, %10, %cst_70 {dimension_numbers = #tpu.dot_dimension_numbers<[1], [0], [0], [1], [0, 0, 1, 1], [], []>} : vector<2x128xf32>, vector<128x384xf32>, vector<2x384xf32> -> vector<2x384xf32>
    %169 = vector.extract_strided_slice %162 {offsets = [0, 0], sizes = [2, 128], strides = [1, 1]} : vector<2x384xf32> to vector<2x128xf32>
    %170 = vector.extract_strided_slice %167 {offsets = [0, 0], sizes = [2, 128], strides = [1, 1]} : vector<2x384xf32> to vector<2x128xf32>
    %171 = arith.addf %169, %170 : vector<2x128xf32>
    %172 = arith.negf %171 : vector<2x128xf32>
    %173 = math.exp %172 : vector<2x128xf32>
    %cst_71 = arith.constant 1.000000e+00 : f32
    %174 = vector.broadcast %cst_71 : f32 to vector<2x128xf32>
    %175 = arith.addf %174, %173 : vector<2x128xf32>
    %176 = arith.divf %174, %175 : vector<2x128xf32>
    %177 = vector.extract_strided_slice %162 {offsets = [0, 128], sizes = [2, 128], strides = [1, 1]} : vector<2x384xf32> to vector<2x128xf32>
    %178 = vector.extract_strided_slice %167 {offsets = [0, 128], sizes = [2, 128], strides = [1, 1]} : vector<2x384xf32> to vector<2x128xf32>
    %179 = arith.addf %177, %178 : vector<2x128xf32>
    %180 = arith.negf %179 : vector<2x128xf32>
    %181 = math.exp %180 : vector<2x128xf32>
    %cst_72 = arith.constant 1.000000e+00 : f32
    %182 = vector.broadcast %cst_72 : f32 to vector<2x128xf32>
    %183 = arith.addf %182, %181 : vector<2x128xf32>
    %184 = arith.divf %182, %183 : vector<2x128xf32>
    %185 = vector.extract_strided_slice %162 {offsets = [0, 256], sizes = [2, 128], strides = [1, 1]} : vector<2x384xf32> to vector<2x128xf32>
    %186 = vector.extract_strided_slice %167 {offsets = [0, 256], sizes = [2, 128], strides = [1, 1]} : vector<2x384xf32> to vector<2x128xf32>
    %187 = arith.addf %186, %13 : vector<2x128xf32>
    %188 = arith.mulf %176, %187 : vector<2x128xf32>
    %189 = arith.addf %185, %188 : vector<2x128xf32>
    %190 = math.tanh %189 : vector<2x128xf32>
    %cst_73 = arith.constant 1.000000e+00 : f32
    %191 = vector.broadcast %cst_73 : f32 to vector<2x128xf32>
    %192 = arith.subf %191, %184 : vector<2x128xf32>
    %193 = arith.mulf %192, %190 : vector<2x128xf32>
    %194 = arith.mulf %184, %126 : vector<2x128xf32>
    %195 = arith.addf %193, %194 : vector<2x128xf32>
    %196 = vector.extract_strided_slice %166 {offsets = [0, 0], sizes = [2, 128], strides = [1, 1]} : vector<2x384xf32> to vector<2x128xf32>
    %197 = vector.extract_strided_slice %168 {offsets = [0, 0], sizes = [2, 128], strides = [1, 1]} : vector<2x384xf32> to vector<2x128xf32>
    %198 = arith.addf %196, %197 : vector<2x128xf32>
    %199 = arith.negf %198 : vector<2x128xf32>
    %200 = math.exp %199 : vector<2x128xf32>
    %cst_74 = arith.constant 1.000000e+00 : f32
    %201 = vector.broadcast %cst_74 : f32 to vector<2x128xf32>
    %202 = arith.addf %201, %200 : vector<2x128xf32>
    %203 = arith.divf %201, %202 : vector<2x128xf32>
    %204 = vector.extract_strided_slice %166 {offsets = [0, 128], sizes = [2, 128], strides = [1, 1]} : vector<2x384xf32> to vector<2x128xf32>
    %205 = vector.extract_strided_slice %168 {offsets = [0, 128], sizes = [2, 128], strides = [1, 1]} : vector<2x384xf32> to vector<2x128xf32>
    %206 = arith.addf %204, %205 : vector<2x128xf32>
    %207 = arith.negf %206 : vector<2x128xf32>
    %208 = math.exp %207 : vector<2x128xf32>
    %cst_75 = arith.constant 1.000000e+00 : f32
    %209 = vector.broadcast %cst_75 : f32 to vector<2x128xf32>
    %210 = arith.addf %209, %208 : vector<2x128xf32>
    %211 = arith.divf %209, %210 : vector<2x128xf32>
    %212 = vector.extract_strided_slice %166 {offsets = [0, 256], sizes = [2, 128], strides = [1, 1]} : vector<2x384xf32> to vector<2x128xf32>
    %213 = vector.extract_strided_slice %168 {offsets = [0, 256], sizes = [2, 128], strides = [1, 1]} : vector<2x384xf32> to vector<2x128xf32>
    %214 = arith.addf %213, %16 : vector<2x128xf32>
    %215 = arith.mulf %203, %214 : vector<2x128xf32>
    %216 = arith.addf %212, %215 : vector<2x128xf32>
    %217 = math.tanh %216 : vector<2x128xf32>
    %cst_76 = arith.constant 1.000000e+00 : f32
    %218 = vector.broadcast %cst_76 : f32 to vector<2x128xf32>
    %219 = arith.subf %218, %211 : vector<2x128xf32>
    %220 = arith.mulf %219, %217 : vector<2x128xf32>
    %221 = arith.mulf %211, %153 : vector<2x128xf32>
    %222 = arith.addf %220, %221 : vector<2x128xf32>
    %c0_77 = arith.constant 0 : index
    %c0_78 = arith.constant 0 : index
    %223 = vector.load %arg17[%c0_77, %c0_78] : memref<2x128xf32, #tpu.memory_space<vmem>>, vector<2x128xf32>
    %224 = arith.addf %223, %195 : vector<2x128xf32>
    %c0_79 = arith.constant 0 : index
    %c0_80 = arith.constant 0 : index
    %225 = vector.load %arg17[%c0_79, %c0_80] : memref<2x128xf32, #tpu.memory_space<vmem>>, vector<2x128xf32>
    tpu.vector_store %arg17[%c0_79, %c0_80], %224 {strides = array<i32>} : memref<2x128xf32, #tpu.memory_space<vmem>>, vector<2x128xf32>,
    %c0_81 = arith.constant 0 : index
    %c0_82 = arith.constant 0 : index
    %226 = vector.load %arg18[%c0_81, %c0_82] : memref<2x128xf32, #tpu.memory_space<vmem>>, vector<2x128xf32>
    %227 = arith.addf %226, %222 : vector<2x128xf32>
    %c0_83 = arith.constant 0 : index
    %c0_84 = arith.constant 0 : index
    %228 = vector.load %arg18[%c0_83, %c0_84] : memref<2x128xf32, #tpu.memory_space<vmem>>, vector<2x128xf32>
    tpu.vector_store %arg18[%c0_83, %c0_84], %227 {strides = array<i32>} : memref<2x128xf32, #tpu.memory_space<vmem>>, vector<2x128xf32>,
    %c3_i32 = arith.constant 3 : i32
    %229 = arith.index_cast %c3_i32 : i32 to index
    %c0_85 = arith.constant 0 : index
    %c0_86 = arith.constant 0 : index
    %230 = vector.load %arg16[%229, %c0_85, %c0_86] : memref<8x2x768xf32, #tpu.memory_space<vmem>>, vector<1x2x384xf32>
    %231 = vector.shape_cast %230 : vector<1x2x384xf32> to vector<2x384xf32>
    %c7_i32_87 = arith.constant 7 : i32
    %232 = arith.subi %c7_i32_87, %c3_i32 : i32
    %233 = arith.index_cast %232 : i32 to index
    %c0_88 = arith.constant 0 : index
    %c384_89 = arith.constant 384 : index
    %234 = vector.load %arg16[%233, %c0_88, %c384_89] : memref<8x2x768xf32, #tpu.memory_space<vmem>>, vector<1x2x384xf32>
    %235 = vector.shape_cast %234 : vector<1x2x384xf32> to vector<2x384xf32>
    %cst_90 = arith.constant dense<0.000000e+00> : vector<2x384xf32>
    %236 = tpu.matmul %195, %9, %cst_90 {dimension_numbers = #tpu.dot_dimension_numbers<[1], [0], [0], [1], [0, 0, 1, 1], [], []>} : vector<2x128xf32>, vector<128x384xf32>, vector<2x384xf32> -> vector<2x384xf32>
    %cst_91 = arith.constant dense<0.000000e+00> : vector<2x384xf32>
    %237 = tpu.matmul %222, %10, %cst_91 {dimension_numbers = #tpu.dot_dimension_numbers<[1], [0], [0], [1], [0, 0, 1, 1], [], []>} : vector<2x128xf32>, vector<128x384xf32>, vector<2x384xf32> -> vector<2x384xf32>
    %238 = vector.extract_strided_slice %231 {offsets = [0, 0], sizes = [2, 128], strides = [1, 1]} : vector<2x384xf32> to vector<2x128xf32>
    %239 = vector.extract_strided_slice %236 {offsets = [0, 0], sizes = [2, 128], strides = [1, 1]} : vector<2x384xf32> to vector<2x128xf32>
    %240 = arith.addf %238, %239 : vector<2x128xf32>
    %241 = arith.negf %240 : vector<2x128xf32>
    %242 = math.exp %241 : vector<2x128xf32>
    %cst_92 = arith.constant 1.000000e+00 : f32
    %243 = vector.broadcast %cst_92 : f32 to vector<2x128xf32>
    %244 = arith.addf %243, %242 : vector<2x128xf32>
    %245 = arith.divf %243, %244 : vector<2x128xf32>
    %246 = vector.extract_strided_slice %231 {offsets = [0, 128], sizes = [2, 128], strides = [1, 1]} : vector<2x384xf32> to vector<2x128xf32>
    %247 = vector.extract_strided_slice %236 {offsets = [0, 128], sizes = [2, 128], strides = [1, 1]} : vector<2x384xf32> to vector<2x128xf32>
    %248 = arith.addf %246, %247 : vector<2x128xf32>
    %249 = arith.negf %248 : vector<2x128xf32>
    %250 = math.exp %249 : vector<2x128xf32>
    %cst_93 = arith.constant 1.000000e+00 : f32
    %251 = vector.broadcast %cst_93 : f32 to vector<2x128xf32>
    %252 = arith.addf %251, %250 : vector<2x128xf32>
    %253 = arith.divf %251, %252 : vector<2x128xf32>
    %254 = vector.extract_strided_slice %231 {offsets = [0, 256], sizes = [2, 128], strides = [1, 1]} : vector<2x384xf32> to vector<2x128xf32>
    %255 = vector.extract_strided_slice %236 {offsets = [0, 256], sizes = [2, 128], strides = [1, 1]} : vector<2x384xf32> to vector<2x128xf32>
    %256 = arith.addf %255, %13 : vector<2x128xf32>
    %257 = arith.mulf %245, %256 : vector<2x128xf32>
    %258 = arith.addf %254, %257 : vector<2x128xf32>
    %259 = math.tanh %258 : vector<2x128xf32>
    %cst_94 = arith.constant 1.000000e+00 : f32
    %260 = vector.broadcast %cst_94 : f32 to vector<2x128xf32>
    %261 = arith.subf %260, %253 : vector<2x128xf32>
    %262 = arith.mulf %261, %259 : vector<2x128xf32>
    %263 = arith.mulf %253, %195 : vector<2x128xf32>
    %264 = arith.addf %262, %263 : vector<2x128xf32>
    %265 = vector.extract_strided_slice %235 {offsets = [0, 0], sizes = [2, 128], strides = [1, 1]} : vector<2x384xf32> to vector<2x128xf32>
    %266 = vector.extract_strided_slice %237 {offsets = [0, 0], sizes = [2, 128], strides = [1, 1]} : vector<2x384xf32> to vector<2x128xf32>
    %267 = arith.addf %265, %266 : vector<2x128xf32>
    %268 = arith.negf %267 : vector<2x128xf32>
    %269 = math.exp %268 : vector<2x128xf32>
    %cst_95 = arith.constant 1.000000e+00 : f32
    %270 = vector.broadcast %cst_95 : f32 to vector<2x128xf32>
    %271 = arith.addf %270, %269 : vector<2x128xf32>
    %272 = arith.divf %270, %271 : vector<2x128xf32>
    %273 = vector.extract_strided_slice %235 {offsets = [0, 128], sizes = [2, 128], strides = [1, 1]} : vector<2x384xf32> to vector<2x128xf32>
    %274 = vector.extract_strided_slice %237 {offsets = [0, 128], sizes = [2, 128], strides = [1, 1]} : vector<2x384xf32> to vector<2x128xf32>
    %275 = arith.addf %273, %274 : vector<2x128xf32>
    %276 = arith.negf %275 : vector<2x128xf32>
    %277 = math.exp %276 : vector<2x128xf32>
    %cst_96 = arith.constant 1.000000e+00 : f32
    %278 = vector.broadcast %cst_96 : f32 to vector<2x128xf32>
    %279 = arith.addf %278, %277 : vector<2x128xf32>
    %280 = arith.divf %278, %279 : vector<2x128xf32>
    %281 = vector.extract_strided_slice %235 {offsets = [0, 256], sizes = [2, 128], strides = [1, 1]} : vector<2x384xf32> to vector<2x128xf32>
    %282 = vector.extract_strided_slice %237 {offsets = [0, 256], sizes = [2, 128], strides = [1, 1]} : vector<2x384xf32> to vector<2x128xf32>
    %283 = arith.addf %282, %16 : vector<2x128xf32>
    %284 = arith.mulf %272, %283 : vector<2x128xf32>
    %285 = arith.addf %281, %284 : vector<2x128xf32>
    %286 = math.tanh %285 : vector<2x128xf32>
    %cst_97 = arith.constant 1.000000e+00 : f32
    %287 = vector.broadcast %cst_97 : f32 to vector<2x128xf32>
    %288 = arith.subf %287, %280 : vector<2x128xf32>
    %289 = arith.mulf %288, %286 : vector<2x128xf32>
    %290 = arith.mulf %280, %222 : vector<2x128xf32>
    %291 = arith.addf %289, %290 : vector<2x128xf32>
    %c0_98 = arith.constant 0 : index
    %c0_99 = arith.constant 0 : index
    %292 = vector.load %arg17[%c0_98, %c0_99] : memref<2x128xf32, #tpu.memory_space<vmem>>, vector<2x128xf32>
    %293 = arith.addf %292, %264 : vector<2x128xf32>
    %c0_100 = arith.constant 0 : index
    %c0_101 = arith.constant 0 : index
    %294 = vector.load %arg17[%c0_100, %c0_101] : memref<2x128xf32, #tpu.memory_space<vmem>>, vector<2x128xf32>
    tpu.vector_store %arg17[%c0_100, %c0_101], %293 {strides = array<i32>} : memref<2x128xf32, #tpu.memory_space<vmem>>, vector<2x128xf32>,
    %c0_102 = arith.constant 0 : index
    %c0_103 = arith.constant 0 : index
    %295 = vector.load %arg18[%c0_102, %c0_103] : memref<2x128xf32, #tpu.memory_space<vmem>>, vector<2x128xf32>
    %296 = arith.addf %295, %291 : vector<2x128xf32>
    %c0_104 = arith.constant 0 : index
    %c0_105 = arith.constant 0 : index
    %297 = vector.load %arg18[%c0_104, %c0_105] : memref<2x128xf32, #tpu.memory_space<vmem>>, vector<2x128xf32>
    tpu.vector_store %arg18[%c0_104, %c0_105], %296 {strides = array<i32>} : memref<2x128xf32, #tpu.memory_space<vmem>>, vector<2x128xf32>,
    %c4_i32 = arith.constant 4 : i32
    %298 = arith.index_cast %c4_i32 : i32 to index
    %c0_106 = arith.constant 0 : index
    %c0_107 = arith.constant 0 : index
    %299 = vector.load %arg16[%298, %c0_106, %c0_107] : memref<8x2x768xf32, #tpu.memory_space<vmem>>, vector<1x2x384xf32>
    %300 = vector.shape_cast %299 : vector<1x2x384xf32> to vector<2x384xf32>
    %c7_i32_108 = arith.constant 7 : i32
    %301 = arith.subi %c7_i32_108, %c4_i32 : i32
    %302 = arith.index_cast %301 : i32 to index
    %c0_109 = arith.constant 0 : index
    %c384_110 = arith.constant 384 : index
    %303 = vector.load %arg16[%302, %c0_109, %c384_110] : memref<8x2x768xf32, #tpu.memory_space<vmem>>, vector<1x2x384xf32>
    %304 = vector.shape_cast %303 : vector<1x2x384xf32> to vector<2x384xf32>
    %cst_111 = arith.constant dense<0.000000e+00> : vector<2x384xf32>
    %305 = tpu.matmul %264, %9, %cst_111 {dimension_numbers = #tpu.dot_dimension_numbers<[1], [0], [0], [1], [0, 0, 1, 1], [], []>} : vector<2x128xf32>, vector<128x384xf32>, vector<2x384xf32> -> vector<2x384xf32>
    %cst_112 = arith.constant dense<0.000000e+00> : vector<2x384xf32>
    %306 = tpu.matmul %291, %10, %cst_112 {dimension_numbers = #tpu.dot_dimension_numbers<[1], [0], [0], [1], [0, 0, 1, 1], [], []>} : vector<2x128xf32>, vector<128x384xf32>, vector<2x384xf32> -> vector<2x384xf32>
    %307 = vector.extract_strided_slice %300 {offsets = [0, 0], sizes = [2, 128], strides = [1, 1]} : vector<2x384xf32> to vector<2x128xf32>
    %308 = vector.extract_strided_slice %305 {offsets = [0, 0], sizes = [2, 128], strides = [1, 1]} : vector<2x384xf32> to vector<2x128xf32>
    %309 = arith.addf %307, %308 : vector<2x128xf32>
    %310 = arith.negf %309 : vector<2x128xf32>
    %311 = math.exp %310 : vector<2x128xf32>
    %cst_113 = arith.constant 1.000000e+00 : f32
    %312 = vector.broadcast %cst_113 : f32 to vector<2x128xf32>
    %313 = arith.addf %312, %311 : vector<2x128xf32>
    %314 = arith.divf %312, %313 : vector<2x128xf32>
    %315 = vector.extract_strided_slice %300 {offsets = [0, 128], sizes = [2, 128], strides = [1, 1]} : vector<2x384xf32> to vector<2x128xf32>
    %316 = vector.extract_strided_slice %305 {offsets = [0, 128], sizes = [2, 128], strides = [1, 1]} : vector<2x384xf32> to vector<2x128xf32>
    %317 = arith.addf %315, %316 : vector<2x128xf32>
    %318 = arith.negf %317 : vector<2x128xf32>
    %319 = math.exp %318 : vector<2x128xf32>
    %cst_114 = arith.constant 1.000000e+00 : f32
    %320 = vector.broadcast %cst_114 : f32 to vector<2x128xf32>
    %321 = arith.addf %320, %319 : vector<2x128xf32>
    %322 = arith.divf %320, %321 : vector<2x128xf32>
    %323 = vector.extract_strided_slice %300 {offsets = [0, 256], sizes = [2, 128], strides = [1, 1]} : vector<2x384xf32> to vector<2x128xf32>
    %324 = vector.extract_strided_slice %305 {offsets = [0, 256], sizes = [2, 128], strides = [1, 1]} : vector<2x384xf32> to vector<2x128xf32>
    %325 = arith.addf %324, %13 : vector<2x128xf32>
    %326 = arith.mulf %314, %325 : vector<2x128xf32>
    %327 = arith.addf %323, %326 : vector<2x128xf32>
    %328 = math.tanh %327 : vector<2x128xf32>
    %cst_115 = arith.constant 1.000000e+00 : f32
    %329 = vector.broadcast %cst_115 : f32 to vector<2x128xf32>
    %330 = arith.subf %329, %322 : vector<2x128xf32>
    %331 = arith.mulf %330, %328 : vector<2x128xf32>
    %332 = arith.mulf %322, %264 : vector<2x128xf32>
    %333 = arith.addf %331, %332 : vector<2x128xf32>
    %334 = vector.extract_strided_slice %304 {offsets = [0, 0], sizes = [2, 128], strides = [1, 1]} : vector<2x384xf32> to vector<2x128xf32>
    %335 = vector.extract_strided_slice %306 {offsets = [0, 0], sizes = [2, 128], strides = [1, 1]} : vector<2x384xf32> to vector<2x128xf32>
    %336 = arith.addf %334, %335 : vector<2x128xf32>
    %337 = arith.negf %336 : vector<2x128xf32>
    %338 = math.exp %337 : vector<2x128xf32>
    %cst_116 = arith.constant 1.000000e+00 : f32
    %339 = vector.broadcast %cst_116 : f32 to vector<2x128xf32>
    %340 = arith.addf %339, %338 : vector<2x128xf32>
    %341 = arith.divf %339, %340 : vector<2x128xf32>
    %342 = vector.extract_strided_slice %304 {offsets = [0, 128], sizes = [2, 128], strides = [1, 1]} : vector<2x384xf32> to vector<2x128xf32>
    %343 = vector.extract_strided_slice %306 {offsets = [0, 128], sizes = [2, 128], strides = [1, 1]} : vector<2x384xf32> to vector<2x128xf32>
    %344 = arith.addf %342, %343 : vector<2x128xf32>
    %345 = arith.negf %344 : vector<2x128xf32>
    %346 = math.exp %345 : vector<2x128xf32>
    %cst_117 = arith.constant 1.000000e+00 : f32
    %347 = vector.broadcast %cst_117 : f32 to vector<2x128xf32>
    %348 = arith.addf %347, %346 : vector<2x128xf32>
    %349 = arith.divf %347, %348 : vector<2x128xf32>
    %350 = vector.extract_strided_slice %304 {offsets = [0, 256], sizes = [2, 128], strides = [1, 1]} : vector<2x384xf32> to vector<2x128xf32>
    %351 = vector.extract_strided_slice %306 {offsets = [0, 256], sizes = [2, 128], strides = [1, 1]} : vector<2x384xf32> to vector<2x128xf32>
    %352 = arith.addf %351, %16 : vector<2x128xf32>
    %353 = arith.mulf %341, %352 : vector<2x128xf32>
    %354 = arith.addf %350, %353 : vector<2x128xf32>
    %355 = math.tanh %354 : vector<2x128xf32>
    %cst_118 = arith.constant 1.000000e+00 : f32
    %356 = vector.broadcast %cst_118 : f32 to vector<2x128xf32>
    %357 = arith.subf %356, %349 : vector<2x128xf32>
    %358 = arith.mulf %357, %355 : vector<2x128xf32>
    %359 = arith.mulf %349, %291 : vector<2x128xf32>
    %360 = arith.addf %358, %359 : vector<2x128xf32>
    %c0_119 = arith.constant 0 : index
    %c0_120 = arith.constant 0 : index
    %361 = vector.load %arg17[%c0_119, %c0_120] : memref<2x128xf32, #tpu.memory_space<vmem>>, vector<2x128xf32>
    %362 = arith.addf %361, %333 : vector<2x128xf32>
    %c0_121 = arith.constant 0 : index
    %c0_122 = arith.constant 0 : index
    %363 = vector.load %arg17[%c0_121, %c0_122] : memref<2x128xf32, #tpu.memory_space<vmem>>, vector<2x128xf32>
    tpu.vector_store %arg17[%c0_121, %c0_122], %362 {strides = array<i32>} : memref<2x128xf32, #tpu.memory_space<vmem>>, vector<2x128xf32>,
    %c0_123 = arith.constant 0 : index
    %c0_124 = arith.constant 0 : index
    %364 = vector.load %arg18[%c0_123, %c0_124] : memref<2x128xf32, #tpu.memory_space<vmem>>, vector<2x128xf32>
    %365 = arith.addf %364, %360 : vector<2x128xf32>
    %c0_125 = arith.constant 0 : index
    %c0_126 = arith.constant 0 : index
    %366 = vector.load %arg18[%c0_125, %c0_126] : memref<2x128xf32, #tpu.memory_space<vmem>>, vector<2x128xf32>
    tpu.vector_store %arg18[%c0_125, %c0_126], %365 {strides = array<i32>} : memref<2x128xf32, #tpu.memory_space<vmem>>, vector<2x128xf32>,
    %c5_i32 = arith.constant 5 : i32
    %367 = arith.index_cast %c5_i32 : i32 to index
    %c0_127 = arith.constant 0 : index
    %c0_128 = arith.constant 0 : index
    %368 = vector.load %arg16[%367, %c0_127, %c0_128] : memref<8x2x768xf32, #tpu.memory_space<vmem>>, vector<1x2x384xf32>
    %369 = vector.shape_cast %368 : vector<1x2x384xf32> to vector<2x384xf32>
    %c7_i32_129 = arith.constant 7 : i32
    %370 = arith.subi %c7_i32_129, %c5_i32 : i32
    %371 = arith.index_cast %370 : i32 to index
    %c0_130 = arith.constant 0 : index
    %c384_131 = arith.constant 384 : index
    %372 = vector.load %arg16[%371, %c0_130, %c384_131] : memref<8x2x768xf32, #tpu.memory_space<vmem>>, vector<1x2x384xf32>
    %373 = vector.shape_cast %372 : vector<1x2x384xf32> to vector<2x384xf32>
    %cst_132 = arith.constant dense<0.000000e+00> : vector<2x384xf32>
    %374 = tpu.matmul %333, %9, %cst_132 {dimension_numbers = #tpu.dot_dimension_numbers<[1], [0], [0], [1], [0, 0, 1, 1], [], []>} : vector<2x128xf32>, vector<128x384xf32>, vector<2x384xf32> -> vector<2x384xf32>
    %cst_133 = arith.constant dense<0.000000e+00> : vector<2x384xf32>
    %375 = tpu.matmul %360, %10, %cst_133 {dimension_numbers = #tpu.dot_dimension_numbers<[1], [0], [0], [1], [0, 0, 1, 1], [], []>} : vector<2x128xf32>, vector<128x384xf32>, vector<2x384xf32> -> vector<2x384xf32>
    %376 = vector.extract_strided_slice %369 {offsets = [0, 0], sizes = [2, 128], strides = [1, 1]} : vector<2x384xf32> to vector<2x128xf32>
    %377 = vector.extract_strided_slice %374 {offsets = [0, 0], sizes = [2, 128], strides = [1, 1]} : vector<2x384xf32> to vector<2x128xf32>
    %378 = arith.addf %376, %377 : vector<2x128xf32>
    %379 = arith.negf %378 : vector<2x128xf32>
    %380 = math.exp %379 : vector<2x128xf32>
    %cst_134 = arith.constant 1.000000e+00 : f32
    %381 = vector.broadcast %cst_134 : f32 to vector<2x128xf32>
    %382 = arith.addf %381, %380 : vector<2x128xf32>
    %383 = arith.divf %381, %382 : vector<2x128xf32>
    %384 = vector.extract_strided_slice %369 {offsets = [0, 128], sizes = [2, 128], strides = [1, 1]} : vector<2x384xf32> to vector<2x128xf32>
    %385 = vector.extract_strided_slice %374 {offsets = [0, 128], sizes = [2, 128], strides = [1, 1]} : vector<2x384xf32> to vector<2x128xf32>
    %386 = arith.addf %384, %385 : vector<2x128xf32>
    %387 = arith.negf %386 : vector<2x128xf32>
    %388 = math.exp %387 : vector<2x128xf32>
    %cst_135 = arith.constant 1.000000e+00 : f32
    %389 = vector.broadcast %cst_135 : f32 to vector<2x128xf32>
    %390 = arith.addf %389, %388 : vector<2x128xf32>
    %391 = arith.divf %389, %390 : vector<2x128xf32>
    %392 = vector.extract_strided_slice %369 {offsets = [0, 256], sizes = [2, 128], strides = [1, 1]} : vector<2x384xf32> to vector<2x128xf32>
    %393 = vector.extract_strided_slice %374 {offsets = [0, 256], sizes = [2, 128], strides = [1, 1]} : vector<2x384xf32> to vector<2x128xf32>
    %394 = arith.addf %393, %13 : vector<2x128xf32>
    %395 = arith.mulf %383, %394 : vector<2x128xf32>
    %396 = arith.addf %392, %395 : vector<2x128xf32>
    %397 = math.tanh %396 : vector<2x128xf32>
    %cst_136 = arith.constant 1.000000e+00 : f32
    %398 = vector.broadcast %cst_136 : f32 to vector<2x128xf32>
    %399 = arith.subf %398, %391 : vector<2x128xf32>
    %400 = arith.mulf %399, %397 : vector<2x128xf32>
    %401 = arith.mulf %391, %333 : vector<2x128xf32>
    %402 = arith.addf %400, %401 : vector<2x128xf32>
    %403 = vector.extract_strided_slice %373 {offsets = [0, 0], sizes = [2, 128], strides = [1, 1]} : vector<2x384xf32> to vector<2x128xf32>
    %404 = vector.extract_strided_slice %375 {offsets = [0, 0], sizes = [2, 128], strides = [1, 1]} : vector<2x384xf32> to vector<2x128xf32>
    %405 = arith.addf %403, %404 : vector<2x128xf32>
    %406 = arith.negf %405 : vector<2x128xf32>
    %407 = math.exp %406 : vector<2x128xf32>
    %cst_137 = arith.constant 1.000000e+00 : f32
    %408 = vector.broadcast %cst_137 : f32 to vector<2x128xf32>
    %409 = arith.addf %408, %407 : vector<2x128xf32>
    %410 = arith.divf %408, %409 : vector<2x128xf32>
    %411 = vector.extract_strided_slice %373 {offsets = [0, 128], sizes = [2, 128], strides = [1, 1]} : vector<2x384xf32> to vector<2x128xf32>
    %412 = vector.extract_strided_slice %375 {offsets = [0, 128], sizes = [2, 128], strides = [1, 1]} : vector<2x384xf32> to vector<2x128xf32>
    %413 = arith.addf %411, %412 : vector<2x128xf32>
    %414 = arith.negf %413 : vector<2x128xf32>
    %415 = math.exp %414 : vector<2x128xf32>
    %cst_138 = arith.constant 1.000000e+00 : f32
    %416 = vector.broadcast %cst_138 : f32 to vector<2x128xf32>
    %417 = arith.addf %416, %415 : vector<2x128xf32>
    %418 = arith.divf %416, %417 : vector<2x128xf32>
    %419 = vector.extract_strided_slice %373 {offsets = [0, 256], sizes = [2, 128], strides = [1, 1]} : vector<2x384xf32> to vector<2x128xf32>
    %420 = vector.extract_strided_slice %375 {offsets = [0, 256], sizes = [2, 128], strides = [1, 1]} : vector<2x384xf32> to vector<2x128xf32>
    %421 = arith.addf %420, %16 : vector<2x128xf32>
    %422 = arith.mulf %410, %421 : vector<2x128xf32>
    %423 = arith.addf %419, %422 : vector<2x128xf32>
    %424 = math.tanh %423 : vector<2x128xf32>
    %cst_139 = arith.constant 1.000000e+00 : f32
    %425 = vector.broadcast %cst_139 : f32 to vector<2x128xf32>
    %426 = arith.subf %425, %418 : vector<2x128xf32>
    %427 = arith.mulf %426, %424 : vector<2x128xf32>
    %428 = arith.mulf %418, %360 : vector<2x128xf32>
    %429 = arith.addf %427, %428 : vector<2x128xf32>
    %c0_140 = arith.constant 0 : index
    %c0_141 = arith.constant 0 : index
    %430 = vector.load %arg17[%c0_140, %c0_141] : memref<2x128xf32, #tpu.memory_space<vmem>>, vector<2x128xf32>
    %431 = arith.addf %430, %402 : vector<2x128xf32>
    %c0_142 = arith.constant 0 : index
    %c0_143 = arith.constant 0 : index
    %432 = vector.load %arg17[%c0_142, %c0_143] : memref<2x128xf32, #tpu.memory_space<vmem>>, vector<2x128xf32>
    tpu.vector_store %arg17[%c0_142, %c0_143], %431 {strides = array<i32>} : memref<2x128xf32, #tpu.memory_space<vmem>>, vector<2x128xf32>,
    %c0_144 = arith.constant 0 : index
    %c0_145 = arith.constant 0 : index
    %433 = vector.load %arg18[%c0_144, %c0_145] : memref<2x128xf32, #tpu.memory_space<vmem>>, vector<2x128xf32>
    %434 = arith.addf %433, %429 : vector<2x128xf32>
    %c0_146 = arith.constant 0 : index
    %c0_147 = arith.constant 0 : index
    %435 = vector.load %arg18[%c0_146, %c0_147] : memref<2x128xf32, #tpu.memory_space<vmem>>, vector<2x128xf32>
    tpu.vector_store %arg18[%c0_146, %c0_147], %434 {strides = array<i32>} : memref<2x128xf32, #tpu.memory_space<vmem>>, vector<2x128xf32>,
    %c6_i32 = arith.constant 6 : i32
    %436 = arith.index_cast %c6_i32 : i32 to index
    %c0_148 = arith.constant 0 : index
    %c0_149 = arith.constant 0 : index
    %437 = vector.load %arg16[%436, %c0_148, %c0_149] : memref<8x2x768xf32, #tpu.memory_space<vmem>>, vector<1x2x384xf32>
    %438 = vector.shape_cast %437 : vector<1x2x384xf32> to vector<2x384xf32>
    %c7_i32_150 = arith.constant 7 : i32
    %439 = arith.subi %c7_i32_150, %c6_i32 : i32
    %440 = arith.index_cast %439 : i32 to index
    %c0_151 = arith.constant 0 : index
    %c384_152 = arith.constant 384 : index
    %441 = vector.load %arg16[%440, %c0_151, %c384_152] : memref<8x2x768xf32, #tpu.memory_space<vmem>>, vector<1x2x384xf32>
    %442 = vector.shape_cast %441 : vector<1x2x384xf32> to vector<2x384xf32>
    %cst_153 = arith.constant dense<0.000000e+00> : vector<2x384xf32>
    %443 = tpu.matmul %402, %9, %cst_153 {dimension_numbers = #tpu.dot_dimension_numbers<[1], [0], [0], [1], [0, 0, 1, 1], [], []>} : vector<2x128xf32>, vector<128x384xf32>, vector<2x384xf32> -> vector<2x384xf32>
    %cst_154 = arith.constant dense<0.000000e+00> : vector<2x384xf32>
    %444 = tpu.matmul %429, %10, %cst_154 {dimension_numbers = #tpu.dot_dimension_numbers<[1], [0], [0], [1], [0, 0, 1, 1], [], []>} : vector<2x128xf32>, vector<128x384xf32>, vector<2x384xf32> -> vector<2x384xf32>
    %445 = vector.extract_strided_slice %438 {offsets = [0, 0], sizes = [2, 128], strides = [1, 1]} : vector<2x384xf32> to vector<2x128xf32>
    %446 = vector.extract_strided_slice %443 {offsets = [0, 0], sizes = [2, 128], strides = [1, 1]} : vector<2x384xf32> to vector<2x128xf32>
    %447 = arith.addf %445, %446 : vector<2x128xf32>
    %448 = arith.negf %447 : vector<2x128xf32>
    %449 = math.exp %448 : vector<2x128xf32>
    %cst_155 = arith.constant 1.000000e+00 : f32
    %450 = vector.broadcast %cst_155 : f32 to vector<2x128xf32>
    %451 = arith.addf %450, %449 : vector<2x128xf32>
    %452 = arith.divf %450, %451 : vector<2x128xf32>
    %453 = vector.extract_strided_slice %438 {offsets = [0, 128], sizes = [2, 128], strides = [1, 1]} : vector<2x384xf32> to vector<2x128xf32>
    %454 = vector.extract_strided_slice %443 {offsets = [0, 128], sizes = [2, 128], strides = [1, 1]} : vector<2x384xf32> to vector<2x128xf32>
    %455 = arith.addf %453, %454 : vector<2x128xf32>
    %456 = arith.negf %455 : vector<2x128xf32>
    %457 = math.exp %456 : vector<2x128xf32>
    %cst_156 = arith.constant 1.000000e+00 : f32
    %458 = vector.broadcast %cst_156 : f32 to vector<2x128xf32>
    %459 = arith.addf %458, %457 : vector<2x128xf32>
    %460 = arith.divf %458, %459 : vector<2x128xf32>
    %461 = vector.extract_strided_slice %438 {offsets = [0, 256], sizes = [2, 128], strides = [1, 1]} : vector<2x384xf32> to vector<2x128xf32>
    %462 = vector.extract_strided_slice %443 {offsets = [0, 256], sizes = [2, 128], strides = [1, 1]} : vector<2x384xf32> to vector<2x128xf32>
    %463 = arith.addf %462, %13 : vector<2x128xf32>
    %464 = arith.mulf %452, %463 : vector<2x128xf32>
    %465 = arith.addf %461, %464 : vector<2x128xf32>
    %466 = math.tanh %465 : vector<2x128xf32>
    %cst_157 = arith.constant 1.000000e+00 : f32
    %467 = vector.broadcast %cst_157 : f32 to vector<2x128xf32>
    %468 = arith.subf %467, %460 : vector<2x128xf32>
    %469 = arith.mulf %468, %466 : vector<2x128xf32>
    %470 = arith.mulf %460, %402 : vector<2x128xf32>
    %471 = arith.addf %469, %470 : vector<2x128xf32>
    %472 = vector.extract_strided_slice %442 {offsets = [0, 0], sizes = [2, 128], strides = [1, 1]} : vector<2x384xf32> to vector<2x128xf32>
    %473 = vector.extract_strided_slice %444 {offsets = [0, 0], sizes = [2, 128], strides = [1, 1]} : vector<2x384xf32> to vector<2x128xf32>
    %474 = arith.addf %472, %473 : vector<2x128xf32>
    %475 = arith.negf %474 : vector<2x128xf32>
    %476 = math.exp %475 : vector<2x128xf32>
    %cst_158 = arith.constant 1.000000e+00 : f32
    %477 = vector.broadcast %cst_158 : f32 to vector<2x128xf32>
    %478 = arith.addf %477, %476 : vector<2x128xf32>
    %479 = arith.divf %477, %478 : vector<2x128xf32>
    %480 = vector.extract_strided_slice %442 {offsets = [0, 128], sizes = [2, 128], strides = [1, 1]} : vector<2x384xf32> to vector<2x128xf32>
    %481 = vector.extract_strided_slice %444 {offsets = [0, 128], sizes = [2, 128], strides = [1, 1]} : vector<2x384xf32> to vector<2x128xf32>
    %482 = arith.addf %480, %481 : vector<2x128xf32>
    %483 = arith.negf %482 : vector<2x128xf32>
    %484 = math.exp %483 : vector<2x128xf32>
    %cst_159 = arith.constant 1.000000e+00 : f32
    %485 = vector.broadcast %cst_159 : f32 to vector<2x128xf32>
    %486 = arith.addf %485, %484 : vector<2x128xf32>
    %487 = arith.divf %485, %486 : vector<2x128xf32>
    %488 = vector.extract_strided_slice %442 {offsets = [0, 256], sizes = [2, 128], strides = [1, 1]} : vector<2x384xf32> to vector<2x128xf32>
    %489 = vector.extract_strided_slice %444 {offsets = [0, 256], sizes = [2, 128], strides = [1, 1]} : vector<2x384xf32> to vector<2x128xf32>
    %490 = arith.addf %489, %16 : vector<2x128xf32>
    %491 = arith.mulf %479, %490 : vector<2x128xf32>
    %492 = arith.addf %488, %491 : vector<2x128xf32>
    %493 = math.tanh %492 : vector<2x128xf32>
    %cst_160 = arith.constant 1.000000e+00 : f32
    %494 = vector.broadcast %cst_160 : f32 to vector<2x128xf32>
    %495 = arith.subf %494, %487 : vector<2x128xf32>
    %496 = arith.mulf %495, %493 : vector<2x128xf32>
    %497 = arith.mulf %487, %429 : vector<2x128xf32>
    %498 = arith.addf %496, %497 : vector<2x128xf32>
    %c0_161 = arith.constant 0 : index
    %c0_162 = arith.constant 0 : index
    %499 = vector.load %arg17[%c0_161, %c0_162] : memref<2x128xf32, #tpu.memory_space<vmem>>, vector<2x128xf32>
    %500 = arith.addf %499, %471 : vector<2x128xf32>
    %c0_163 = arith.constant 0 : index
    %c0_164 = arith.constant 0 : index
    %501 = vector.load %arg17[%c0_163, %c0_164] : memref<2x128xf32, #tpu.memory_space<vmem>>, vector<2x128xf32>
    tpu.vector_store %arg17[%c0_163, %c0_164], %500 {strides = array<i32>} : memref<2x128xf32, #tpu.memory_space<vmem>>, vector<2x128xf32>,
    %c0_165 = arith.constant 0 : index
    %c0_166 = arith.constant 0 : index
    %502 = vector.load %arg18[%c0_165, %c0_166] : memref<2x128xf32, #tpu.memory_space<vmem>>, vector<2x128xf32>
    %503 = arith.addf %502, %498 : vector<2x128xf32>
    %c0_167 = arith.constant 0 : index
    %c0_168 = arith.constant 0 : index
    %504 = vector.load %arg18[%c0_167, %c0_168] : memref<2x128xf32, #tpu.memory_space<vmem>>, vector<2x128xf32>
    tpu.vector_store %arg18[%c0_167, %c0_168], %503 {strides = array<i32>} : memref<2x128xf32, #tpu.memory_space<vmem>>, vector<2x128xf32>,
    %c7_i32_169 = arith.constant 7 : i32
    %505 = arith.index_cast %c7_i32_169 : i32 to index
    %c0_170 = arith.constant 0 : index
    %c0_171 = arith.constant 0 : index
    %506 = vector.load %arg16[%505, %c0_170, %c0_171] : memref<8x2x768xf32, #tpu.memory_space<vmem>>, vector<1x2x384xf32>
    %507 = vector.shape_cast %506 : vector<1x2x384xf32> to vector<2x384xf32>
    %c7_i32_172 = arith.constant 7 : i32
    %508 = arith.subi %c7_i32_172, %c7_i32_169 : i32
    %509 = arith.index_cast %508 : i32 to index
    %c0_173 = arith.constant 0 : index
    %c384_174 = arith.constant 384 : index
    %510 = vector.load %arg16[%509, %c0_173, %c384_174] : memref<8x2x768xf32, #tpu.memory_space<vmem>>, vector<1x2x384xf32>
    %511 = vector.shape_cast %510 : vector<1x2x384xf32> to vector<2x384xf32>
    %cst_175 = arith.constant dense<0.000000e+00> : vector<2x384xf32>
    %512 = tpu.matmul %471, %9, %cst_175 {dimension_numbers = #tpu.dot_dimension_numbers<[1], [0], [0], [1], [0, 0, 1, 1], [], []>} : vector<2x128xf32>, vector<128x384xf32>, vector<2x384xf32> -> vector<2x384xf32>
    %cst_176 = arith.constant dense<0.000000e+00> : vector<2x384xf32>
    %513 = tpu.matmul %498, %10, %cst_176 {dimension_numbers = #tpu.dot_dimension_numbers<[1], [0], [0], [1], [0, 0, 1, 1], [], []>} : vector<2x128xf32>, vector<128x384xf32>, vector<2x384xf32> -> vector<2x384xf32>
    %514 = vector.extract_strided_slice %507 {offsets = [0, 0], sizes = [2, 128], strides = [1, 1]} : vector<2x384xf32> to vector<2x128xf32>
    %515 = vector.extract_strided_slice %512 {offsets = [0, 0], sizes = [2, 128], strides = [1, 1]} : vector<2x384xf32> to vector<2x128xf32>
    %516 = arith.addf %514, %515 : vector<2x128xf32>
    %517 = arith.negf %516 : vector<2x128xf32>
    %518 = math.exp %517 : vector<2x128xf32>
    %cst_177 = arith.constant 1.000000e+00 : f32
    %519 = vector.broadcast %cst_177 : f32 to vector<2x128xf32>
    %520 = arith.addf %519, %518 : vector<2x128xf32>
    %521 = arith.divf %519, %520 : vector<2x128xf32>
    %522 = vector.extract_strided_slice %507 {offsets = [0, 128], sizes = [2, 128], strides = [1, 1]} : vector<2x384xf32> to vector<2x128xf32>
    %523 = vector.extract_strided_slice %512 {offsets = [0, 128], sizes = [2, 128], strides = [1, 1]} : vector<2x384xf32> to vector<2x128xf32>
    %524 = arith.addf %522, %523 : vector<2x128xf32>
    %525 = arith.negf %524 : vector<2x128xf32>
    %526 = math.exp %525 : vector<2x128xf32>
    %cst_178 = arith.constant 1.000000e+00 : f32
    %527 = vector.broadcast %cst_178 : f32 to vector<2x128xf32>
    %528 = arith.addf %527, %526 : vector<2x128xf32>
    %529 = arith.divf %527, %528 : vector<2x128xf32>
    %530 = vector.extract_strided_slice %507 {offsets = [0, 256], sizes = [2, 128], strides = [1, 1]} : vector<2x384xf32> to vector<2x128xf32>
    %531 = vector.extract_strided_slice %512 {offsets = [0, 256], sizes = [2, 128], strides = [1, 1]} : vector<2x384xf32> to vector<2x128xf32>
    %532 = arith.addf %531, %13 : vector<2x128xf32>
    %533 = arith.mulf %521, %532 : vector<2x128xf32>
    %534 = arith.addf %530, %533 : vector<2x128xf32>
    %535 = math.tanh %534 : vector<2x128xf32>
    %cst_179 = arith.constant 1.000000e+00 : f32
    %536 = vector.broadcast %cst_179 : f32 to vector<2x128xf32>
    %537 = arith.subf %536, %529 : vector<2x128xf32>
    %538 = arith.mulf %537, %535 : vector<2x128xf32>
    %539 = arith.mulf %529, %471 : vector<2x128xf32>
    %540 = arith.addf %538, %539 : vector<2x128xf32>
    %541 = vector.extract_strided_slice %511 {offsets = [0, 0], sizes = [2, 128], strides = [1, 1]} : vector<2x384xf32> to vector<2x128xf32>
    %542 = vector.extract_strided_slice %513 {offsets = [0, 0], sizes = [2, 128], strides = [1, 1]} : vector<2x384xf32> to vector<2x128xf32>
    %543 = arith.addf %541, %542 : vector<2x128xf32>
    %544 = arith.negf %543 : vector<2x128xf32>
    %545 = math.exp %544 : vector<2x128xf32>
    %cst_180 = arith.constant 1.000000e+00 : f32
    %546 = vector.broadcast %cst_180 : f32 to vector<2x128xf32>
    %547 = arith.addf %546, %545 : vector<2x128xf32>
    %548 = arith.divf %546, %547 : vector<2x128xf32>
    %549 = vector.extract_strided_slice %511 {offsets = [0, 128], sizes = [2, 128], strides = [1, 1]} : vector<2x384xf32> to vector<2x128xf32>
    %550 = vector.extract_strided_slice %513 {offsets = [0, 128], sizes = [2, 128], strides = [1, 1]} : vector<2x384xf32> to vector<2x128xf32>
    %551 = arith.addf %549, %550 : vector<2x128xf32>
    %552 = arith.negf %551 : vector<2x128xf32>
    %553 = math.exp %552 : vector<2x128xf32>
    %cst_181 = arith.constant 1.000000e+00 : f32
    %554 = vector.broadcast %cst_181 : f32 to vector<2x128xf32>
    %555 = arith.addf %554, %553 : vector<2x128xf32>
    %556 = arith.divf %554, %555 : vector<2x128xf32>
    %557 = vector.extract_strided_slice %511 {offsets = [0, 256], sizes = [2, 128], strides = [1, 1]} : vector<2x384xf32> to vector<2x128xf32>
    %558 = vector.extract_strided_slice %513 {offsets = [0, 256], sizes = [2, 128], strides = [1, 1]} : vector<2x384xf32> to vector<2x128xf32>
    %559 = arith.addf %558, %16 : vector<2x128xf32>
    %560 = arith.mulf %548, %559 : vector<2x128xf32>
    %561 = arith.addf %557, %560 : vector<2x128xf32>
    %562 = math.tanh %561 : vector<2x128xf32>
    %cst_182 = arith.constant 1.000000e+00 : f32
    %563 = vector.broadcast %cst_182 : f32 to vector<2x128xf32>
    %564 = arith.subf %563, %556 : vector<2x128xf32>
    %565 = arith.mulf %564, %562 : vector<2x128xf32>
    %566 = arith.mulf %556, %498 : vector<2x128xf32>
    %567 = arith.addf %565, %566 : vector<2x128xf32>
    %c0_183 = arith.constant 0 : index
    %c0_184 = arith.constant 0 : index
    %568 = vector.load %arg17[%c0_183, %c0_184] : memref<2x128xf32, #tpu.memory_space<vmem>>, vector<2x128xf32>
    %569 = arith.addf %568, %540 : vector<2x128xf32>
    %c0_185 = arith.constant 0 : index
    %c0_186 = arith.constant 0 : index
    %570 = vector.load %arg17[%c0_185, %c0_186] : memref<2x128xf32, #tpu.memory_space<vmem>>, vector<2x128xf32>
    tpu.vector_store %arg17[%c0_185, %c0_186], %569 {strides = array<i32>} : memref<2x128xf32, #tpu.memory_space<vmem>>, vector<2x128xf32>,
    %c0_187 = arith.constant 0 : index
    %c0_188 = arith.constant 0 : index
    %571 = vector.load %arg18[%c0_187, %c0_188] : memref<2x128xf32, #tpu.memory_space<vmem>>, vector<2x128xf32>
    %572 = arith.addf %571, %567 : vector<2x128xf32>
    %c0_189 = arith.constant 0 : index
    %c0_190 = arith.constant 0 : index
    %573 = vector.load %arg18[%c0_189, %c0_190] : memref<2x128xf32, #tpu.memory_space<vmem>>, vector<2x128xf32>
    tpu.vector_store %arg18[%c0_189, %c0_190], %572 {strides = array<i32>} : memref<2x128xf32, #tpu.memory_space<vmem>>, vector<2x128xf32>,
    %c8_i32 = arith.constant 8 : i32
    %c0_191 = arith.constant 0 : index
    %c0_192 = arith.constant 0 : index
    %574 = vector.load %arg17[%c0_191, %c0_192] : memref<2x128xf32, #tpu.memory_space<vmem>>, vector<2x128xf32>
    %cst_193 = arith.constant 1.250000e-01 : f32
    %575 = vector.broadcast %cst_193 : f32 to vector<2x128xf32>
    %576 = arith.mulf %574, %575 : vector<2x128xf32>
    %c0_194 = arith.constant 0 : index
    %c0_195 = arith.constant 0 : index
    %577 = vector.load %arg18[%c0_194, %c0_195] : memref<2x128xf32, #tpu.memory_space<vmem>>, vector<2x128xf32>
    %cst_196 = arith.constant 1.250000e-01 : f32
    %578 = vector.broadcast %cst_196 : f32 to vector<2x128xf32>
    %579 = arith.mulf %577, %578 : vector<2x128xf32>
    %c0_197 = arith.constant 0 : index
    %c0_198 = arith.constant 0 : index
    %580 = vector.load %arg8[%c0_197, %c0_198] : memref<128x32xf32, #tpu.memory_space<vmem>>, vector<128x32xf32>
    %cst_199 = arith.constant dense<0.000000e+00> : vector<2x32xf32>
    %581 = tpu.matmul %576, %580, %cst_199 {dimension_numbers = #tpu.dot_dimension_numbers<[1], [0], [0], [1], [0, 0, 1, 1], [], []>} : vector<2x128xf32>, vector<128x32xf32>, vector<2x32xf32> -> vector<2x32xf32>
    %c0_200 = arith.constant 0 : index
    %c0_201 = arith.constant 0 : index
    %582 = vector.load %arg9[%c0_200, %c0_201] : memref<128x32xf32, #tpu.memory_space<vmem>>, vector<128x32xf32>
    %cst_202 = arith.constant dense<0.000000e+00> : vector<2x32xf32>
    %583 = tpu.matmul %579, %582, %cst_202 {dimension_numbers = #tpu.dot_dimension_numbers<[1], [0], [0], [1], [0, 0, 1, 1], [], []>} : vector<2x128xf32>, vector<128x32xf32>, vector<2x32xf32> -> vector<2x32xf32>
    %584 = arith.addf %581, %583 : vector<2x32xf32>
    %c0_203 = arith.constant 0 : index
    %c0_204 = arith.constant 0 : index
    %585 = vector.load %arg10[%c0_203, %c0_204] : memref<1x32xf32, #tpu.memory_space<vmem>>, vector<1x32xf32>
    %586 = vector.broadcast %585 : vector<1x32xf32> to vector<2x32xf32>
    %587 = arith.addf %584, %586 : vector<2x32xf32>
    %cst_205 = arith.constant 0.000000e+00 : f32
    %588 = vector.broadcast %cst_205 : f32 to vector<2x32xf32>
    %589 = arith.maximumf %587, %588 : vector<2x32xf32>
    %c0_206 = arith.constant 0 : index
    %c0_207 = arith.constant 0 : index
    %590 = vector.load %arg11[%c0_206, %c0_207] : memref<32x16xf32, #tpu.memory_space<vmem>>, vector<32x16xf32>
    %cst_208 = arith.constant dense<0.000000e+00> : vector<2x16xf32>
    %591 = tpu.matmul %589, %590, %cst_208 {dimension_numbers = #tpu.dot_dimension_numbers<[1], [0], [0], [1], [0, 0, 1, 1], [], []>} : vector<2x32xf32>, vector<32x16xf32>, vector<2x16xf32> -> vector<2x16xf32>
    %c0_209 = arith.constant 0 : index
    %c0_210 = arith.constant 0 : index
    %592 = vector.load %arg12[%c0_209, %c0_210] : memref<1x16xf32, #tpu.memory_space<vmem>>, vector<1x16xf32>
    %593 = vector.broadcast %592 : vector<1x16xf32> to vector<2x16xf32>
    %594 = arith.addf %591, %593 : vector<2x16xf32>
    %cst_211 = arith.constant 0.000000e+00 : f32
    %595 = vector.broadcast %cst_211 : f32 to vector<2x16xf32>
    %596 = arith.maximumf %594, %595 : vector<2x16xf32>
    %c0_212 = arith.constant 0 : index
    %c0_213 = arith.constant 0 : index
    %597 = vector.load %arg13[%c0_212, %c0_213] : memref<16x4xf32, #tpu.memory_space<vmem>>, vector<16x4xf32>
    %cst_214 = arith.constant dense<0.000000e+00> : vector<2x4xf32>
    %598 = tpu.matmul %596, %597, %cst_214 {dimension_numbers = #tpu.dot_dimension_numbers<[1], [0], [0], [1], [0, 0, 1, 1], [], []>} : vector<2x16xf32>, vector<16x4xf32>, vector<2x4xf32> -> vector<2x4xf32>
    %c0_215 = arith.constant 0 : index
    %c0_216 = arith.constant 0 : index
    %599 = vector.load %arg14[%c0_215, %c0_216] : memref<1x4xf32, #tpu.memory_space<vmem>>, vector<1x4xf32>
    %600 = vector.broadcast %599 : vector<1x4xf32> to vector<2x4xf32>
    %601 = arith.addf %598, %600 : vector<2x4xf32>
    %c0_217 = arith.constant 0 : index
    %c0_218 = arith.constant 0 : index
    %602 = vector.load %arg15[%c0_217, %c0_218] : memref<2x4xf32, #tpu.memory_space<vmem>>, vector<2x4xf32>
    tpu.vector_store %arg15[%c0_217, %c0_218], %601 {strides = array<i32>} : memref<2x4xf32, #tpu.memory_space<vmem>>, vector<2x4xf32>,
    return
  }
  func.func @transform_0(%arg0: i32) -> (i32, i32, i32) {
    %c0_i32 = arith.constant 0 : i32
    %c0_i32_0 = arith.constant 0 : i32
    %c0_i32_1 = arith.constant 0 : i32
    return %c0_i32, %arg0, %c0_i32_0 : i32, i32, i32
  }
  func.func @transform_1(%arg0: i32) -> (i32, i32) {
    %c0_i32 = arith.constant 0 : i32
    %c0_i32_0 = arith.constant 0 : i32
    %c0_i32_1 = arith.constant 0 : i32
    return %c0_i32, %c0_i32_0 : i32, i32
  }
  func.func @transform_2(%arg0: i32) -> (i32, i32) {
    %c0_i32 = arith.constant 0 : i32
    %c0_i32_0 = arith.constant 0 : i32
    %c0_i32_1 = arith.constant 0 : i32
    return %c0_i32, %c0_i32_0 : i32, i32
  }
  func.func @transform_3(%arg0: i32) -> (i32, i32) {
    %c0_i32 = arith.constant 0 : i32
    %c0_i32_0 = arith.constant 0 : i32
    %c0_i32_1 = arith.constant 0 : i32
    return %c0_i32, %c0_i32_0 : i32, i32
  }
  func.func @transform_4(%arg0: i32) -> (i32, i32) {
    %c0_i32 = arith.constant 0 : i32
    %c0_i32_0 = arith.constant 0 : i32
    %c0_i32_1 = arith.constant 0 : i32
    return %c0_i32, %c0_i32_0 : i32, i32
  }
  func.func @transform_5(%arg0: i32) -> (i32, i32) {
    %c0_i32 = arith.constant 0 : i32
    %c0_i32_0 = arith.constant 0 : i32
    %c0_i32_1 = arith.constant 0 : i32
    return %c0_i32, %c0_i32_0 : i32, i32
  }
  func.func @transform_6(%arg0: i32) -> (i32, i32) {
    %c0_i32 = arith.constant 0 : i32
    %c0_i32_0 = arith.constant 0 : i32
    %c0_i32_1 = arith.constant 0 : i32
    return %c0_i32, %c0_i32_0 : i32, i32
  }
  func.func @transform_7(%arg0: i32) -> (i32, i32) {
    %c0_i32 = arith.constant 0 : i32
    %c0_i32_0 = arith.constant 0 : i32
    %c0_i32_1 = arith.constant 0 : i32
    return %c0_i32, %c0_i32_0 : i32, i32
  }
  func.func @transform_8(%arg0: i32) -> (i32, i32) {
    %c0_i32 = arith.constant 0 : i32
    %c0_i32_0 = arith.constant 0 : i32
    %c0_i32_1 = arith.constant 0 : i32
    return %c0_i32, %c0_i32_0 : i32, i32
  }
  func.func @transform_9(%arg0: i32) -> (i32, i32) {
    %c0_i32 = arith.constant 0 : i32
    %c0_i32_0 = arith.constant 0 : i32
    %c0_i32_1 = arith.constant 0 : i32
    return %c0_i32, %c0_i32_0 : i32, i32
  }
  func.func @transform_10(%arg0: i32) -> (i32, i32) {
    %c0_i32 = arith.constant 0 : i32
    %c0_i32_0 = arith.constant 0 : i32
    %c0_i32_1 = arith.constant 0 : i32
    return %c0_i32, %c0_i32_0 : i32, i32
  }
  func.func @transform_11(%arg0: i32) -> (i32, i32) {
    %c0_i32 = arith.constant 0 : i32
    %c0_i32_0 = arith.constant 0 : i32
    %c0_i32_1 = arith.constant 0 : i32
    return %c0_i32, %c0_i32_0 : i32, i32
  }
  func.func @transform_12(%arg0: i32) -> (i32, i32) {
    %c0_i32 = arith.constant 0 : i32
    %c0_i32_0 = arith.constant 0 : i32
    %c0_i32_1 = arith.constant 0 : i32
    return %c0_i32, %c0_i32_0 : i32, i32
  }
  func.func @transform_13(%arg0: i32) -> (i32, i32) {
    %c0_i32 = arith.constant 0 : i32
    %c0_i32_0 = arith.constant 0 : i32
    %c0_i32_1 = arith.constant 0 : i32
    return %c0_i32, %c0_i32_0 : i32, i32
  }
  func.func @transform_14(%arg0: i32) -> (i32, i32) {
    %c0_i32 = arith.constant 0 : i32
    %c0_i32_0 = arith.constant 0 : i32
    return %arg0, %c0_i32 : i32, i32
  }
}

</mosaic_0001>

<bundles_post_ra>
// kernel: tpu_custom_call.1
= control target key start
LH: loop header
LB: loop body
LE: loop exit
PB: predicated region body
PF: predicated region fallthrough
CT: control target
= control target key end

     0   :  { %19 = vsyncpa [#allocation6], 0  ;;  %s7431_s0 = inlined_call_operand.hbm [shape: f32[8,2,32], index: 0, kind: input, shape index: {}]   ;;  %s7432_s1 = inlined_call_operand.hbm [shape: f32[32,768], index: 1, kind: input, shape index: {}]   ;;  %s7433_s2 = inlined_call_operand.hbm [shape: f32[1,768], index: 2, kind: input, shape index: {}]   ;;  %s7434_s3 = inlined_call_operand.vmem [shape: f32[128,384], index: 3, kind: input, shape index: {}]   ;;  %s7435_s4 = inlined_call_operand.vmem [shape: f32[1,128], index: 4, kind: input, shape index: {}]   ;;  %s7436_s5 = inlined_call_operand.hbm [shape: f32[128,384], index: 5, kind: input, shape index: {}]   ;;  %s7437_s6 = inlined_call_operand.vmem [shape: f32[1,128], index: 6, kind: input, shape index: {}]   ;;  %s7438_s7 = inlined_call_operand.vmem [shape: f32[128,32], index: 7, kind: input, shape index: {}]   ;;  %s7439_s8 = inlined_call_operand.vmem [shape: f32[128,32], index: 8, kind: input, shape index: {}]   ;;  %s7440_s9 = inlined_call_operand.hbm [shape: f32[1,32], index: 9, kind: input, shape index: {}]   ;;  %s7441_s10 = inlined_call_operand.vmem [shape: f32[32,16], index: 10, kind: input, shape index: {}]   ;;  %s7442_s11 = inlined_call_operand.vmem [shape: f32[1,16], index: 11, kind: input, shape index: {}]   ;;  %s7443_s12 = inlined_call_operand.vmem [shape: f32[16,4], index: 12, kind: input, shape index: {}]   ;;  %s7444_s13 = inlined_call_operand.vmem [shape: f32[1,4], index: 13, kind: input, shape index: {}]   ;;  %s7445_s14 = inlined_call_operand.hbm [shape: f32[2,4], index: 14, kind: output, shape index: {}]  }
   0x1   :  { %20 = vsyncpa [#allocation9], 0 }
   0x2   :  { %21 = vsyncpa [#allocation12], 0 }
   0x3   :  { %22 = vsyncpa [#allocation7], 0  ;;  %s6155_s29 = smov [#allocation8]   ;;  %s6015_s17 = scalar_lea.hbm %s7432_s1, 3072 }
   0x4   :  { %s40_s30 = sshll.u32 %s6155_s29, 4  ;;  %p6016_p0 = scmp.ne.s32.totalorder %s7432_s1, %s6015_s17  ;;  %s41_s30 = int_to_ptr.vmem [resolvable:$true] %s40_s30 }
   0x5   :  { %p6019_p1 = scmp.lt.u32.totalorder %s6015_s17, %s7432_s1 }
   0x7   :  { %p6021_p2 = pnand %p6019_p1, %p6016_p0 }
   0x9   :  { %6024 = shalt.err (!%p6021_p2)
}
   0xa   :  { %s6025_s22 = scalar_lea.vmem %s41_s30, 3072  ;;  %p6030_p4 = scmp.lt.s32.totalorder %s41_s30, %s41_s30 }
   0xb   :  { %p6026_p3 = scmp.ne.s32.totalorder %s41_s30, %s6025_s22  ;;  %p6031_p5 = scmp.lt.s32.totalorder %s6025_s22, %s6025_s22 }
   0xd   :  { %p6032_p6 = por %p6031_p5, %p6030_p4 }
   0xf   :  { %p6033_p7 = pnand %p6032_p6, %p6026_p3 }
  0x11   :  { %6036 = shalt.err (!%p6033_p7)
}
  0x12   :  { %s6156_s23 = smov 768   ;;  %s6157_s24 = smov 48  }
  0x13   :  { %46 = dma.hbm_to_vmem [thread:$0]  %s7432_s1, 3072, %s41_s30, [#allocation9], %s6156_s23, %s6156_s23, %s6157_s24  }
  0x14   :  { %s6158_s27 = smov [#allocation11]   ;;  %s6037_s16 = scalar_lea.hbm %s7436_s5, 6144 }
  0x15   :  { %s66_s28 = sshll.u32 %s6158_s27, 4  ;;  %p6038_p8 = scmp.ne.s32.totalorder %s7436_s5, %s6037_s16  ;;  %s67_s28 = int_to_ptr.vmem [resolvable:$true] %s66_s28 }
  0x16   :  { %p6041_p9 = scmp.lt.u32.totalorder %s6037_s16, %s7436_s5 }
  0x18   :  { %p6043_p10 = pnand %p6041_p9, %p6038_p8 }
  0x1a   :  { %6046 = shalt.err (!%p6043_p10)
}
  0x1b   :  { %s6047_s21 = scalar_lea.vmem %s67_s28, 6144  ;;  %p6052_p12 = scmp.lt.s32.totalorder %s67_s28, %s67_s28 }
  0x1c   :  { %p6048_p11 = scmp.ne.s32.totalorder %s67_s28, %s6047_s21  ;;  %p6053_p13 = scmp.lt.s32.totalorder %s6047_s21, %s6047_s21 }
  0x1e   :  { %p6054_p0 = por %p6053_p13, %p6052_p12 }
  0x20   :  { %p6055_p1 = pnand %p6054_p0, %p6048_p11 }
  0x22   :  { %6058 = shalt.err (!%p6055_p1)
}
  0x23   :  { %s6159_s1 = smov 384   ;;  %s6160_s30 = smov 24  }
  0x24   :  { %72 = dma.hbm_to_vmem [thread:$0]  %s7436_s5, 6144, %s67_s28, [#allocation12], %s6159_s1, %s6159_s1, %s6160_s30  }
  0x25   :  { %s6161_s24 = smov [#allocation5]   ;;  %s6059_s29 = scalar_lea.hbm %s7431_s0, 256 }
  0x26   :  { %s28_s25 = sshll.u32 %s6161_s24, 4  ;;  %p6060_p2 = scmp.ne.s32.totalorder %s7431_s0, %s6059_s29  ;;  %s29_s25 = int_to_ptr.vmem [resolvable:$true] %s28_s25 }
  0x27   :  { %p6063_p3 = scmp.lt.u32.totalorder %s6059_s29, %s7431_s0 }
  0x29   :  { %p6065_p4 = pnand %p6063_p3, %p6060_p2 }
  0x2b   :  { %6068 = shalt.err (!%p6065_p4)
}
  0x2c   :  { %s6069_s19 = scalar_lea.vmem %s29_s25, 256  ;;  %p6074_p6 = scmp.lt.s32.totalorder %s29_s25, %s29_s25 }
  0x2d   :  { %p6070_p5 = scmp.ne.s32.totalorder %s29_s25, %s6069_s19  ;;  %p6075_p7 = scmp.lt.s32.totalorder %s6069_s19, %s6069_s19 }
  0x2f   :  { %p6076_p8 = por %p6075_p7, %p6074_p6 }
  0x31   :  { %p6077_p9 = pnand %p6076_p8, %p6070_p5 }
  0x33   :  { %6080 = shalt.err (!%p6077_p9)
}
  0x34   :  { %s6162_s5 = smov 32   ;;  %s6163_s28 = smov 2  }
  0x35   :  { %34 = dma.hbm_to_vmem [thread:$0]  %s7431_s0, 256, %s29_s25, [#allocation6], %s6162_s5, %s6162_s5, %s6163_s28  }
  0x36   :  { %s6164_s1 = smov [#allocation10]   ;;  %s6165_s22 = smov [#allocation13]  }
  0x37   :  { %s53_s30 = sshll.u32 %s6164_s1, 4  ;;  %s85_s23 = sshll.u32 %s6165_s22, 4  ;;  %s54_s30 = int_to_ptr.vmem [resolvable:$true] %s53_s30  ;;  %s86_s23 = int_to_ptr.vmem [resolvable:$true] %s85_s23 }
  0x38   :  { %s6081_s27 = scalar_lea.hbm %s7433_s2, 96 }
  0x39   :  { %p6082_p10 = scmp.ne.s32.totalorder %s7433_s2, %s6081_s27  ;;  %p6085_p11 = scmp.lt.u32.totalorder %s6081_s27, %s7433_s2 }
  0x3b   :  { %p6087_p12 = pnand %p6085_p11, %p6082_p10 }
  0x3d   :  { %6090 = shalt.err (!%p6087_p12)
}
  0x3e   :  { %s6091_s0 = scalar_lea.vmem %s54_s30, 96  ;;  %p6096_p0 = scmp.lt.s32.totalorder %s54_s30, %s54_s30 }
  0x3f   :  { %p6092_p13 = scmp.ne.s32.totalorder %s54_s30, %s6091_s0  ;;  %p6097_p1 = scmp.lt.s32.totalorder %s6091_s0, %s6091_s0 }
  0x41   :  { %p6098_p2 = por %p6097_p1, %p6096_p0 }
  0x43   :  { %p6099_p3 = pnand %p6098_p2, %p6092_p13 }
  0x45   :  { %6102 = shalt.err (!%p6099_p3)
}
  0x46   :  { %56 = dma.hbm_to_vmem [thread:$0]  %s7433_s2, 96, %s54_s30, [#allocation9]  }
  0x47   :  { %s6103_s28 = scalar_lea.hbm %s7440_s9, 16 }
  0x48   :  { %p6104_p4 = scmp.ne.s32.totalorder %s7440_s9, %s6103_s28  ;;  %p6107_p5 = scmp.lt.u32.totalorder %s6103_s28, %s7440_s9 }
  0x4a   :  { %p6109_p6 = pnand %p6107_p5, %p6104_p4 }
  0x4c   :  { %6112 = shalt.err (!%p6109_p6)
}
  0x4d   :  { %s6113_s24 = scalar_lea.vmem %s86_s23, 16  ;;  %s6117_s26 = scalar_lea.vmem %s86_s23, 32 }
  0x4e   :  { %p6114_p7 = scmp.ne.s32.totalorder %s86_s23, %s6113_s24  ;;  %p6118_p8 = scmp.lt.s32.totalorder %s86_s23, %s86_s23 }
  0x4f   :  { %p6119_p9 = scmp.lt.s32.totalorder %s6117_s26, %s6113_s24 }
  0x51   :  { %p6120_p10 = por %p6119_p9, %p6118_p8 }
  0x53   :  { %p6121_p11 = pnand %p6120_p10, %p6114_p7 }
  0x55   :  { %6124 = shalt.err (!%p6121_p11)
}
  0x56   :  { %88 = dma.hbm_to_vmem [thread:$0]  %s7440_s9, 16, %s86_s23, [#allocation12]  }
  0x57   :  { %6147 = dma.done.wait [#allocation6], 256  }
  0x58   :  { %6148 = vsyncadd [#allocation6], 4294967040 }
  0x59   :  { %6149 = dma.done.wait [#allocation9], 3168  }
  0x5a   :  { %6150 = vsyncadd [#allocation9], 4294964128 }
  0x5b   :  { %6151 = dma.done.wait [#allocation12], 6160  }
  0x5c   :  { %6152 = vsyncadd [#allocation12], 4294961136  ;;  %v7446_v0 = vmov 0.0   ;;  %v146_v1 = vlaneseq  ;;  %v6167_v2 = vmov 1983009808   ;;  %v121_v4 = vld [vmem:[#allocation8 + $0x8] sm:$0xff] }
  0x5d   :  { %287 = vmatprep.mubr.f32.mxu0 %v7446_v0  ;;  %716 = vst [vmem:[#allocation3] sm:$0x3] %v7446_v0  ;;  %717 = vst [vmem:[#allocation4] sm:$0x3] %v7446_v0  ;;  %364 = vmatprep.mubr.f32.mxu1 %v7446_v0  ;;  %v187_v3 = vunpack.c.l.s4 %v6167_v2  ;;  %v127_v5 = vld [vmem:[#allocation8 + $0x38] sm:$0xff]  ;;  %v129_v10 = vld [vmem:[#allocation8 + $0x48] sm:$0xff] }
  0x5e   :  { %v123_v6 = vld [vmem:[#allocation8 + $0x18] sm:$0xff]  ;;  %v6310_v7 = vshrl.u32 %v146_v1, 7  ;;  %v4860_v9 = vpack.c.bf16 %v127_v5, %v121_v4  ;;  %v120_v11 = vld [vmem:[#allocation8] sm:$0xff]  ;;  %v126_v12 = vld [vmem:[#allocation8 + $0x30] sm:$0xff]  ;;  %vm218_vm0 = vcmask 261120   ;;  %vm6169_vm1 = vmmov 0  }
  0x5f   :  { %v188_v8 = vunpack.c.0.s8 %v187_v3  ;;  %v4868_v13 = vpack.c.bf16 %v129_v10, %v123_v6  ;;  %v4862_v14 = vpack.c.bf16 %v126_v12, %v120_v11  ;;  %v122_v15 = vld [vmem:[#allocation8 + $0x10] sm:$0xff]  ;;  %v128_v16 = vld [vmem:[#allocation8 + $0x40] sm:$0xff]  ;;  %v133_v17 = vld [vmem:[#allocation8 + $0x68] sm:$0xff]  ;;  %vm3756_vm2 = vcmask 130048   ;;  %s6170_s9 = smov [#allocation14]  }
  0x60   :  { %4861 = vmatprep.subr.bf16.mxu0 %v4860_v9  ;;  %v4870_v18 = vpack.c.bf16 %v128_v16, %v122_v15  ;;  %v139_v19 = vld [vmem:[#allocation8 + $0x98] sm:$0xff]  ;;  %v141_v21 = vld [vmem:[#allocation8 + $0xa8] sm:$0xff]  ;;  %v132_v24 = vld [vmem:[#allocation8 + $0x60] sm:$0xff]  ;;  %s3838_s23 = sshll.u32 %s6170_s9, 4  ;;  %vm3830_vm3 = vcmask 25600   ;;  %s3839_s23 = int_to_ptr.vmem [resolvable:$true] %s3838_s23 }
  0x61   :  { %v135_v20 = vld [vmem:[#allocation8 + $0x78] sm:$0xff]  ;;  %4869 = vmatprep.subr.bf16.mxu1 %v4868_v13  ;;  %4863 = vmatpush1.bf16.msra.mxu0 %v4862_v14  ;;  %v4864_v22 = vpack.c.bf16 %v139_v19, %v133_v17  ;;  %v138_v25 = vld [vmem:[#allocation8 + $0x90] sm:$0xff]  ;;  %v6313_v27 = vsub.s32 %v188_v8, %v6310_v7  ;;  %v140_v29 = vld [vmem:[#allocation8 + $0xa0] sm:$0xff]  ;;  %p6130_p13 = scmp.lt.s32.totalorder %s3839_s23, %s3839_s23 }
  0x62   :  { %v4872_v23 = vpack.c.bf16 %v141_v21, %v135_v20  ;;  %v134_v26 = vld [vmem:[#allocation8 + $0x70] sm:$0xff]  ;;  %4871 = vmatpush1.bf16.msra.mxu1 %v4870_v18  ;;  %v4866_v28 = vpack.c.bf16 %v138_v25, %v132_v24  ;;  %v125_v36 = vld [vmem:[#allocation8 + $0x28] sm:$0xff]  ;;  %v131_v38 = vld [vmem:[#allocation8 + $0x58] sm:$0xff]  ;;  %v7452_v24 = vmov 0.0|0.0  }
  0x63   :  { %v112_v30 = vld [vmem:[#allocation5] sm:$0x3]  ;;  %v113_v31 = vld [vmem:[#allocation5 + $0x2] sm:$0x3]  ;;  %4865 = vmatprep.subr.bf16.mxu0 %v4864_v22  ;;  %v4874_v32 = vpack.c.bf16 %v140_v29, %v134_v26  ;;  %v114_v33 = vld [vmem:[#allocation5 + $0x4] sm:$0x3]  ;;  %v4876_v42 = vpack.c.bf16 %v131_v38, %v125_v36 }
  0x64   :  { %4873 = vmatprep.subr.bf16.mxu1 %v4872_v23  ;;  %v115_v34 = vld [vmem:[#allocation5 + $0x6] sm:$0x3]  ;;  %v184_v35 = vcombine.low %v112_v30, %v113_v31  ;;  %v610_v40 = vld [vmem:[%s7434_s3 + $0x20] sm:$0xff]  ;;  %v124_v44 = vld [vmem:[#allocation8 + $0x20] sm:$0xff] }
  0x65   :  { %v185_v37 = vcombine.low %v114_v33, %v115_v34  ;;  %v607_v39 = vld [vmem:[%s7434_s3 + $0x8] sm:$0xff]  ;;  %4867 = vmatpush1.bf16.msra.mxu0 %v4866_v28  ;;  %v606_v46 = vld [vmem:[%s7434_s3] sm:$0xff]  ;;  %v609_v48 = vld [vmem:[%s7434_s3 + $0x18] sm:$0xff] }
  0x66   :  { %v192_v41 = vrot.slane %v184_v35, %v6313_v27  ;;  %v6322_v43 = vpack.c.bf16 %v610_v40, %v607_v39  ;;  %v130_v45 = vld [vmem:[#allocation8 + $0x50] sm:$0xff]  ;;  %4875 = vmatpush1.bf16.msra.mxu1 %v4874_v32  ;;  %v116_v49 = vld [vmem:[#allocation5 + $0x8] sm:$0x3]  ;;  %v117_v50 = vld [vmem:[#allocation5 + $0xa] sm:$0x3]  ;;  %4877 = vmatprep.subr.bf16.mxu0 %v4876_v42  ;;  %v6332_v52 = vpack.c.bf16 %v609_v48, %v606_v46 }
  0x67   :  { %v199_v47 = vrot.slane %v185_v37, %v6313_v27  ;;  %v4878_v51 = vpack.c.bf16 %v130_v45, %v124_v44  ;;  %v118_v53 = vld [vmem:[#allocation5 + $0xc] sm:$0x3]  ;;  %v119_v54 = vld [vmem:[#allocation5 + $0xe] sm:$0x3]  ;;  %v201_v55 = vcombine.low %v116_v49, %v117_v50  ;;  %v137_v56 = vld [vmem:[#allocation8 + $0x88] sm:$0xff] }
  0x68   :  { %4885 = vmatprep.subr.bf16.mxu1 %v6322_v43  ;;  %v202_v58 = vcombine.low %v118_v53, %v119_v54  ;;  %v143_v59 = vld [vmem:[#allocation8 + $0xb8] sm:$0xff]  ;;  %v613_v60 = vld [vmem:[%s7434_s3 + $0x38] sm:$0xff]  ;;  %v142_v3 = vld [vmem:[#allocation8 + $0xb0] sm:$0xff] }
  0x69   :  { %v200_v57 = vcombine.low %v192_v41, %v199_v47  ;;  %v616_v61 = vld [vmem:[%s7434_s3 + $0x50] sm:$0xff]  ;;  %v209_v62 = vrot.slane %v201_v55, %v6313_v27  ;;  %v4880_v63 = vpack.c.bf16 %v143_v59, %v137_v56  ;;  %v615_v6 = vld [vmem:[%s7434_s3 + $0x48] sm:$0xff]  ;;  %v622_v9 = vld [vmem:[%s7434_s3 + $0x80] sm:$0xff] }
  0x6a   :  { %v6341_v1 = vpack.c.bf16 %v616_v61, %v613_v60  ;;  %v136_v2 = vld [vmem:[#allocation8 + $0x80] sm:$0xff]  ;;  %v216_v5 = vrot.slane %v202_v58, %v6313_v27  ;;  %v619_v8 = vld [vmem:[%s7434_s3 + $0x68] sm:$0xff]  ;;  %v618_v14 = vld [vmem:[%s7434_s3 + $0x60] sm:$0xff] }
  0x6b   :  { %v612_v4 = vld [vmem:[%s7434_s3 + $0x30] sm:$0xff]  ;;  %3849 = vmatmul.mubr.msk.f32.vlgmr.msra.gmra.mrb[0].mxu0 %vm218_vm0, %v200_v57  ;;  %3851 = vmatmul.mubr.msk.f32.vlgmr.msra.gmra.mrb[0].mxu1 %vm218_vm0, %v200_v57  ;;  %v4882_v10 = vpack.c.bf16 %v142_v3, %v136_v2  ;;  %v6362_v13 = vpack.c.bf16 %v622_v9, %v619_v8  ;;  %v621_v15 = vld [vmem:[%s7434_s3 + $0x78] sm:$0xff]  ;;  %v627_v21 = vld [vmem:[%s7434_s3 + $0xa8] sm:$0xff] }
  0x6c   :  { %4879 = vmatpush1.bf16.msra.mxu0 %v4878_v51  ;;  %4887 = vmatpush1.bf16.msra.mxu1 %v6332_v52  ;;  %v6359_v11 = vpack.c.bf16 %v615_v6, %v612_v4  ;;  %v217_v12 = vcombine.low %v209_v62, %v216_v5  ;;  %v625_v16 = vld [vmem:[%s7434_s3 + $0x98] sm:$0xff]  ;;  %v628_v17 = vld [vmem:[%s7434_s3 + $0xb0] sm:$0xff]  ;;  %v6381_v18 = vpack.c.bf16 %v621_v15, %v618_v14  ;;  %v631_v22 = vld [vmem:[%s7434_s3 + $0xc8] sm:$0xff] }
  0x6d   :  { %293 = vmatprep.mubr.f32.mxu0 %v7446_v0  ;;  %4881 = vmatprep.subr.bf16.mxu0 %v4880_v63  ;;  %v6385_v19 = vpack.c.bf16 %v628_v17, %v625_v16  ;;  %v624_v20 = vld [vmem:[%s7434_s3 + $0x90] sm:$0xff]  ;;  %v634_v23 = vld [vmem:[%s7434_s3 + $0xe0] sm:$0xff]  ;;  %v611_v26 = vld [vmem:[%s7434_s3 + $0x28] sm:$0xff] }
  0x6e   :  { %4889 = vmatprep.subr.bf16.mxu1 %v6341_v1  ;;  %370 = vmatprep.mubr.f32.mxu1 %v7446_v0  ;;  %v608_v25 = vld [vmem:[%s7434_s3 + $0x10] sm:$0xff]  ;;  %v6411_v29 = vpack.c.bf16 %v627_v21, %v624_v20  ;;  %v614_v30 = vld [vmem:[%s7434_s3 + $0x40] sm:$0xff]  ;;  %v617_v31 = vld [vmem:[%s7434_s3 + $0x58] sm:$0xff]  ;;  %v6421_v32 = vpack.c.bf16 %v634_v23, %v631_v22 }
  0x6f   :  { %3850 = vmatmul.mubr.msk.f32.gmra.mrb[2].mxu0 %vm218_vm0, %v217_v12  ;;  %3852 = vmatmul.mubr.msk.f32.gmra.mrb[2].mxu1 %vm218_vm0, %v217_v12  ;;  %v6408_v28 = vpack.c.bf16 %v611_v26, %v608_v25  ;;  %v630_v33 = vld [vmem:[%s7434_s3 + $0xc0] sm:$0xff]  ;;  %v633_v34 = vld [vmem:[%s7434_s3 + $0xd8] sm:$0xff]  ;;  %v6433_v36 = vpack.c.bf16 %v617_v31, %v614_v30  ;;  %v640_v37 = vld [vmem:[%s7434_s3 + $0x110] sm:$0xff] }
  0x70   :  { %4883 = vmatpush1.bf16.msra.mxu0 %v4882_v10  ;;  %4891 = vmatpush1.bf16.msra.mxu1 %v6359_v11  ;;  %7479 = vst [vmem:[#allocation19_spill] sm:$0xff] %v6421_v32  ;;  %v637_v35 = vld [vmem:[%s7434_s3 + $0xf8] sm:$0xff]  ;;  %v620_v38 = vld [vmem:[%s7434_s3 + $0x70] sm:$0xff]  ;;  %v623_v39 = vld [vmem:[%s7434_s3 + $0x88] sm:$0xff]  ;;  %v6447_v40 = vpack.c.bf16 %v633_v34, %v630_v33 }
  0x71   :  { %441 = vmatprep.mubr.f32.mxu0 %v7446_v0  ;;  %4893 = vmatprep.subr.bf16.mxu1 %v6362_v13  ;;  %v6452_v41 = vpack.c.bf16 %v640_v37, %v637_v35  ;;  %v636_v42 = vld [vmem:[%s7434_s3 + $0xf0] sm:$0xff]  ;;  %v639_v44 = vld [vmem:[%s7434_s3 + $0x108] sm:$0xff]  ;;  %v6464_v46 = vpack.c.bf16 %v623_v39, %v620_v38  ;;  %v646_v47 = vld [vmem:[%s7434_s3 + $0x140] sm:$0xff] }
  0x72   :  { %4916 = vmatprep.subr.bf16.mxu0 %v7452_v24  ;;  %785 = vmatprep.mubr.f32.mxu1 %v7446_v0  ;;  %7480 = vst [vmem:[#allocation20_spill] sm:$0xff] %v6447_v40  ;;  %v643_v45 = vld [vmem:[%s7434_s3 + $0x128] sm:$0xff]  ;;  %v626_v48 = vld [vmem:[%s7434_s3 + $0xa0] sm:$0xff]  ;;  %v629_v49 = vld [vmem:[%s7434_s3 + $0xb8] sm:$0xff]  ;;  %v6477_v50 = vpack.c.bf16 %v639_v44, %v636_v42 }
  0x73   :  { %3853 = vmatmul.mubr.msk.f32.vlgmr.msra.gmra.mrb[4].mxu0 %vm218_vm0, %v200_v57  ;;  %7481 = vst [vmem:[#allocation21_spill] sm:$0xff] %v6452_v41  ;;  %v6480_v51 = vpack.c.bf16 %v646_v47, %v643_v45  ;;  %v642_v53 = vld [vmem:[%s7434_s3 + $0x120] sm:$0xff]  ;;  %v645_v54 = vld [vmem:[%s7434_s3 + $0x138] sm:$0xff]  ;;  %v6492_v56 = vpack.c.bf16 %v629_v49, %v626_v48  ;;  %v652_v57 = vld [vmem:[%s7434_s3 + $0x170] sm:$0xff] }
  0x74   :  { %4895 = vmatpush1.bf16.msra.mxu1 %v6381_v18  ;;  %447 = vmatprep.mubr.f32.mxu0 %v7446_v0  ;;  %7482 = vst [vmem:[#allocation22_spill] sm:$0xff] %v6477_v50  ;;  %v649_v55 = vld [vmem:[%s7434_s3 + $0x158] sm:$0xff]  ;;  %v632_v58 = vld [vmem:[%s7434_s3 + $0xd0] sm:$0xff]  ;;  %v635_v59 = vld [vmem:[%s7434_s3 + $0xe8] sm:$0xff]  ;;  %v6505_v60 = vpack.c.bf16 %v645_v54, %v642_v53 }
  0x75   :  { %4897 = vmatprep.subr.bf16.mxu1 %v6385_v19  ;;  %4918 = vmatpush3.bf16.msra.mxu0 %v6408_v28  ;;  %7483 = vst [vmem:[#allocation23_spill] sm:$0xff] %v6480_v51  ;;  %7484 = vst [vmem:[#allocation24_spill] sm:$0xff] %v6492_v56  ;;  %v6508_v61 = vpack.c.bf16 %v652_v57, %v649_v55  ;;  %v648_v62 = vld [vmem:[%s7434_s3 + $0x150] sm:$0xff]  ;;  %v651_v63 = vld [vmem:[%s7434_s3 + $0x168] sm:$0xff]  ;;  %v6517_v3 = vpack.c.bf16 %v635_v59, %v632_v58 }
  0x76   :  { %4919 = vmatprep.subr.bf16.mxu0 %v7452_v24  ;;  %7485 = vst [vmem:[#allocation25_spill] sm:$0xff] %v6505_v60  ;;  %v655_v2 = vld [vmem:[#allocation11 + $0x8] sm:$0xff]  ;;  %v658_v4 = vld [vmem:[#allocation11 + $0x20] sm:$0xff]  ;;  %v6527_v8 = vpack.c.bf16 %v651_v63, %v648_v62  ;;  %v661_v14 = vld [vmem:[#allocation11 + $0x38] sm:$0xff] }
  0x77   :  { %3854 = vmatmul.mubr.msk.f32.gmra.mrb[6].mxu0 %vm218_vm0, %v217_v12  ;;  %7486 = vst [vmem:[#allocation26_spill] sm:$0xff] %v6508_v61  ;;  %7487 = vst [vmem:[#allocation27_spill] sm:$0xff] %v6517_v3  ;;  %v638_v5 = vld [vmem:[%s7434_s3 + $0x100] sm:$0xff]  ;;  %v641_v6 = vld [vmem:[%s7434_s3 + $0x118] sm:$0xff]  ;;  %v6530_v9 = vpack.c.bf16 %v658_v4, %v655_v2 }
  0x78   :  { %4899 = vmatpush1.bf16.msra.mxu1 %v6411_v29  ;;  %4244 = vmatprep.mubr.msk.f32.mxu0 %vm6169_vm1, %v7446_v0  ;;  %7488 = vst [vmem:[#allocation28_spill] sm:$0xff] %v6527_v8  ;;  %v654_v10 = vld [vmem:[#allocation11] sm:$0xff]  ;;  %v657_v12 = vld [vmem:[#allocation11 + $0x18] sm:$0xff]  ;;  %v6533_v15 = vpack.c.bf16 %v641_v6, %v638_v5  ;;  %v664_v16 = vld [vmem:[#allocation11 + $0x50] sm:$0xff] }
  0x79   :  { %4901 = vmatprep.subr.bf16.mxu1 %v6421_v32  ;;  %4921 = vmatpush3.bf16.msra.mxu0 %v6433_v36  ;;  %7489 = vst [vmem:[#allocation29_spill] sm:$0xff] %v6530_v9  ;;  %v644_v17 = vld [vmem:[%s7434_s3 + $0x130] sm:$0xff]  ;;  %v647_v20 = vld [vmem:[%s7434_s3 + $0x148] sm:$0xff]  ;;  %v6543_v21 = vpack.c.bf16 %v657_v12, %v654_v10  ;;  %v6546_v22 = vpack.c.bf16 %v664_v16, %v661_v14  ;;  %v670_v31 = vld [vmem:[#allocation11 + $0x80] sm:$0xff] }
  0x7a   :  { %4922 = vmatprep.subr.bf16.mxu0 %v7452_v24  ;;  %7490 = vst [vmem:[#allocation30_spill] sm:$0xff] %v6533_v15  ;;  %v660_v23 = vld [vmem:[#allocation11 + $0x30] sm:$0xff]  ;;  %v663_v25 = vld [vmem:[#allocation11 + $0x48] sm:$0xff]  ;;  %v6549_v30 = vpack.c.bf16 %v647_v20, %v644_v17  ;;  %v653_v34 = vld [vmem:[%s7434_s3 + $0x178] sm:$0xff] }
  0x7b   :  { %v667_v26 = vld [vmem:[#allocation11 + $0x68] sm:$0xff]  ;;  %v6560_v35 = vpack.c.bf16 %v663_v25, %v660_v23  ;;  %v666_v38 = vld [vmem:[#allocation11 + $0x60] sm:$0xff]  ;;  %v669_v39 = vld [vmem:[#allocation11 + $0x78] sm:$0xff] }
  0x7c   :  { %4903 = vmatpush1.bf16.msra.mxu1 %v6447_v40  ;;  %7491 = vst [vmem:[#allocation31_spill] sm:$0xff] %v6549_v30  ;;  %v650_v33 = vld [vmem:[%s7434_s3 + $0x160] sm:$0xff]  ;;  %v6564_v37 = vpack.c.bf16 %v670_v31, %v667_v26  ;;  %v673_v42 = vld [vmem:[#allocation11 + $0x98] sm:$0xff]  ;;  %v676_v45 = vld [vmem:[#allocation11 + $0xb0] sm:$0xff]  ;;  %v6571_v49 = vpack.c.bf16 %v669_v39, %v666_v38 }
  0x7d   :  { %4905 = vmatprep.subr.bf16.mxu1 %v6452_v41  ;;  %4924 = vmatpush3.bf16.msra.mxu0 %v6464_v46  ;;  %v6567_v44 = vpack.c.bf16 %v653_v34, %v650_v33  ;;  %v656_v47 = vld [vmem:[#allocation11 + $0x10] sm:$0xff]  ;;  %v659_v48 = vld [vmem:[#allocation11 + $0x28] sm:$0xff]  ;;  %v6574_v53 = vpack.c.bf16 %v676_v45, %v673_v42  ;;  %v682_v59 = vld [vmem:[#allocation11 + $0xe0] sm:$0xff] }
  0x7e   :  { %4925 = vmatprep.subr.bf16.mxu0 %v7452_v24  ;;  %v672_v54 = vld [vmem:[#allocation11 + $0x90] sm:$0xff]  ;;  %v675_v55 = vld [vmem:[#allocation11 + $0xa8] sm:$0xff]  ;;  %v6577_v58 = vpack.c.bf16 %v659_v48, %v656_v47  ;;  %v662_v62 = vld [vmem:[#allocation11 + $0x40] sm:$0xff] }
  0x7f   :  { %7492 = vst [vmem:[#allocation32_spill] sm:$0xff] %v6567_v44  ;;  %v679_v57 = vld [vmem:[#allocation11 + $0xc8] sm:$0xff]  ;;  %v665_v63 = vld [vmem:[#allocation11 + $0x58] sm:$0xff]  ;;  %v6581_v2 = vpack.c.bf16 %v675_v55, %v672_v54  ;;  %v678_v5 = vld [vmem:[#allocation11 + $0xc0] sm:$0xff] }
  0x80   :  { %4907 = vmatpush1.bf16.msra.mxu1 %v6477_v50  ;;  %v6585_v4 = vpack.c.bf16 %v682_v59, %v679_v57  ;;  %v681_v6 = vld [vmem:[#allocation11 + $0xd8] sm:$0xff]  ;;  %v6588_v12 = vpack.c.bf16 %v665_v63, %v662_v62  ;;  %v688_v14 = vld [vmem:[#allocation11 + $0x110] sm:$0xff]  ;;  %v671_v17 = vld [vmem:[#allocation11 + $0x88] sm:$0xff] }
  0x81   :  { %4909 = vmatprep.subr.bf16.mxu1 %v6480_v51  ;;  %4927 = vmatpush3.bf16.msra.mxu0 %v6492_v56  ;;  %v685_v10 = vld [vmem:[#allocation11 + $0xf8] sm:$0xff]  ;;  %v668_v16 = vld [vmem:[#allocation11 + $0x70] sm:$0xff]  ;;  %v6594_v20 = vpack.c.bf16 %v681_v6, %v678_v5  ;;  %v687_v26 = vld [vmem:[#allocation11 + $0x108] sm:$0xff] }
  0x82   :  { %4928 = vmatprep.subr.bf16.mxu0 %v7452_v24  ;;  %v6597_v23 = vpack.c.bf16 %v688_v14, %v685_v10  ;;  %v684_v25 = vld [vmem:[#allocation11 + $0xf0] sm:$0xff]  ;;  %v691_v31 = vld [vmem:[#allocation11 + $0x128] sm:$0xff]  ;;  %v6600_v33 = vpack.c.bf16 %v671_v17, %v668_v16  ;;  %v694_v34 = vld [vmem:[#allocation11 + $0x140] sm:$0xff] }
  0x83   :  { %v674_v38 = vld [vmem:[#allocation11 + $0xa0] sm:$0xff]  ;;  %v677_v39 = vld [vmem:[#allocation11 + $0xb8] sm:$0xff]  ;;  %v6604_v42 = vpack.c.bf16 %v687_v26, %v684_v25  ;;  %v6607_v45 = vpack.c.bf16 %v694_v34, %v691_v31  ;;  %v700_v57 = vld [vmem:[#allocation11 + $0x170] sm:$0xff] }
  0x84   :  { %4911 = vmatpush1.bf16.msra.mxu1 %v6505_v60  ;;  %v690_v47 = vld [vmem:[#allocation11 + $0x120] sm:$0xff]  ;;  %v693_v48 = vld [vmem:[#allocation11 + $0x138] sm:$0xff]  ;;  %v6610_v55 = vpack.c.bf16 %v677_v39, %v674_v38  ;;  %v680_v59 = vld [vmem:[#allocation11 + $0xd0] sm:$0xff] }
  0x85   :  { %4913 = vmatprep.subr.bf16.mxu1 %v6508_v61  ;;  %4930 = vmatpush3.bf16.msra.mxu0 %v6517_v3  ;;  %v697_v54 = vld [vmem:[#allocation11 + $0x158] sm:$0xff]  ;;  %v683_v62 = vld [vmem:[#allocation11 + $0xe8] sm:$0xff]  ;;  %v6614_v63 = vpack.c.bf16 %v693_v48, %v690_v47  ;;  %v696_v6 = vld [vmem:[#allocation11 + $0x150] sm:$0xff] }
  0x86   :  { %4931 = vmatprep.subr.bf16.mxu0 %v7452_v24  ;;  %v6617_v5 = vpack.c.bf16 %v700_v57, %v697_v54  ;;  %v699_v10 = vld [vmem:[#allocation11 + $0x168] sm:$0xff]  ;;  %v6620_v14 = vpack.c.bf16 %v683_v62, %v680_v59  ;;  %v686_v16 = vld [vmem:[#allocation11 + $0x100] sm:$0xff]  ;;  %v689_v17 = vld [vmem:[#allocation11 + $0x118] sm:$0xff]  ;;  %v148_v54 = vsub.s32 0, %v6310_v7  ;;  %v156_v57 = vsub.s32 2, %v6310_v7 }
  0x87   :  { %v6624_v25 = vpack.c.bf16 %v699_v10, %v696_v6  ;;  %v6628_v26 = vpack.c.bf16 %v689_v17, %v686_v16  ;;  %v692_v31 = vld [vmem:[#allocation11 + $0x130] sm:$0xff]  ;;  %v695_v34 = vld [vmem:[#allocation11 + $0x148] sm:$0xff]  ;;  %v698_v39 = vld [vmem:[#allocation11 + $0x160] sm:$0xff]  ;;  %v152_v62 = vsub.s32 1, %v6310_v7  ;;  %v160_v6 = vsub.s32 3, %v6310_v7 }
  0x88   :  { %4915 = vmatpush1.bf16.msra.mxu1 %v6527_v8  ;;  %v6633_v38 = vpack.c.bf16 %v695_v34, %v692_v31  ;;  %v701_v47 = vld [vmem:[#allocation11 + $0x178] sm:$0xff] }
  0x89   :  { %4941 = vmatprep.subr.bf16.mxu1 %v6530_v9  ;;  %4933 = vmatpush3.bf16.msra.mxu0 %v6533_v15  ;;  %v6641_v48 = vpack.c.bf16 %v701_v47, %v698_v39  ;;  %v144_v59 = vld [vmem:[#allocation10] sm:$0x3f] }
  0x8a   :  { %4934 = vmatprep.subr.bf16.mxu0 %v7452_v24  ;;  %v149_v10 = vrot.slane %v144_v59, %v148_v54  ;;  %v157_v16 = vrot.slane %v144_v59, %v156_v57  ;;  %v153_v17 = vrot.slane %v144_v59, %v152_v62  ;;  %v161_v31 = vrot.slane %v144_v59, %v160_v6 }
  0x8b   :  { %786 = vmatmul.mubr.f32.vlgmr.msra.gmra.mrb[4].mxu1 %v7446_v0 }
  0x8c   :  { %4943 = vmatpush1.bf16.msra.mxu1 %v6543_v21  ;;  %926 = vmatprep.mubr.f32.mxu1 %v7446_v0 }
  0x8d   :  { %4945 = vmatprep.subr.bf16.mxu1 %v6546_v22  ;;  %4936 = vmatpush3.bf16.msra.mxu0 %v6549_v30 }
  0x8e   :  { %4937 = vmatprep.subr.bf16.mxu0 %v7452_v24 }
  0x90   :  { %4947 = vmatpush1.bf16.msra.mxu1 %v6560_v35 }
  0x91   :  { %4949 = vmatprep.subr.bf16.mxu1 %v6564_v37  ;;  %4939 = vmatpush3.bf16.msra.mxu0 %v6567_v44 }
  0x92   :  { %4972 = vmatprep.subr.bf16.mxu0 %v7452_v24 }
  0x94   :  { %4951 = vmatpush1.bf16.msra.mxu1 %v6571_v49  ;;  %4245 = vmatmul.mubr.f32.vlgmr.msra.gmra.mrb[8].mxu0 %v7446_v0 }
  0x95   :  { %4953 = vmatprep.subr.bf16.mxu1 %v6574_v53  ;;  %4974 = vmatpush3.bf16.msra.mxu0 %v6577_v58 }
  0x96   :  { %4975 = vmatprep.subr.bf16.mxu0 %v7452_v24  ;;  %4279 = vmatprep.mubr.msk.f32.mxu0 %vm6169_vm1, %v7446_v0 }
  0x98   :  { %4955 = vmatpush1.bf16.msra.mxu1 %v6581_v2 }
  0x99   :  { %4957 = vmatprep.subr.bf16.mxu1 %v6585_v4  ;;  %4977 = vmatpush3.bf16.msra.mxu0 %v6588_v12 }
  0x9a   :  { %4978 = vmatprep.subr.bf16.mxu0 %v7452_v24 }
  0x9c   :  { %4959 = vmatpush1.bf16.msra.mxu1 %v6594_v20 }
  0x9d   :  { %4961 = vmatprep.subr.bf16.mxu1 %v6597_v23  ;;  %4980 = vmatpush3.bf16.msra.mxu0 %v6600_v33 }
  0x9e   :  { %4981 = vmatprep.subr.bf16.mxu0 %v7452_v24 }
  0xa0   :  { %4963 = vmatpush1.bf16.msra.mxu1 %v6604_v42 }
  0xa1   :  { %4965 = vmatprep.subr.bf16.mxu1 %v6607_v45  ;;  %4983 = vmatpush3.bf16.msra.mxu0 %v6610_v55 }
  0xa2   :  { %4984 = vmatprep.subr.bf16.mxu0 %v7452_v24 }
  0xa4   :  { %4967 = vmatpush1.bf16.msra.mxu1 %v6614_v63 }
  0xa5   :  { %4969 = vmatprep.subr.bf16.mxu1 %v6617_v5  ;;  %4986 = vmatpush3.bf16.msra.mxu0 %v6620_v14 }
  0xa6   :  { %4987 = vmatprep.subr.bf16.mxu0 %v7452_v24 }
  0xa8   :  { %4971 = vmatpush1.bf16.msra.mxu1 %v6624_v25 }
  0xa9   :  { %4989 = vmatpush3.bf16.msra.mxu0 %v6628_v26  ;;  %4997 = vmatprep.subr.bf16.mxu1 %v6322_v43 }
  0xaa   :  { %4990 = vmatprep.subr.bf16.mxu0 %v7452_v24 }
  0xab   :  { %927 = vmatmul.mubr.f32.vlgmr.msra.gmra.mrb[6].mxu1 %v7446_v0 }
  0xac   :  { %4999 = vmatpush1.bf16.msra.mxu1 %v6332_v52  ;;  %1131 = vmatprep.mubr.f32.mxu1 %v7446_v0 }
  0xad   :  { %4992 = vmatpush3.bf16.msra.mxu0 %v6633_v38  ;;  %5001 = vmatprep.subr.bf16.mxu1 %v6341_v1 }
  0xae   :  { %4993 = vmatprep.subr.bf16.mxu0 %v7452_v24 }
  0xb0   :  { %5003 = vmatpush1.bf16.msra.mxu1 %v6359_v11 }
  0xb1   :  { %4995 = vmatpush3.bf16.msra.mxu0 %v6641_v48  ;;  %5005 = vmatprep.subr.bf16.mxu1 %v6362_v13 }
  0xb2   :  { %5028 = vmatprep.subr.bf16.mxu0 %v7452_v24 }
  0xb4   :  { %4280 = vmatmul.mubr.f32.vlgmr.msra.gmra.mrb[10].mxu0 %v7446_v0  ;;  %5007 = vmatpush1.bf16.msra.mxu1 %v6381_v18 }
  0xb5   :  { %5030 = vmatpush3.bf16.msra.mxu0 %v6408_v28  ;;  %5009 = vmatprep.subr.bf16.mxu1 %v6385_v19 }
  0xb6   :  { %5031 = vmatprep.subr.bf16.mxu0 %v7452_v24  ;;  %4314 = vmatprep.mubr.msk.f32.mxu0 %vm6169_vm1, %v7446_v0 }
  0xb8   :  { %5011 = vmatpush1.bf16.msra.mxu1 %v6411_v29 }
  0xb9   :  { %5033 = vmatpush3.bf16.msra.mxu0 %v6433_v36  ;;  %5013 = vmatprep.subr.bf16.mxu1 %v6421_v32 }
  0xba   :  { %5034 = vmatprep.subr.bf16.mxu0 %v7452_v24 }
  0xbc   :  { %5015 = vmatpush1.bf16.msra.mxu1 %v6447_v40 }
  0xbd   :  { %5036 = vmatpush3.bf16.msra.mxu0 %v6464_v46  ;;  %5017 = vmatprep.subr.bf16.mxu1 %v6452_v41 }
  0xbe   :  { %5037 = vmatprep.subr.bf16.mxu0 %v7452_v24 }
  0xc0   :  { %5019 = vmatpush1.bf16.msra.mxu1 %v6477_v50 }
  0xc1   :  { %5039 = vmatpush3.bf16.msra.mxu0 %v6492_v56  ;;  %5021 = vmatprep.subr.bf16.mxu1 %v6480_v51 }
  0xc2   :  { %5040 = vmatprep.subr.bf16.mxu0 %v7452_v24 }
  0xc4   :  { %5023 = vmatpush1.bf16.msra.mxu1 %v6505_v60 }
  0xc5   :  { %5042 = vmatpush3.bf16.msra.mxu0 %v6517_v3  ;;  %5025 = vmatprep.subr.bf16.mxu1 %v6508_v61 }
  0xc6   :  { %5043 = vmatprep.subr.bf16.mxu0 %v7452_v24 }
  0xc8   :  { %5027 = vmatpush1.bf16.msra.mxu1 %v6527_v8  ;;  %v168_v8 = vsub.s32 5, %v6310_v7 }
  0xc9   :  { %5045 = vmatpush3.bf16.msra.mxu0 %v6533_v15  ;;  %5053 = vmatprep.subr.bf16.mxu1 %v6530_v9 }
  0xca   :  { %5046 = vmatprep.subr.bf16.mxu0 %v7452_v24  ;;  %v169_v3 = vrot.slane %v144_v59, %v168_v8 }
  0xcd   :  { %5048 = vmatpush3.bf16.msra.mxu0 %v6549_v30 }
  0xce   :  { %5049 = vmatprep.subr.bf16.mxu0 %v7452_v24 }
  0xd1   :  { %5051 = vmatpush3.bf16.msra.mxu0 %v6567_v44 }
  0xd2   :  { %5084 = vmatprep.subr.bf16.mxu0 %v7452_v24  ;;  %v164_v24 = vsub.s32 4, %v6310_v7 }
  0xd4   :  { %v165_v41 = vrot.slane %v144_v59, %v164_v24 }
 0x13e   :  { %v289_v34 = vpop.f32.mrb[0].mxu0  ;;  %v366_v39 = vpop.f32.mrb[0].mxu1 }
 0x13f   :  { %v290_v47 = vadd.f32 %v289_v34, %v149_v10  ;;  %v367_v0 = vadd.f32 %v366_v39, %v157_v16  ;;  %v291_v9 = vpop.f32.mrb[1].mxu0  ;;  %v368_v44 = vpop.f32.mrb[1].mxu1 }
 0x140   :  { %v292_v61 = vadd.f32 %v291_v9, %v153_v17  ;;  %v369_v30 = vadd.f32 %v368_v44, %v161_v31 }
 0x142   :  { %v466_v60 = vcombine.low %v290_v47, %v292_v61  ;;  %v467_v51 = vcombine.high %v290_v47, %v292_v61  ;;  %v468_v15 = vcombine.low %v367_v0, %v369_v30  ;;  %v469_v50 = vcombine.high %v367_v0, %v369_v30  ;;  %v295_v54 = vpop.f32.mrb[2].mxu0  ;;  %v372_v57 = vpop.f32.mrb[2].mxu1 }
 0x143   :  { %v296_v62 = vadd.f32 %v295_v54, %v149_v10  ;;  %v297_v6 = vpop.f32.mrb[3].mxu0  ;;  %v373_v34 = vadd.f32 %v372_v57, %v157_v16  ;;  %v374_v39 = vpop.f32.mrb[3].mxu1 }
 0x144   :  { %v476_v40 = vrot.slane %v466_v60, %v6313_v27  ;;  %v483_v32 = vrot.slane %v467_v51, %v6313_v27  ;;  %v490_v7 = vrot.slane %v468_v15, %v6313_v27  ;;  %v497_v9 = vrot.slane %v469_v50, %v6313_v27 }
 0x145   :  { %v298_v44 = vadd.f32 %v297_v6, %v153_v17  ;;  %v375_v61 = vadd.f32 %v374_v39, %v161_v31 }
 0x146   :  { %v498_v47 = vcombine.low %v476_v40, %v490_v7  ;;  %v499_v0 = vcombine.high %v476_v40, %v490_v7  ;;  %v500_v30 = vcombine.low %v483_v32, %v497_v9  ;;  %v501_v56 = vcombine.high %v483_v32, %v497_v9  ;;  %v443_v10 = vpop.f32.mrb[4].mxu0 }
 0x147   :  { %v520_v54 = vcombine.low %v296_v62, %v298_v44  ;;  %v521_v24 = vcombine.high %v296_v62, %v298_v44  ;;  %v444_v8 = vadd.f32 %v443_v10, %v165_v41  ;;  %v445_v59 = vpop.f32.mrb[5].mxu0  ;;  %v522_v16 = vcombine.low %v373_v34, %v375_v61 }
 0x148   :  { %590 = vst [vmem:[#allocation2] sm:$0xff] %v498_v47  ;;  %592 = vst [vmem:[#allocation2 + $0xc] sm:$0xff] %v499_v0  ;;  %v446_v51 = vadd.f32 %v445_v59, %v169_v3  ;;  %v523_v60 = vcombine.high %v373_v34, %v375_v61 }
 0x149   :  { %594 = vst [vmem:[#allocation2 + $0x18] sm:$0xff] %v500_v30  ;;  %596 = vst [vmem:[#allocation2 + $0x24] sm:$0xff] %v501_v56  ;;  %v530_v50 = vrot.slane %v520_v54, %v6313_v27  ;;  %v537_v15 = vrot.slane %v521_v24, %v6313_v27  ;;  %v544_v40 = vrot.slane %v522_v16, %v6313_v27 }
 0x14a   :  { %v502_v17 = vcombine.low %v444_v8, %v446_v51  ;;  %v503_v32 = vcombine.high %v444_v8, %v446_v51  ;;  %v449_v31 = vpop.f32.mrb[6].mxu0  ;;  %v551_v57 = vrot.slane %v523_v60, %v6313_v27 }
 0x14b   :  { %v450_v62 = vadd.f32 %v449_v31, %v165_v41  ;;  %v552_v6 = vcombine.low %v530_v50, %v544_v40  ;;  %v553_v39 = vcombine.high %v530_v50, %v544_v40  ;;  %v451_v7 = vpop.f32.mrb[7].mxu0 }
 0x14c   :  { %v510_v9 = vrot.slane %v502_v17, %v6313_v27  ;;  %v517_v56 = vrot.slane %v503_v32, %v6313_v27  ;;  %3855 = vst.sshfl [vmem:[#allocation2 + $0x8] sm:$0x33 pattern:$0x76325410] %v502_v17  ;;  %v554_v34 = vcombine.low %v537_v15, %v551_v57  ;;  %v555_v44 = vcombine.high %v537_v15, %v551_v57 }
 0x14d   :  { %3856 = vst.sshfl [vmem:[#allocation2 + $0x20] sm:$0x33 pattern:$0x76325410] %v503_v32  ;;  %598 = vst [vmem:[#allocation2 + $0x30] sm:$0xff] %v552_v6  ;;  %v452_v61 = vadd.f32 %v451_v7, %v169_v3 }
 0x14e   :  { %600 = vst [vmem:[#allocation2 + $0x3c] sm:$0xff] %v553_v39  ;;  %v518_v47 = vcombine.high %v510_v9, %v510_v9  ;;  %v519_v0 = vcombine.high %v517_v56, %v517_v56  ;;  %602 = vst [vmem:[#allocation2 + $0x48] sm:$0xff] %v554_v34 }
 0x14f   :  { %604 = vst [vmem:[#allocation2 + $0x54] sm:$0xff] %v555_v44  ;;  %v556_v30 = vcombine.low %v450_v62, %v452_v61  ;;  %v557_v41 = vcombine.high %v450_v62, %v452_v61  ;;  %v718_v59 = vld [vmem:[#allocation2] sm:$0x3f] }
 0x150   :  { %593 = vst [vmem:[#allocation2 + $0x14] sm:$0xf] %v518_v47  ;;  %597 = vst [vmem:[#allocation2 + $0x2c] sm:$0xf] %v519_v0  ;;  %v1011_v60 = vrot.slane %v718_v59, 2  ;;  %v1022_v9 = vrot.slane %v718_v59, 4 }
 0x151   :  { %v564_v10 = vrot.slane %v556_v30, %v6313_v27  ;;  %v571_v54 = vrot.slane %v557_v41, %v6313_v27  ;;  %3857 = vst.sshfl [vmem:[#allocation2 + $0x38] sm:$0x33 pattern:$0x76325410] %v556_v30  ;;  %v6701_v62 = vld [vmem:[%s7435_s4] ss:$0 sm:$0xff] }
 0x152   :  { %3858 = vst.sshfl [vmem:[#allocation2 + $0x50] sm:$0x33 pattern:$0x76325410] %v557_v41 }
 0x153   :  { %v572_v24 = vcombine.high %v564_v10, %v564_v10  ;;  %v573_v8 = vcombine.high %v571_v54, %v571_v54 }
 0x155   :  { %601 = vst [vmem:[#allocation2 + $0x44] sm:$0xf] %v572_v24  ;;  %605 = vst [vmem:[#allocation2 + $0x5c] sm:$0xf] %v573_v8 }
 0x15c   :  { %v720_v44 = vld [vmem:[#allocation2 + $0x5a] sm:$0x3f] }
 0x15d   :  { %v1038_v30 = vrot.slane %v720_v44, 2 }
 0x15e   :  { %v787_v3 = vpop.f32.mrb[4].mxu1 }
 0x15f   :  { %v1003_v16 = vadd.f32 %v787_v3, %v718_v59  ;;  %v789_v51 = vpop.f32.mrb[5].mxu1 }
 0x160   :  { %v1013_v15 = vadd.f32 %v1011_v60, %v789_v51 }
 0x161   :  { %v3861_v50 = vmul.f32 -1.442695, %v1003_v16 }
 0x162   :  { %v3862_v40 = vmul.f32 -1.442695, %v1013_v15 }
 0x163   :  { %5853 = vpow2.f32 %v3861_v50  ;;  %v1057_v50 = vld [vmem:[#allocation3] sm:$0x3] }
 0x164   :  { %5855 = vpow2.f32 %v3862_v40 }
 0x167   :  { %v858_v17 = vpop.f32.mrb[8].mxu0 }
 0x168   :  { %v4246_v32 = vpop.f32.mrb[9].mxu0  ;;  %v1020_v39 = vadd.f32 %v6701_v62, %v858_v17 }
 0x16d   :  { %v5854_v31 = vpop.eup %5853 }
 0x16e   :  { %v1007_v27 = vadd.f32 1.0, %v5854_v31  ;;  %v5856_v57 = vpop.eup %5855  ;;  %v7493_v31 = vmov 0.0|0.0  }
 0x16f   :  { %v1017_v6 = vadd.f32 1.0, %v5856_v57 }
 0x170   :  { %5857 = vrcp.f32 %v1007_v27  ;;  %v7494_v27 = vmov 0.0  }
 0x171   :  { %5859 = vrcp.f32 %v1017_v6  ;;  %v6723_v6 = vld [vmem:[%s7437_s6] ss:$0 sm:$0xff] }
 0x17a   :  { %v5858_v7 = vpop.eup %5857 }
 0x17b   :  { %v1021_v56 = vmul.f32 %v5858_v7, %v1020_v39  ;;  %v5860_v54 = vpop.eup %5859 }
 0x17c   :  { %v1026_v3 = vsub.f32 1.0, %v5860_v54  ;;  %v1028_v60 = vmul.f32 0.0, %v5860_v54 }
 0x17d   :  { %v1024_v34 = vadd.f32 %v1022_v9, %v1021_v56  ;;  %v1049_v56 = vrot.slane %v720_v44, 4 }
 0x17e   :  { %v928_v61 = vpop.f32.mrb[6].mxu1 }
 0x17f   :  { %5861 = vtanh.f32 %v1024_v34  ;;  %v1030_v47 = vadd.f32 %v928_v61, %v720_v44  ;;  %v930_v0 = vpop.f32.mrb[7].mxu1 }
 0x180   :  { %v1040_v10 = vadd.f32 %v1038_v30, %v930_v0 }
 0x181   :  { %v3863_v41 = vmul.f32 -1.442695, %v1030_v47 }
 0x182   :  { %v3864_v24 = vmul.f32 -1.442695, %v1040_v10  ;;  %v1060_v10 = vld [vmem:[#allocation4] sm:$0x3] }
 0x183   :  { %5863 = vpow2.f32 %v3863_v41 }
 0x184   :  { %5865 = vpow2.f32 %v3864_v24 }
 0x187   :  { %v999_v8 = vpop.f32.mrb[10].mxu0 }
 0x188   :  { %v4281_v16 = vpop.f32.mrb[11].mxu0  ;;  %v1047_v7 = vadd.f32 %v6723_v6, %v999_v8  ;;  %v7495_v8 = vld [vmem:[#allocation24_spill] sm:$0xff] }
 0x189   :  { %v5862_v51 = vpop.eup %5861  ;;  %v7497_v16 = vld [vmem:[#allocation20_spill] sm:$0xff] }
 0x18a   :  { %v1027_v59 = vmul.f32 %v5862_v51, %v1026_v3  ;;  %v7496_v3 = vld [vmem:[#allocation19_spill] sm:$0xff] }
 0x18b   :  { %v7498_v51 = vld [vmem:[#allocation27_spill] sm:$0xff] }
 0x18c   :  { %v6704_v15 = vadd.f32 %v1028_v60, %v1027_v59  ;;  %v7499_v59 = vld [vmem:[#allocation21_spill] sm:$0xff]  ;;  %v7500_v60 = vld [vmem:[#allocation22_spill] sm:$0xff] }
 0x18d   :  { %v5864_v40 = vpop.eup %5863 }
 0x18e   :  { %v1034_v17 = vadd.f32 1.0, %v5864_v40  ;;  %v1058_v32 = vadd.f32 %v1057_v50, %v6704_v15  ;;  %1132 = vmatmul.mubr.f32.vlgmr.msra.gmra.mrb[8].mxu1 %v6704_v15  ;;  %4315 = vmatmul.mubr.f32.vlgmr.msra.gmra.mrb[12].mxu0 %v6704_v15  ;;  %v5866_v57 = vpop.eup %5865  ;;  %v7501_v50 = vld [vmem:[#allocation30_spill] sm:$0xff]  ;;  %v7502_v40 = vld [vmem:[#allocation23_spill] sm:$0xff] }
 0x18f   :  { %5055 = vmatpush1.bf16.msra.mxu1 %v6543_v21  ;;  %5086 = vmatpush3.bf16.msra.mxu0 %v6577_v58  ;;  %v1044_v39 = vadd.f32 1.0, %v5866_v57  ;;  %v7505_v57 = vld [vmem:[#allocation26_spill] sm:$0xff] }
 0x190   :  { %5867 = vrcp.f32 %v1034_v17  ;;  %1059 = vst [vmem:[#allocation3] sm:$0x3] %v1058_v32  ;;  %5057 = vmatprep.subr.bf16.mxu1 %v6546_v22  ;;  %5087 = vmatprep.subr.bf16.mxu0 %v7493_v31  ;;  %v7503_v17 = vld [vmem:[#allocation25_spill] sm:$0xff]  ;;  %v7504_v32 = vld [vmem:[#allocation31_spill] sm:$0xff] }
 0x191   :  { %1272 = vmatprep.mubr.f32.mxu1 %v7494_v27  ;;  %4349 = vmatprep.mubr.msk.f32.mxu0 %vm6169_vm1, %v7494_v27  ;;  %5869 = vrcp.f32 %v1044_v39  ;;  %v7506_v39 = vld [vmem:[#allocation28_spill] sm:$0xff] }
 0x193   :  { %5059 = vmatpush1.bf16.msra.mxu1 %v6560_v35  ;;  %5089 = vmatpush3.bf16.msra.mxu0 %v6588_v12 }
 0x194   :  { %5061 = vmatprep.subr.bf16.mxu1 %v6564_v37  ;;  %5090 = vmatprep.subr.bf16.mxu0 %v7493_v31 }
 0x197   :  { %5063 = vmatpush1.bf16.msra.mxu1 %v6571_v49  ;;  %5092 = vmatpush3.bf16.msra.mxu0 %v6600_v33 }
 0x198   :  { %5065 = vmatprep.subr.bf16.mxu1 %v6574_v53  ;;  %5093 = vmatprep.subr.bf16.mxu0 %v7493_v31 }
 0x19a   :  { %v5868_v9 = vpop.eup %5867 }
 0x19b   :  { %v1048_v34 = vmul.f32 %v5868_v9, %v1047_v7  ;;  %5067 = vmatpush1.bf16.msra.mxu1 %v6581_v2  ;;  %5095 = vmatpush3.bf16.msra.mxu0 %v6610_v55  ;;  %v5870_v44 = vpop.eup %5869  ;;  %v7507_v7 = vld [vmem:[#allocation32_spill] sm:$0xff]  ;;  %v7508_v9 = vld [vmem:[#allocation29_spill] sm:$0xff] }
 0x19c   :  { %5069 = vmatprep.subr.bf16.mxu1 %v6585_v4  ;;  %5096 = vmatprep.subr.bf16.mxu0 %v7493_v31  ;;  %v1053_v47 = vsub.f32 1.0, %v5870_v44  ;;  %v1055_v41 = vmul.f32 0.0, %v5870_v44 }
 0x19d   :  { %v1051_v61 = vadd.f32 %v1049_v56, %v1048_v34  ;;  %v1064_v56 = vld [vmem:[#allocation2 + $0xc] sm:$0x3f] }
 0x19f   :  { %5871 = vtanh.f32 %v1051_v61  ;;  %5071 = vmatpush1.bf16.msra.mxu1 %v6594_v20  ;;  %5098 = vmatpush3.bf16.msra.mxu0 %v6620_v14 }
 0x1a0   :  { %5073 = vmatprep.subr.bf16.mxu1 %v6597_v23  ;;  %5099 = vmatprep.subr.bf16.mxu0 %v7493_v31 }
 0x1a3   :  { %5075 = vmatpush1.bf16.msra.mxu1 %v6604_v42  ;;  %5101 = vmatpush3.bf16.msra.mxu0 %v6628_v26 }
 0x1a4   :  { %5077 = vmatprep.subr.bf16.mxu1 %v6607_v45  ;;  %5102 = vmatprep.subr.bf16.mxu0 %v7493_v31 }
 0x1a7   :  { %5079 = vmatpush1.bf16.msra.mxu1 %v6614_v63  ;;  %5104 = vmatpush3.bf16.msra.mxu0 %v6633_v38 }
 0x1a8   :  { %5081 = vmatprep.subr.bf16.mxu1 %v6617_v5  ;;  %5105 = vmatprep.subr.bf16.mxu0 %v7493_v31 }
 0x1a9   :  { %v5872_v0 = vpop.eup %5871 }
 0x1aa   :  { %v1054_v30 = vmul.f32 %v5872_v0, %v1053_v47 }
 0x1ab   :  { %5083 = vmatpush1.bf16.msra.mxu1 %v6624_v25  ;;  %5107 = vmatpush3.bf16.msra.mxu0 %v6641_v48 }
 0x1ac   :  { %v6748_v54 = vadd.f32 %v1055_v41, %v1054_v30  ;;  %5109 = vmatprep.subr.bf16.mxu1 %v6322_v43  ;;  %5140 = vmatprep.subr.bf16.mxu0 %v7493_v31  ;;  %v1357_v30 = vrot.slane %v1064_v56, 2 }
 0x1ae   :  { %v1061_v24 = vadd.f32 %v1060_v10, %v6748_v54  ;;  %1273 = vmatmul.mubr.f32.vlgmr.msra.gmra.mrb[10].mxu1 %v6748_v54  ;;  %4350 = vmatmul.mubr.f32.vlgmr.msra.gmra.mrb[14].mxu0 %v6748_v54 }
 0x1af   :  { %5111 = vmatpush1.bf16.msra.mxu1 %v6332_v52  ;;  %5142 = vmatpush3.bf16.msra.mxu0 %v6408_v28 }
 0x1b0   :  { %1062 = vst [vmem:[#allocation4] sm:$0x3] %v1061_v24  ;;  %5113 = vmatprep.subr.bf16.mxu1 %v6341_v1  ;;  %5143 = vmatprep.subr.bf16.mxu0 %v7493_v31 }
 0x1b1   :  { %1477 = vmatprep.mubr.f32.mxu1 %v7494_v27  ;;  %4384 = vmatprep.mubr.msk.f32.mxu0 %vm6169_vm1, %v7494_v27 }
 0x1b3   :  { %5115 = vmatpush1.bf16.msra.mxu1 %v6359_v11  ;;  %5145 = vmatpush3.bf16.msra.mxu0 %v6433_v36 }
 0x1b4   :  { %5117 = vmatprep.subr.bf16.mxu1 %v6362_v13  ;;  %5146 = vmatprep.subr.bf16.mxu0 %v7493_v31 }
 0x1b7   :  { %5119 = vmatpush1.bf16.msra.mxu1 %v6381_v18  ;;  %5148 = vmatpush3.bf16.msra.mxu0 %v6464_v46 }
 0x1b8   :  { %5121 = vmatprep.subr.bf16.mxu1 %v6385_v19  ;;  %5149 = vmatprep.subr.bf16.mxu0 %v7493_v31 }
 0x1bb   :  { %5123 = vmatpush1.bf16.msra.mxu1 %v6411_v29  ;;  %5151 = vmatpush3.bf16.msra.mxu0 %v7495_v8 }
 0x1bc   :  { %5125 = vmatprep.subr.bf16.mxu1 %v7496_v3  ;;  %5152 = vmatprep.subr.bf16.mxu0 %v7493_v31 }
 0x1bf   :  { %5127 = vmatpush1.bf16.msra.mxu1 %v7497_v16  ;;  %5154 = vmatpush3.bf16.msra.mxu0 %v7498_v51 }
 0x1c0   :  { %5129 = vmatprep.subr.bf16.mxu1 %v7499_v59  ;;  %5155 = vmatprep.subr.bf16.mxu0 %v7493_v31 }
 0x1c3   :  { %5131 = vmatpush1.bf16.msra.mxu1 %v7500_v60  ;;  %5157 = vmatpush3.bf16.msra.mxu0 %v7501_v50  ;;  %v1066_v60 = vld [vmem:[#allocation2 + $0x4e] sm:$0x3f] }
 0x1c4   :  { %5133 = vmatprep.subr.bf16.mxu1 %v7502_v40  ;;  %5158 = vmatprep.subr.bf16.mxu0 %v7493_v31  ;;  %v1368_v40 = vrot.slane %v1064_v56, 4 }
 0x1c7   :  { %5135 = vmatpush1.bf16.msra.mxu1 %v7503_v17  ;;  %5160 = vmatpush3.bf16.msra.mxu0 %v7504_v32 }
 0x1c8   :  { %5137 = vmatprep.subr.bf16.mxu1 %v7505_v57  ;;  %5161 = vmatprep.subr.bf16.mxu0 %v7493_v31 }
 0x1cb   :  { %5139 = vmatpush1.bf16.msra.mxu1 %v7506_v39  ;;  %5163 = vmatpush3.bf16.msra.mxu0 %v7507_v7 }
 0x1cc   :  { %5165 = vmatprep.subr.bf16.mxu1 %v7508_v9  ;;  %5196 = vmatprep.subr.bf16.mxu0 %v7493_v31 }
 0x261   :  { %v1133_v34 = vpop.f32.mrb[8].mxu1  ;;  %v1204_v61 = vpop.f32.mrb[12].mxu0 }
 0x262   :  { %v1349_v44 = vadd.f32 %v1133_v34, %v1064_v56  ;;  %v1135_v47 = vpop.f32.mrb[9].mxu1  ;;  %v4316_v0 = vpop.f32.mrb[13].mxu0  ;;  %v1366_v9 = vadd.f32 %v6701_v62, %v1204_v61 }
 0x263   :  { %v1359_v10 = vadd.f32 %v1357_v30, %v1135_v47 }
 0x264   :  { %v3865_v41 = vmul.f32 -1.442695, %v1349_v44 }
 0x265   :  { %v3866_v24 = vmul.f32 -1.442695, %v1359_v10 }
 0x266   :  { %5873 = vpow2.f32 %v3865_v41  ;;  %v1384_v41 = vrot.slane %v1066_v60, 2 }
 0x267   :  { %5875 = vpow2.f32 %v3866_v24 }
 0x270   :  { %v5874_v57 = vpop.eup %5873 }
 0x271   :  { %v1353_v39 = vadd.f32 1.0, %v5874_v57  ;;  %v5876_v7 = vpop.eup %5875 }
 0x272   :  { %v1363_v32 = vadd.f32 1.0, %v5876_v7 }
 0x273   :  { %5877 = vrcp.f32 %v1353_v39 }
 0x274   :  { %5879 = vrcp.f32 %v1363_v32  ;;  %v1403_v32 = vld [vmem:[#allocation3] sm:$0x3] }
 0x27d   :  { %v5878_v17 = vpop.eup %5877 }
 0x27e   :  { %v1367_v50 = vmul.f32 %v5878_v17, %v1366_v9  ;;  %v5880_v39 = vpop.eup %5879 }
 0x27f   :  { %v1372_v24 = vsub.f32 1.0, %v5880_v39  ;;  %v1374_v17 = vmul.f32 %v5880_v39, %v6704_v15 }
 0x280   :  { %v1370_v34 = vadd.f32 %v1368_v40, %v1367_v50 }
 0x281   :  { %v1274_v0 = vpop.f32.mrb[10].mxu1  ;;  %v1345_v59 = vpop.f32.mrb[14].mxu0 }
 0x282   :  { %5881 = vtanh.f32 %v1370_v34  ;;  %v1376_v44 = vadd.f32 %v1274_v0, %v1066_v60  ;;  %v1276_v47 = vpop.f32.mrb[11].mxu1  ;;  %v4351_v30 = vpop.f32.mrb[15].mxu0 }
 0x283   :  { %v1386_v57 = vadd.f32 %v1384_v41, %v1276_v47  ;;  %v1395_v30 = vrot.slane %v1066_v60, 4 }
 0x284   :  { %v3867_v10 = vmul.f32 -1.442695, %v1376_v44  ;;  %v1393_v44 = vadd.f32 %v6723_v6, %v1345_v59 }
 0x285   :  { %v3868_v7 = vmul.f32 -1.442695, %v1386_v57 }
 0x286   :  { %5883 = vpow2.f32 %v3867_v10 }
 0x287   :  { %5885 = vpow2.f32 %v3868_v7 }
 0x28c   :  { %v5882_v61 = vpop.eup %5881 }
 0x28d   :  { %v1373_v56 = vmul.f32 %v5882_v61, %v1372_v24  ;;  %v1406_v61 = vld [vmem:[#allocation4] sm:$0x3] }
 0x28f   :  { %v6792_v50 = vadd.f32 %v1374_v17, %v1373_v56  ;;  %v7510_v17 = vld [vmem:[#allocation22_spill] sm:$0xff] }
 0x290   :  { %v5884_v40 = vpop.eup %5883 }
 0x291   :  { %v1380_v9 = vadd.f32 1.0, %v5884_v40  ;;  %v1404_v34 = vadd.f32 %v1403_v32, %v6792_v50  ;;  %1478 = vmatmul.mubr.f32.vlgmr.msra.gmra.mrb[12].mxu1 %v6792_v50  ;;  %4385 = vmatmul.mubr.f32.vlgmr.msra.gmra.mrb[16].mxu0 %v6792_v50  ;;  %v5886_v15 = vpop.eup %5885  ;;  %v7511_v40 = vld [vmem:[#allocation30_spill] sm:$0xff]  ;;  %v7512_v32 = vld [vmem:[#allocation23_spill] sm:$0xff] }
 0x292   :  { %5167 = vmatpush1.bf16.msra.mxu1 %v6543_v21  ;;  %5198 = vmatpush3.bf16.msra.mxu0 %v6577_v58  ;;  %v1390_v0 = vadd.f32 1.0, %v5886_v15  ;;  %v7515_v15 = vld [vmem:[#allocation26_spill] sm:$0xff] }
 0x293   :  { %5887 = vrcp.f32 %v1380_v9  ;;  %1405 = vst [vmem:[#allocation3] sm:$0x3] %v1404_v34  ;;  %5169 = vmatprep.subr.bf16.mxu1 %v6546_v22  ;;  %5199 = vmatprep.subr.bf16.mxu0 %v7493_v31  ;;  %v7513_v9 = vld [vmem:[#allocation25_spill] sm:$0xff]  ;;  %v7514_v34 = vld [vmem:[#allocation31_spill] sm:$0xff] }
 0x294   :  { %1618 = vmatprep.mubr.f32.mxu1 %v7494_v27  ;;  %4419 = vmatprep.mubr.msk.f32.mxu0 %vm6169_vm1, %v7494_v27  ;;  %5889 = vrcp.f32 %v1390_v0  ;;  %v7516_v0 = vld [vmem:[#allocation28_spill] sm:$0xff] }
 0x296   :  { %5171 = vmatpush1.bf16.msra.mxu1 %v6560_v35  ;;  %5201 = vmatpush3.bf16.msra.mxu0 %v6588_v12 }
 0x297   :  { %5173 = vmatprep.subr.bf16.mxu1 %v6564_v37  ;;  %5202 = vmatprep.subr.bf16.mxu0 %v7493_v31 }
 0x29a   :  { %5175 = vmatpush1.bf16.msra.mxu1 %v6571_v49  ;;  %5204 = vmatpush3.bf16.msra.mxu0 %v6600_v33 }
 0x29b   :  { %5177 = vmatprep.subr.bf16.mxu1 %v6574_v53  ;;  %5205 = vmatprep.subr.bf16.mxu0 %v7493_v31 }
 0x29d   :  { %v5888_v47 = vpop.eup %5887 }
 0x29e   :  { %v1394_v41 = vmul.f32 %v5888_v47, %v1393_v44  ;;  %5179 = vmatpush1.bf16.msra.mxu1 %v6581_v2  ;;  %5207 = vmatpush3.bf16.msra.mxu0 %v6610_v55  ;;  %v5890_v59 = vpop.eup %5889  ;;  %v7517_v44 = vld [vmem:[#allocation32_spill] sm:$0xff]  ;;  %v7518_v47 = vld [vmem:[#allocation29_spill] sm:$0xff] }
 0x29f   :  { %5181 = vmatprep.subr.bf16.mxu1 %v6585_v4  ;;  %5208 = vmatprep.subr.bf16.mxu0 %v7493_v31  ;;  %v1399_v60 = vsub.f32 1.0, %v5890_v59  ;;  %v1401_v7 = vmul.f32 %v5890_v59, %v6748_v54  ;;  %v7509_v54 = vld [vmem:[#allocation21_spill] sm:$0xff] }
 0x2a0   :  { %v1397_v10 = vadd.f32 %v1395_v30, %v1394_v41  ;;  %v1410_v30 = vld [vmem:[#allocation2 + $0x18] sm:$0x3f] }
 0x2a2   :  { %5891 = vtanh.f32 %v1397_v10  ;;  %5183 = vmatpush1.bf16.msra.mxu1 %v6594_v20  ;;  %5210 = vmatpush3.bf16.msra.mxu0 %v6620_v14 }
 0x2a3   :  { %5185 = vmatprep.subr.bf16.mxu1 %v6597_v23  ;;  %5211 = vmatprep.subr.bf16.mxu0 %v7493_v31 }
 0x2a6   :  { %5187 = vmatpush1.bf16.msra.mxu1 %v6604_v42  ;;  %5213 = vmatpush3.bf16.msra.mxu0 %v6628_v26 }
 0x2a7   :  { %5189 = vmatprep.subr.bf16.mxu1 %v6607_v45  ;;  %5214 = vmatprep.subr.bf16.mxu0 %v7493_v31 }
 0x2aa   :  { %5191 = vmatpush1.bf16.msra.mxu1 %v6614_v63  ;;  %5216 = vmatpush3.bf16.msra.mxu0 %v6633_v38 }
 0x2ab   :  { %5193 = vmatprep.subr.bf16.mxu1 %v6617_v5  ;;  %5217 = vmatprep.subr.bf16.mxu0 %v7493_v31 }
 0x2ac   :  { %v5892_v57 = vpop.eup %5891 }
 0x2ad   :  { %v1400_v39 = vmul.f32 %v5892_v57, %v1399_v60 }
 0x2ae   :  { %5195 = vmatpush1.bf16.msra.mxu1 %v6624_v25  ;;  %5219 = vmatpush3.bf16.msra.mxu0 %v6641_v48 }
 0x2af   :  { %v6832_v24 = vadd.f32 %v1401_v7, %v1400_v39  ;;  %5221 = vmatprep.subr.bf16.mxu1 %v6322_v43  ;;  %5252 = vmatprep.subr.bf16.mxu0 %v7493_v31  ;;  %v1703_v39 = vrot.slane %v1410_v30, 2 }
 0x2b1   :  { %v1407_v56 = vadd.f32 %v1406_v61, %v6832_v24  ;;  %1619 = vmatmul.mubr.f32.vlgmr.msra.gmra.mrb[14].mxu1 %v6832_v24  ;;  %4420 = vmatmul.mubr.f32.vlgmr.msra.gmra.mrb[18].mxu0 %v6832_v24 }
 0x2b2   :  { %5223 = vmatpush1.bf16.msra.mxu1 %v6332_v52  ;;  %5254 = vmatpush3.bf16.msra.mxu0 %v6408_v28 }
 0x2b3   :  { %1408 = vst [vmem:[#allocation4] sm:$0x3] %v1407_v56  ;;  %5225 = vmatprep.subr.bf16.mxu1 %v6341_v1  ;;  %5255 = vmatprep.subr.bf16.mxu0 %v7493_v31 }
 0x2b4   :  { %1823 = vmatprep.mubr.f32.mxu1 %v7494_v27  ;;  %4454 = vmatprep.mubr.msk.f32.mxu0 %vm6169_vm1, %v7494_v27 }
 0x2b6   :  { %5227 = vmatpush1.bf16.msra.mxu1 %v6359_v11  ;;  %5257 = vmatpush3.bf16.msra.mxu0 %v6433_v36 }
 0x2b7   :  { %5229 = vmatprep.subr.bf16.mxu1 %v6362_v13  ;;  %5258 = vmatprep.subr.bf16.mxu0 %v7493_v31 }
 0x2ba   :  { %5231 = vmatpush1.bf16.msra.mxu1 %v6381_v18  ;;  %5260 = vmatpush3.bf16.msra.mxu0 %v6464_v46 }
 0x2bb   :  { %5233 = vmatprep.subr.bf16.mxu1 %v6385_v19  ;;  %5261 = vmatprep.subr.bf16.mxu0 %v7493_v31 }
 0x2be   :  { %5235 = vmatpush1.bf16.msra.mxu1 %v6411_v29  ;;  %5263 = vmatpush3.bf16.msra.mxu0 %v7495_v8 }
 0x2bf   :  { %5237 = vmatprep.subr.bf16.mxu1 %v7496_v3  ;;  %5264 = vmatprep.subr.bf16.mxu0 %v7493_v31 }
 0x2c2   :  { %5239 = vmatpush1.bf16.msra.mxu1 %v7497_v16  ;;  %5266 = vmatpush3.bf16.msra.mxu0 %v7498_v51 }
 0x2c3   :  { %5241 = vmatprep.subr.bf16.mxu1 %v7509_v54  ;;  %5267 = vmatprep.subr.bf16.mxu0 %v7493_v31 }
 0x2c6   :  { %5243 = vmatpush1.bf16.msra.mxu1 %v7510_v17  ;;  %5269 = vmatpush3.bf16.msra.mxu0 %v7511_v40  ;;  %v1412_v17 = vld [vmem:[#allocation2 + $0x42] sm:$0x3f] }
 0x2c7   :  { %5245 = vmatprep.subr.bf16.mxu1 %v7512_v32  ;;  %5270 = vmatprep.subr.bf16.mxu0 %v7493_v31  ;;  %v1714_v32 = vrot.slane %v1410_v30, 4 }
 0x2ca   :  { %5247 = vmatpush1.bf16.msra.mxu1 %v7513_v9  ;;  %5272 = vmatpush3.bf16.msra.mxu0 %v7514_v34 }
 0x2cb   :  { %5249 = vmatprep.subr.bf16.mxu1 %v7515_v15  ;;  %5273 = vmatprep.subr.bf16.mxu0 %v7493_v31 }
 0x2ce   :  { %5251 = vmatpush1.bf16.msra.mxu1 %v7516_v0  ;;  %5275 = vmatpush3.bf16.msra.mxu0 %v7517_v44 }
 0x2cf   :  { %5277 = vmatprep.subr.bf16.mxu1 %v7518_v47  ;;  %5308 = vmatprep.subr.bf16.mxu0 %v7493_v31 }
 0x364   :  { %v1479_v41 = vpop.f32.mrb[12].mxu1  ;;  %v1550_v10 = vpop.f32.mrb[16].mxu0 }
 0x365   :  { %v1695_v59 = vadd.f32 %v1479_v41, %v1410_v30  ;;  %v1481_v60 = vpop.f32.mrb[13].mxu1  ;;  %v4386_v57 = vpop.f32.mrb[17].mxu0  ;;  %v1712_v47 = vadd.f32 %v6701_v62, %v1550_v10 }
 0x366   :  { %v1705_v61 = vadd.f32 %v1703_v39, %v1481_v60 }
 0x367   :  { %v3869_v7 = vmul.f32 -1.442695, %v1695_v59 }
 0x368   :  { %v3870_v56 = vmul.f32 -1.442695, %v1705_v61 }
 0x369   :  { %5893 = vpow2.f32 %v3869_v7  ;;  %v1730_v7 = vrot.slane %v1412_v17, 2 }
 0x36a   :  { %5895 = vpow2.f32 %v3870_v56 }
 0x373   :  { %v5894_v15 = vpop.eup %5893 }
 0x374   :  { %v1699_v0 = vadd.f32 1.0, %v5894_v15  ;;  %v5896_v44 = vpop.eup %5895 }
 0x375   :  { %v1709_v34 = vadd.f32 1.0, %v5896_v44 }
 0x376   :  { %5897 = vrcp.f32 %v1699_v0 }
 0x377   :  { %5899 = vrcp.f32 %v1709_v34  ;;  %v1749_v34 = vld [vmem:[#allocation3] sm:$0x3] }
 0x380   :  { %v5898_v9 = vpop.eup %5897 }
 0x381   :  { %v1713_v40 = vmul.f32 %v5898_v9, %v1712_v47  ;;  %v5900_v0 = vpop.eup %5899 }
 0x382   :  { %v1718_v56 = vsub.f32 1.0, %v5900_v0  ;;  %v1720_v9 = vmul.f32 %v5900_v0, %v6792_v50 }
 0x383   :  { %v1716_v41 = vadd.f32 %v1714_v32, %v1713_v40 }
 0x384   :  { %v1620_v57 = vpop.f32.mrb[14].mxu1  ;;  %v1691_v54 = vpop.f32.mrb[18].mxu0 }
 0x385   :  { %5901 = vtanh.f32 %v1716_v41  ;;  %v1722_v59 = vadd.f32 %v1620_v57, %v1412_v17  ;;  %v1622_v60 = vpop.f32.mrb[15].mxu1  ;;  %v4421_v39 = vpop.f32.mrb[19].mxu0 }
 0x386   :  { %v1732_v15 = vadd.f32 %v1730_v7, %v1622_v60  ;;  %v1741_v39 = vrot.slane %v1412_v17, 4 }
 0x387   :  { %v3871_v61 = vmul.f32 -1.442695, %v1722_v59  ;;  %v1739_v59 = vadd.f32 %v6723_v6, %v1691_v54 }
 0x388   :  { %v3872_v44 = vmul.f32 -1.442695, %v1732_v15 }
 0x389   :  { %5903 = vpow2.f32 %v3871_v61 }
 0x38a   :  { %5905 = vpow2.f32 %v3872_v44 }
 0x38f   :  { %v5902_v10 = vpop.eup %5901 }
 0x390   :  { %v1719_v30 = vmul.f32 %v5902_v10, %v1718_v56  ;;  %v1752_v10 = vld [vmem:[#allocation4] sm:$0x3] }
 0x392   :  { %v6876_v40 = vadd.f32 %v1720_v9, %v1719_v30  ;;  %v7520_v9 = vld [vmem:[#allocation22_spill] sm:$0xff] }
 0x393   :  { %v5904_v32 = vpop.eup %5903 }
 0x394   :  { %v1726_v47 = vadd.f32 1.0, %v5904_v32  ;;  %v1750_v41 = vadd.f32 %v1749_v34, %v6876_v40  ;;  %1824 = vmatmul.mubr.f32.vlgmr.msra.gmra.mrb[16].mxu1 %v6876_v40  ;;  %4455 = vmatmul.mubr.f32.vlgmr.msra.gmra.mrb[20].mxu0 %v6876_v40  ;;  %v5906_v50 = vpop.eup %5905  ;;  %v7521_v32 = vld [vmem:[#allocation30_spill] sm:$0xff]  ;;  %v7522_v34 = vld [vmem:[#allocation23_spill] sm:$0xff] }
 0x395   :  { %5279 = vmatpush1.bf16.msra.mxu1 %v6543_v21  ;;  %5310 = vmatpush3.bf16.msra.mxu0 %v6577_v58  ;;  %v1736_v57 = vadd.f32 1.0, %v5906_v50  ;;  %v7525_v50 = vld [vmem:[#allocation26_spill] sm:$0xff] }
 0x396   :  { %5907 = vrcp.f32 %v1726_v47  ;;  %1751 = vst [vmem:[#allocation3] sm:$0x3] %v1750_v41  ;;  %5281 = vmatprep.subr.bf16.mxu1 %v6546_v22  ;;  %5311 = vmatprep.subr.bf16.mxu0 %v7493_v31  ;;  %v7523_v47 = vld [vmem:[#allocation25_spill] sm:$0xff]  ;;  %v7524_v41 = vld [vmem:[#allocation31_spill] sm:$0xff] }
 0x397   :  { %1964 = vmatprep.mubr.f32.mxu1 %v7494_v27  ;;  %4489 = vmatprep.mubr.msk.f32.mxu0 %vm6169_vm1, %v7494_v27  ;;  %5909 = vrcp.f32 %v1736_v57  ;;  %v7526_v57 = vld [vmem:[#allocation28_spill] sm:$0xff] }
 0x399   :  { %5283 = vmatpush1.bf16.msra.mxu1 %v6560_v35  ;;  %5313 = vmatpush3.bf16.msra.mxu0 %v6588_v12 }
 0x39a   :  { %5285 = vmatprep.subr.bf16.mxu1 %v6564_v37  ;;  %5314 = vmatprep.subr.bf16.mxu0 %v7493_v31 }
 0x39d   :  { %5287 = vmatpush1.bf16.msra.mxu1 %v6571_v49  ;;  %5316 = vmatpush3.bf16.msra.mxu0 %v6600_v33 }
 0x39e   :  { %5289 = vmatprep.subr.bf16.mxu1 %v6574_v53  ;;  %5317 = vmatprep.subr.bf16.mxu0 %v7493_v31 }
 0x3a0   :  { %v5908_v60 = vpop.eup %5907 }
 0x3a1   :  { %v1740_v7 = vmul.f32 %v5908_v60, %v1739_v59  ;;  %5291 = vmatpush1.bf16.msra.mxu1 %v6581_v2  ;;  %5319 = vmatpush3.bf16.msra.mxu0 %v6610_v55  ;;  %v5910_v54 = vpop.eup %5909  ;;  %v7527_v59 = vld [vmem:[#allocation32_spill] sm:$0xff]  ;;  %v7528_v60 = vld [vmem:[#allocation29_spill] sm:$0xff] }
 0x3a2   :  { %5293 = vmatprep.subr.bf16.mxu1 %v6585_v4  ;;  %5320 = vmatprep.subr.bf16.mxu0 %v7493_v31  ;;  %v1745_v17 = vsub.f32 1.0, %v5910_v54  ;;  %v1747_v44 = vmul.f32 %v5910_v54, %v6832_v24  ;;  %v7519_v24 = vld [vmem:[#allocation21_spill] sm:$0xff] }
 0x3a3   :  { %v1743_v61 = vadd.f32 %v1741_v39, %v1740_v7  ;;  %v1756_v39 = vld [vmem:[#allocation2 + $0x24] sm:$0x3f] }
 0x3a5   :  { %5911 = vtanh.f32 %v1743_v61  ;;  %5295 = vmatpush1.bf16.msra.mxu1 %v6594_v20  ;;  %5322 = vmatpush3.bf16.msra.mxu0 %v6620_v14 }
 0x3a6   :  { %5297 = vmatprep.subr.bf16.mxu1 %v6597_v23  ;;  %5323 = vmatprep.subr.bf16.mxu0 %v7493_v31 }
 0x3a9   :  { %5299 = vmatpush1.bf16.msra.mxu1 %v6604_v42  ;;  %5325 = vmatpush3.bf16.msra.mxu0 %v6628_v26 }
 0x3aa   :  { %5301 = vmatprep.subr.bf16.mxu1 %v6607_v45  ;;  %5326 = vmatprep.subr.bf16.mxu0 %v7493_v31 }
 0x3ad   :  { %5303 = vmatpush1.bf16.msra.mxu1 %v6614_v63  ;;  %5328 = vmatpush3.bf16.msra.mxu0 %v6633_v38 }
 0x3ae   :  { %5305 = vmatprep.subr.bf16.mxu1 %v6617_v5  ;;  %5329 = vmatprep.subr.bf16.mxu0 %v7493_v31 }
 0x3af   :  { %v5912_v15 = vpop.eup %5911 }
 0x3b0   :  { %v1746_v0 = vmul.f32 %v5912_v15, %v1745_v17 }
 0x3b1   :  { %5307 = vmatpush1.bf16.msra.mxu1 %v6624_v25  ;;  %5331 = vmatpush3.bf16.msra.mxu0 %v6641_v48 }
 0x3b2   :  { %v6916_v56 = vadd.f32 %v1747_v44, %v1746_v0  ;;  %5333 = vmatprep.subr.bf16.mxu1 %v6322_v43  ;;  %5364 = vmatprep.subr.bf16.mxu0 %v7493_v31  ;;  %v2049_v0 = vrot.slane %v1756_v39, 2 }
 0x3b4   :  { %v1753_v30 = vadd.f32 %v1752_v10, %v6916_v56  ;;  %1965 = vmatmul.mubr.f32.vlgmr.msra.gmra.mrb[18].mxu1 %v6916_v56  ;;  %4490 = vmatmul.mubr.f32.vlgmr.msra.gmra.mrb[22].mxu0 %v6916_v56 }
 0x3b5   :  { %5335 = vmatpush1.bf16.msra.mxu1 %v6332_v52  ;;  %5366 = vmatpush3.bf16.msra.mxu0 %v6408_v28 }
 0x3b6   :  { %1754 = vst [vmem:[#allocation4] sm:$0x3] %v1753_v30  ;;  %5337 = vmatprep.subr.bf16.mxu1 %v6341_v1  ;;  %5367 = vmatprep.subr.bf16.mxu0 %v7493_v31 }
 0x3b7   :  { %2167 = vmatprep.mubr.f32.mxu1 %v7494_v27  ;;  %4524 = vmatprep.mubr.msk.f32.mxu0 %vm6169_vm1, %v7494_v27 }
 0x3b9   :  { %5339 = vmatpush1.bf16.msra.mxu1 %v6359_v11  ;;  %5369 = vmatpush3.bf16.msra.mxu0 %v6433_v36 }
 0x3ba   :  { %5341 = vmatprep.subr.bf16.mxu1 %v6362_v13  ;;  %5370 = vmatprep.subr.bf16.mxu0 %v7493_v31 }
 0x3bd   :  { %5343 = vmatpush1.bf16.msra.mxu1 %v6381_v18  ;;  %5372 = vmatpush3.bf16.msra.mxu0 %v6464_v46 }
 0x3be   :  { %5345 = vmatprep.subr.bf16.mxu1 %v6385_v19  ;;  %5373 = vmatprep.subr.bf16.mxu0 %v7493_v31 }
 0x3c1   :  { %5347 = vmatpush1.bf16.msra.mxu1 %v6411_v29  ;;  %5375 = vmatpush3.bf16.msra.mxu0 %v7495_v8 }
 0x3c2   :  { %5349 = vmatprep.subr.bf16.mxu1 %v7496_v3  ;;  %5376 = vmatprep.subr.bf16.mxu0 %v7493_v31 }
 0x3c5   :  { %5351 = vmatpush1.bf16.msra.mxu1 %v7497_v16  ;;  %5378 = vmatpush3.bf16.msra.mxu0 %v7498_v51 }
 0x3c6   :  { %5353 = vmatprep.subr.bf16.mxu1 %v7519_v24  ;;  %5379 = vmatprep.subr.bf16.mxu0 %v7493_v31 }
 0x3c9   :  { %5355 = vmatpush1.bf16.msra.mxu1 %v7520_v9  ;;  %5381 = vmatpush3.bf16.msra.mxu0 %v7521_v32  ;;  %v1758_v9 = vld [vmem:[#allocation2 + $0x36] sm:$0x3f] }
 0x3ca   :  { %5357 = vmatprep.subr.bf16.mxu1 %v7522_v34  ;;  %5382 = vmatprep.subr.bf16.mxu0 %v7493_v31  ;;  %v2060_v34 = vrot.slane %v1756_v39, 4 }
 0x3cd   :  { %5359 = vmatpush1.bf16.msra.mxu1 %v7523_v47  ;;  %5384 = vmatpush3.bf16.msra.mxu0 %v7524_v41 }
 0x3ce   :  { %5361 = vmatprep.subr.bf16.mxu1 %v7525_v50  ;;  %5385 = vmatprep.subr.bf16.mxu0 %v7493_v31 }
 0x3d1   :  { %5363 = vmatpush1.bf16.msra.mxu1 %v7526_v57  ;;  %5387 = vmatpush3.bf16.msra.mxu0 %v7527_v59 }
 0x3d2   :  { %5389 = vmatprep.subr.bf16.mxu1 %v7528_v60  ;;  %5420 = vmatprep.subr.bf16.mxu0 %v7493_v31 }
 0x467   :  { %v1825_v7 = vpop.f32.mrb[16].mxu1  ;;  %v1896_v61 = vpop.f32.mrb[20].mxu0 }
 0x468   :  { %v2041_v54 = vadd.f32 %v1825_v7, %v1756_v39  ;;  %v1827_v17 = vpop.f32.mrb[17].mxu1  ;;  %v4456_v15 = vpop.f32.mrb[21].mxu0  ;;  %v2058_v60 = vadd.f32 %v6701_v62, %v1896_v61 }
 0x469   :  { %v2051_v10 = vadd.f32 %v2049_v0, %v1827_v17 }
 0x46a   :  { %v3873_v44 = vmul.f32 -1.442695, %v2041_v54 }
 0x46b   :  { %v3874_v30 = vmul.f32 -1.442695, %v2051_v10 }
 0x46c   :  { %5913 = vpow2.f32 %v3873_v44  ;;  %v2076_v44 = vrot.slane %v1758_v9, 2 }
 0x46d   :  { %5915 = vpow2.f32 %v3874_v30 }
 0x476   :  { %v5914_v50 = vpop.eup %5913 }
 0x477   :  { %v2045_v57 = vadd.f32 1.0, %v5914_v50  ;;  %v5916_v59 = vpop.eup %5915 }
 0x478   :  { %v2055_v41 = vadd.f32 1.0, %v5916_v59 }
 0x479   :  { %5917 = vrcp.f32 %v2045_v57 }
 0x47a   :  { %5919 = vrcp.f32 %v2055_v41  ;;  %v2095_v41 = vld [vmem:[#allocation3] sm:$0x3] }
 0x483   :  { %v5918_v47 = vpop.eup %5917 }
 0x484   :  { %v2059_v32 = vmul.f32 %v5918_v47, %v2058_v60  ;;  %v5920_v57 = vpop.eup %5919 }
 0x485   :  { %v2064_v30 = vsub.f32 1.0, %v5920_v57  ;;  %v2066_v47 = vmul.f32 %v5920_v57, %v6876_v40 }
 0x486   :  { %v2062_v7 = vadd.f32 %v2060_v34, %v2059_v32 }
 0x487   :  { %v1966_v15 = vpop.f32.mrb[18].mxu1  ;;  %v2037_v24 = vpop.f32.mrb[22].mxu0 }
 0x488   :  { %5921 = vtanh.f32 %v2062_v7  ;;  %v2068_v54 = vadd.f32 %v1966_v15, %v1758_v9  ;;  %v1968_v17 = vpop.f32.mrb[19].mxu1  ;;  %v4491_v0 = vpop.f32.mrb[23].mxu0  ;;  %v2085_v15 = vadd.f32 %v6723_v6, %v2037_v24 }
 0x489   :  { %v2078_v50 = vadd.f32 %v2076_v44, %v1968_v17  ;;  %v2087_v17 = vrot.slane %v1758_v9, 4 }
 0x48a   :  { %v3875_v10 = vmul.f32 -1.442695, %v2068_v54 }
 0x48b   :  { %v3876_v59 = vmul.f32 -1.442695, %v2078_v50 }
 0x48c   :  { %5923 = vpow2.f32 %v3875_v10 }
 0x48d   :  { %5925 = vpow2.f32 %v3876_v59  ;;  %v2098_v59 = vld [vmem:[#allocation4] sm:$0x3] }
 0x492   :  { %v5922_v62 = vpop.eup %5921 }
 0x493   :  { %v2065_v39 = vmul.f32 %v5922_v62, %v2064_v30  ;;  %v7530_v62 = vld [vmem:[#allocation22_spill] sm:$0xff] }
 0x495   :  { %v6960_v32 = vadd.f32 %v2066_v47, %v2065_v39  ;;  %v7531_v39 = vld [vmem:[#allocation30_spill] sm:$0xff]  ;;  %v7532_v47 = vld [vmem:[#allocation23_spill] sm:$0xff] }
 0x496   :  { %v5924_v34 = vpop.eup %5923 }
 0x497   :  { %v2072_v60 = vadd.f32 1.0, %v5924_v34  ;;  %v2096_v61 = vadd.f32 %v2095_v41, %v6960_v32  ;;  %2168 = vmatmul.mubr.f32.vlgmr.msra.gmra.mrb[20].mxu1 %v6960_v32  ;;  %4525 = vmatmul.mubr.f32.vlgmr.msra.gmra.mrb[24].mxu0 %v6960_v32  ;;  %v5926_v40 = vpop.eup %5925  ;;  %v7533_v34 = vld [vmem:[#allocation25_spill] sm:$0xff]  ;;  %v7534_v41 = vld [vmem:[#allocation31_spill] sm:$0xff] }
 0x498   :  { %5391 = vmatpush1.bf16.msra.mxu1 %v6543_v21  ;;  %5422 = vmatpush3.bf16.msra.mxu0 %v6577_v58  ;;  %v2082_v7 = vadd.f32 1.0, %v5926_v40  ;;  %v7537_v40 = vld [vmem:[#allocation32_spill] sm:$0xff] }
 0x499   :  { %5927 = vrcp.f32 %v2072_v60  ;;  %2097 = vst [vmem:[#allocation3] sm:$0x3] %v2096_v61  ;;  %5393 = vmatprep.subr.bf16.mxu1 %v6546_v22  ;;  %5423 = vmatprep.subr.bf16.mxu0 %v7493_v31  ;;  %v7535_v60 = vld [vmem:[#allocation26_spill] sm:$0xff]  ;;  %v7536_v61 = vld [vmem:[#allocation28_spill] sm:$0xff] }
 0x49a   :  { %2308 = vmatprep.mubr.f32.mxu1 %v7494_v27  ;;  %4559 = vmatprep.mubr.msk.f32.mxu0 %vm6169_vm1, %v7494_v27  ;;  %5929 = vrcp.f32 %v2082_v7  ;;  %v7538_v7 = vld [vmem:[#allocation29_spill] sm:$0xff] }
 0x49c   :  { %5395 = vmatpush1.bf16.msra.mxu1 %v6560_v35  ;;  %5425 = vmatpush3.bf16.msra.mxu0 %v6588_v12 }
 0x49d   :  { %5397 = vmatprep.subr.bf16.mxu1 %v6564_v37  ;;  %5426 = vmatprep.subr.bf16.mxu0 %v7493_v31 }
 0x4a0   :  { %5399 = vmatpush1.bf16.msra.mxu1 %v6571_v49  ;;  %5428 = vmatpush3.bf16.msra.mxu0 %v6600_v33 }
 0x4a1   :  { %5401 = vmatprep.subr.bf16.mxu1 %v6574_v53  ;;  %5429 = vmatprep.subr.bf16.mxu0 %v7493_v31 }
 0x4a3   :  { %v5928_v54 = vpop.eup %5927 }
 0x4a4   :  { %v2086_v0 = vmul.f32 %v5928_v54, %v2085_v15  ;;  %5403 = vmatpush1.bf16.msra.mxu1 %v6581_v2  ;;  %5431 = vmatpush3.bf16.msra.mxu0 %v6610_v55  ;;  %v5930_v6 = vpop.eup %5929  ;;  %v2101_v15 = vld [vmem:[#allocation2 + $0x30] sm:$0x3f] }
 0x4a5   :  { %5405 = vmatprep.subr.bf16.mxu1 %v6585_v4  ;;  %5432 = vmatprep.subr.bf16.mxu0 %v7493_v31  ;;  %v2091_v24 = vsub.f32 1.0, %v5930_v6  ;;  %v2093_v50 = vmul.f32 %v5930_v6, %v6916_v56  ;;  %v7529_v56 = vld [vmem:[#allocation21_spill] sm:$0xff] }
 0x4a6   :  { %v2089_v44 = vadd.f32 %v2087_v17, %v2086_v0 }
 0x4a8   :  { %5931 = vtanh.f32 %v2089_v44  ;;  %5407 = vmatpush1.bf16.msra.mxu1 %v6594_v20  ;;  %5434 = vmatpush3.bf16.msra.mxu0 %v6620_v14 }
 0x4a9   :  { %5409 = vmatprep.subr.bf16.mxu1 %v6597_v23  ;;  %5435 = vmatprep.subr.bf16.mxu0 %v7493_v31 }
 0x4ac   :  { %5411 = vmatpush1.bf16.msra.mxu1 %v6604_v42  ;;  %5437 = vmatpush3.bf16.msra.mxu0 %v6628_v26 }
 0x4ad   :  { %5413 = vmatprep.subr.bf16.mxu1 %v6607_v45  ;;  %5438 = vmatprep.subr.bf16.mxu0 %v7493_v31 }
 0x4b0   :  { %5415 = vmatpush1.bf16.msra.mxu1 %v6614_v63  ;;  %5440 = vmatpush3.bf16.msra.mxu0 %v6633_v38 }
 0x4b1   :  { %5417 = vmatprep.subr.bf16.mxu1 %v6617_v5  ;;  %5441 = vmatprep.subr.bf16.mxu0 %v7493_v31 }
 0x4b2   :  { %v5932_v9 = vpop.eup %5931 }
 0x4b3   :  { %v2092_v10 = vmul.f32 %v5932_v9, %v2091_v24  ;;  %v2393_v24 = vrot.slane %v2101_v15, 2 }
 0x4b4   :  { %5419 = vmatpush1.bf16.msra.mxu1 %v6624_v25  ;;  %5443 = vmatpush3.bf16.msra.mxu0 %v6641_v48 }
 0x4b5   :  { %v7000_v57 = vadd.f32 %v2093_v50, %v2092_v10  ;;  %5445 = vmatprep.subr.bf16.mxu1 %v6322_v43  ;;  %5476 = vmatprep.subr.bf16.mxu0 %v7493_v31 }
 0x4b7   :  { %v2099_v30 = vadd.f32 %v2098_v59, %v7000_v57  ;;  %2309 = vmatmul.mubr.f32.vlgmr.msra.gmra.mrb[22].mxu1 %v7000_v57  ;;  %4560 = vmatmul.mubr.f32.vlgmr.msra.gmra.mrb[26].mxu0 %v7000_v57 }
 0x4b8   :  { %5447 = vmatpush1.bf16.msra.mxu1 %v6332_v52  ;;  %5478 = vmatpush3.bf16.msra.mxu0 %v6408_v28 }
 0x4b9   :  { %2100 = vst [vmem:[#allocation4] sm:$0x3] %v2099_v30  ;;  %5449 = vmatprep.subr.bf16.mxu1 %v6341_v1  ;;  %5479 = vmatprep.subr.bf16.mxu0 %v7493_v31 }
 0x4ba   :  { %2511 = vmatprep.mubr.f32.mxu1 %v7494_v27  ;;  %4594 = vmatprep.mubr.msk.f32.mxu0 %vm6169_vm1, %v7494_v27 }
 0x4bc   :  { %5451 = vmatpush1.bf16.msra.mxu1 %v6359_v11  ;;  %5481 = vmatpush3.bf16.msra.mxu0 %v6433_v36 }
 0x4bd   :  { %5453 = vmatprep.subr.bf16.mxu1 %v6362_v13  ;;  %5482 = vmatprep.subr.bf16.mxu0 %v7493_v31 }
 0x4c0   :  { %5455 = vmatpush1.bf16.msra.mxu1 %v6381_v18  ;;  %5484 = vmatpush3.bf16.msra.mxu0 %v6464_v46 }
 0x4c1   :  { %5457 = vmatprep.subr.bf16.mxu1 %v6385_v19  ;;  %5485 = vmatprep.subr.bf16.mxu0 %v7493_v31 }
 0x4c4   :  { %5459 = vmatpush1.bf16.msra.mxu1 %v6411_v29  ;;  %5487 = vmatpush3.bf16.msra.mxu0 %v7495_v8 }
 0x4c5   :  { %5461 = vmatprep.subr.bf16.mxu1 %v7496_v3  ;;  %5488 = vmatprep.subr.bf16.mxu0 %v7493_v31 }
 0x4c8   :  { %5463 = vmatpush1.bf16.msra.mxu1 %v7497_v16  ;;  %5490 = vmatpush3.bf16.msra.mxu0 %v7498_v51 }
 0x4c9   :  { %5465 = vmatprep.subr.bf16.mxu1 %v7529_v56  ;;  %5491 = vmatprep.subr.bf16.mxu0 %v7493_v31 }
 0x4cc   :  { %5467 = vmatpush1.bf16.msra.mxu1 %v7530_v62  ;;  %5493 = vmatpush3.bf16.msra.mxu0 %v7531_v39 }
 0x4cd   :  { %5469 = vmatprep.subr.bf16.mxu1 %v7532_v47  ;;  %5494 = vmatprep.subr.bf16.mxu0 %v7493_v31 }
 0x4d0   :  { %5471 = vmatpush1.bf16.msra.mxu1 %v7533_v34  ;;  %5496 = vmatpush3.bf16.msra.mxu0 %v7534_v41 }
 0x4d1   :  { %5473 = vmatprep.subr.bf16.mxu1 %v7535_v60  ;;  %5497 = vmatprep.subr.bf16.mxu0 %v7493_v31 }
 0x4d4   :  { %5475 = vmatpush1.bf16.msra.mxu1 %v7536_v61  ;;  %5499 = vmatpush3.bf16.msra.mxu0 %v7537_v40 }
 0x4d5   :  { %5501 = vmatprep.subr.bf16.mxu1 %v7538_v7  ;;  %5532 = vmatprep.subr.bf16.mxu0 %v7493_v31  ;;  %v7045_v7 = vld [vmem:[%s7435_s4] ss:$0 sm:$0xff] }
 0x56a   :  { %v2169_v54 = vpop.f32.mrb[20].mxu1  ;;  %v2240_v17 = vpop.f32.mrb[24].mxu0 }
 0x56b   :  { %v2385_v0 = vadd.f32 %v2169_v54, %v2101_v15  ;;  %v2171_v44 = vpop.f32.mrb[21].mxu1  ;;  %v4526_v6 = vpop.f32.mrb[25].mxu0  ;;  %v2402_v54 = vadd.f32 %v7045_v7, %v2240_v17 }
 0x56c   :  { %v2395_v10 = vadd.f32 %v2393_v24, %v2171_v44  ;;  %v2404_v6 = vrot.slane %v2101_v15, 4  ;;  %v2102_v44 = vld [vmem:[#allocation2 + $0x2a] sm:$0x3f] }
 0x56d   :  { %v3877_v9 = vmul.f32 -1.442695, %v2385_v0 }
 0x56e   :  { %v3878_v50 = vmul.f32 -1.442695, %v2395_v10 }
 0x56f   :  { %5933 = vpow2.f32 %v3877_v9 }
 0x570   :  { %5935 = vpow2.f32 %v3878_v50 }
 0x579   :  { %v5934_v59 = vpop.eup %5933 }
 0x57a   :  { %v2389_v30 = vadd.f32 1.0, %v5934_v59  ;;  %v5936_v40 = vpop.eup %5935 }
 0x57b   :  { %v2399_v61 = vadd.f32 1.0, %v5936_v40  ;;  %v2420_v40 = vrot.slane %v2102_v44, 2 }
 0x57c   :  { %5937 = vrcp.f32 %v2389_v30 }
 0x57d   :  { %5939 = vrcp.f32 %v2399_v61 }
 0x586   :  { %v5938_v60 = vpop.eup %5937 }
 0x587   :  { %v2403_v41 = vmul.f32 %v5938_v60, %v2402_v54  ;;  %v5940_v47 = vpop.eup %5939  ;;  %v2439_v54 = vld [vmem:[#allocation3] sm:$0x3] }
 0x588   :  { %v2408_v62 = vsub.f32 1.0, %v5940_v47  ;;  %v2410_v60 = vmul.f32 %v5940_v47, %v6960_v32 }
 0x589   :  { %v2406_v0 = vadd.f32 %v2404_v6, %v2403_v41 }
 0x58a   :  { %v2310_v24 = vpop.f32.mrb[22].mxu1  ;;  %v2381_v9 = vpop.f32.mrb[26].mxu0 }
 0x58b   :  { %5941 = vtanh.f32 %v2406_v0  ;;  %v2412_v10 = vadd.f32 %v2310_v24, %v2102_v44  ;;  %v2312_v50 = vpop.f32.mrb[23].mxu1  ;;  %v4561_v59 = vpop.f32.mrb[27].mxu0  ;;  %v2431_v24 = vrot.slane %v2102_v44, 4 }
 0x58c   :  { %v2422_v34 = vadd.f32 %v2420_v40, %v2312_v50 }
 0x58d   :  { %v3879_v30 = vmul.f32 -1.442695, %v2412_v10 }
 0x58e   :  { %v3880_v39 = vmul.f32 -1.442695, %v2422_v34 }
 0x58f   :  { %5943 = vpow2.f32 %v3879_v30 }
 0x590   :  { %5945 = vpow2.f32 %v3880_v39  ;;  %v7072_v39 = vld [vmem:[%s7437_s6] ss:$0 sm:$0xff] }
 0x591   :  { %v2429_v47 = vadd.f32 %v7072_v39, %v2381_v9 }
 0x595   :  { %v5942_v17 = vpop.eup %5941 }
 0x596   :  { %v2409_v15 = vmul.f32 %v5942_v17, %v2408_v62 }
 0x598   :  { %v7049_v41 = vadd.f32 %v2410_v60, %v2409_v15  ;;  %v2442_v15 = vld [vmem:[#allocation4] sm:$0x3] }
 0x599   :  { %v5944_v61 = vpop.eup %5943 }
 0x59a   :  { %v2416_v6 = vadd.f32 1.0, %v5944_v61  ;;  %v2440_v0 = vadd.f32 %v2439_v54, %v7049_v41  ;;  %2512 = vmatmul.mubr.f32.vlgmr.msra.gmra.mrb[24].mxu1 %v7049_v41  ;;  %4595 = vmatmul.mubr.f32.vlgmr.msra.gmra.mrb[28].mxu0 %v7049_v41  ;;  %v5946_v32 = vpop.eup %5945  ;;  %v7540_v61 = vld [vmem:[#allocation30_spill] sm:$0xff]  ;;  %v7541_v54 = vld [vmem:[#allocation23_spill] sm:$0xff] }
 0x59b   :  { %5503 = vmatpush1.bf16.msra.mxu1 %v6543_v21  ;;  %5534 = vmatpush3.bf16.msra.mxu0 %v6577_v58  ;;  %v2426_v62 = vadd.f32 1.0, %v5946_v32  ;;  %v7544_v32 = vld [vmem:[#allocation26_spill] sm:$0xff] }
 0x59c   :  { %5947 = vrcp.f32 %v2416_v6  ;;  %2441 = vst [vmem:[#allocation3] sm:$0x3] %v2440_v0  ;;  %5505 = vmatprep.subr.bf16.mxu1 %v6546_v22  ;;  %5535 = vmatprep.subr.bf16.mxu0 %v7493_v31  ;;  %v7542_v6 = vld [vmem:[#allocation25_spill] sm:$0xff]  ;;  %v7543_v0 = vld [vmem:[#allocation31_spill] sm:$0xff] }
 0x59d   :  { %2652 = vmatprep.mubr.f32.mxu1 %v7494_v27  ;;  %4629 = vmatprep.mubr.msk.f32.mxu0 %vm6169_vm1, %v7494_v27  ;;  %5949 = vrcp.f32 %v2426_v62  ;;  %v7545_v62 = vld [vmem:[#allocation28_spill] sm:$0xff] }
 0x59f   :  { %5507 = vmatpush1.bf16.msra.mxu1 %v6560_v35  ;;  %5537 = vmatpush3.bf16.msra.mxu0 %v6588_v12 }
 0x5a0   :  { %5509 = vmatprep.subr.bf16.mxu1 %v6564_v37  ;;  %5538 = vmatprep.subr.bf16.mxu0 %v7493_v31 }
 0x5a3   :  { %5511 = vmatpush1.bf16.msra.mxu1 %v6571_v49  ;;  %5540 = vmatpush3.bf16.msra.mxu0 %v6600_v33 }
 0x5a4   :  { %5513 = vmatprep.subr.bf16.mxu1 %v6574_v53  ;;  %5541 = vmatprep.subr.bf16.mxu0 %v7493_v31 }
 0x5a6   :  { %v5948_v34 = vpop.eup %5947 }
 0x5a7   :  { %v2430_v10 = vmul.f32 %v5948_v34, %v2429_v47  ;;  %5515 = vmatpush1.bf16.msra.mxu1 %v6581_v2  ;;  %5543 = vmatpush3.bf16.msra.mxu0 %v6610_v55  ;;  %v5950_v44 = vpop.eup %5949  ;;  %v7546_v47 = vld [vmem:[#allocation32_spill] sm:$0xff]  ;;  %v7547_v34 = vld [vmem:[#allocation29_spill] sm:$0xff] }
 0x5a8   :  { %5517 = vmatprep.subr.bf16.mxu1 %v6585_v4  ;;  %5544 = vmatprep.subr.bf16.mxu0 %v7493_v31  ;;  %v2435_v9 = vsub.f32 1.0, %v5950_v44  ;;  %v2437_v30 = vmul.f32 %v5950_v44, %v7000_v57  ;;  %v7539_v57 = vld [vmem:[#allocation22_spill] sm:$0xff] }
 0x5a9   :  { %v2433_v50 = vadd.f32 %v2431_v24, %v2430_v10  ;;  %v2445_v24 = vld [vmem:[#allocation2 + $0x3c] sm:$0x3f] }
 0x5ab   :  { %5951 = vtanh.f32 %v2433_v50  ;;  %5519 = vmatpush1.bf16.msra.mxu1 %v6594_v20  ;;  %5546 = vmatpush3.bf16.msra.mxu0 %v6620_v14 }
 0x5ac   :  { %5521 = vmatprep.subr.bf16.mxu1 %v6597_v23  ;;  %5547 = vmatprep.subr.bf16.mxu0 %v7493_v31 }
 0x5af   :  { %5523 = vmatpush1.bf16.msra.mxu1 %v6604_v42  ;;  %5549 = vmatpush3.bf16.msra.mxu0 %v6628_v26 }
 0x5b0   :  { %5525 = vmatprep.subr.bf16.mxu1 %v6607_v45  ;;  %5550 = vmatprep.subr.bf16.mxu0 %v7493_v31 }
 0x5b3   :  { %5527 = vmatpush1.bf16.msra.mxu1 %v6614_v63  ;;  %5552 = vmatpush3.bf16.msra.mxu0 %v6633_v38 }
 0x5b4   :  { %5529 = vmatprep.subr.bf16.mxu1 %v6617_v5  ;;  %5553 = vmatprep.subr.bf16.mxu0 %v7493_v31 }
 0x5b5   :  { %v5952_v59 = vpop.eup %5951 }
 0x5b6   :  { %v2436_v40 = vmul.f32 %v5952_v59, %v2435_v9 }
 0x5b7   :  { %5531 = vmatpush1.bf16.msra.mxu1 %v6624_v25  ;;  %5555 = vmatpush3.bf16.msra.mxu0 %v6641_v48 }
 0x5b8   :  { %v7094_v17 = vadd.f32 %v2437_v30, %v2436_v40  ;;  %5557 = vmatprep.subr.bf16.mxu1 %v6322_v43  ;;  %5588 = vmatprep.subr.bf16.mxu0 %v7493_v31  ;;  %v2737_v40 = vrot.slane %v2445_v24, 2 }
 0x5ba   :  { %v2443_v60 = vadd.f32 %v2442_v15, %v7094_v17  ;;  %2653 = vmatmul.mubr.f32.vlgmr.msra.gmra.mrb[26].mxu1 %v7094_v17  ;;  %4630 = vmatmul.mubr.f32.vlgmr.msra.gmra.mrb[30].mxu0 %v7094_v17 }
 0x5bb   :  { %5559 = vmatpush1.bf16.msra.mxu1 %v6332_v52  ;;  %5590 = vmatpush3.bf16.msra.mxu0 %v6408_v28 }
 0x5bc   :  { %2444 = vst [vmem:[#allocation4] sm:$0x3] %v2443_v60  ;;  %5561 = vmatprep.subr.bf16.mxu1 %v6341_v1  ;;  %5591 = vmatprep.subr.bf16.mxu0 %v7493_v31 }
 0x5bd   :  { %2855 = vmatprep.mubr.f32.mxu1 %v7494_v27  ;;  %4664 = vmatprep.mubr.msk.f32.mxu0 %vm6169_vm1, %v7494_v27 }
 0x5bf   :  { %5563 = vmatpush1.bf16.msra.mxu1 %v6359_v11  ;;  %5593 = vmatpush3.bf16.msra.mxu0 %v6433_v36 }
 0x5c0   :  { %5565 = vmatprep.subr.bf16.mxu1 %v6362_v13  ;;  %5594 = vmatprep.subr.bf16.mxu0 %v7493_v31 }
 0x5c3   :  { %5567 = vmatpush1.bf16.msra.mxu1 %v6381_v18  ;;  %5596 = vmatpush3.bf16.msra.mxu0 %v6464_v46 }
 0x5c4   :  { %5569 = vmatprep.subr.bf16.mxu1 %v6385_v19  ;;  %5597 = vmatprep.subr.bf16.mxu0 %v7493_v31 }
 0x5c7   :  { %5571 = vmatpush1.bf16.msra.mxu1 %v6411_v29  ;;  %5599 = vmatpush3.bf16.msra.mxu0 %v7495_v8 }
 0x5c8   :  { %5573 = vmatprep.subr.bf16.mxu1 %v7496_v3  ;;  %5600 = vmatprep.subr.bf16.mxu0 %v7493_v31 }
 0x5cb   :  { %5575 = vmatpush1.bf16.msra.mxu1 %v7497_v16  ;;  %5602 = vmatpush3.bf16.msra.mxu0 %v7498_v51 }
 0x5cc   :  { %5577 = vmatprep.subr.bf16.mxu1 %v7529_v56  ;;  %5603 = vmatprep.subr.bf16.mxu0 %v7493_v31 }
 0x5cf   :  { %5579 = vmatpush1.bf16.msra.mxu1 %v7539_v57  ;;  %5605 = vmatpush3.bf16.msra.mxu0 %v7540_v61  ;;  %v2446_v57 = vld [vmem:[#allocation2 + $0x1e] sm:$0x3f] }
 0x5d0   :  { %5581 = vmatprep.subr.bf16.mxu1 %v7541_v54  ;;  %5606 = vmatprep.subr.bf16.mxu0 %v7493_v31  ;;  %v2748_v54 = vrot.slane %v2445_v24, 4 }
 0x5d3   :  { %5583 = vmatpush1.bf16.msra.mxu1 %v7542_v6  ;;  %5608 = vmatpush3.bf16.msra.mxu0 %v7543_v0 }
 0x5d4   :  { %5585 = vmatprep.subr.bf16.mxu1 %v7544_v32  ;;  %5609 = vmatprep.subr.bf16.mxu0 %v7493_v31 }
 0x5d7   :  { %5587 = vmatpush1.bf16.msra.mxu1 %v7545_v62  ;;  %5611 = vmatpush3.bf16.msra.mxu0 %v7546_v47 }
 0x5d8   :  { %5613 = vmatprep.subr.bf16.mxu1 %v7547_v34  ;;  %5644 = vmatprep.subr.bf16.mxu0 %v7493_v31 }
 0x66d   :  { %v2513_v10 = vpop.f32.mrb[24].mxu1  ;;  %v2584_v50 = vpop.f32.mrb[28].mxu0 }
 0x66e   :  { %v2729_v44 = vadd.f32 %v2513_v10, %v2445_v24  ;;  %v2515_v9 = vpop.f32.mrb[25].mxu1  ;;  %v4596_v59 = vpop.f32.mrb[29].mxu0  ;;  %v2746_v34 = vadd.f32 %v7045_v7, %v2584_v50 }
 0x66f   :  { %v2739_v15 = vadd.f32 %v2737_v40, %v2515_v9 }
 0x670   :  { %v3881_v30 = vmul.f32 -1.442695, %v2729_v44 }
 0x671   :  { %v3882_v60 = vmul.f32 -1.442695, %v2739_v15 }
 0x672   :  { %5953 = vpow2.f32 %v3881_v30  ;;  %v2764_v30 = vrot.slane %v2446_v57, 2 }
 0x673   :  { %5955 = vpow2.f32 %v3882_v60 }
 0x67c   :  { %v5954_v32 = vpop.eup %5953 }
 0x67d   :  { %v2733_v62 = vadd.f32 1.0, %v5954_v32  ;;  %v5956_v47 = vpop.eup %5955 }
 0x67e   :  { %v2743_v0 = vadd.f32 1.0, %v5956_v47 }
 0x67f   :  { %5957 = vrcp.f32 %v2733_v62 }
 0x680   :  { %5959 = vrcp.f32 %v2743_v0  ;;  %v2783_v0 = vld [vmem:[#allocation3] sm:$0x3] }
 0x689   :  { %v5958_v6 = vpop.eup %5957 }
 0x68a   :  { %v2747_v61 = vmul.f32 %v5958_v6, %v2746_v34  ;;  %v5960_v62 = vpop.eup %5959 }
 0x68b   :  { %v2752_v60 = vsub.f32 1.0, %v5960_v62  ;;  %v2754_v6 = vmul.f32 %v5960_v62, %v7049_v41 }
 0x68c   :  { %v2750_v10 = vadd.f32 %v2748_v54, %v2747_v61 }
 0x68d   :  { %v2654_v59 = vpop.f32.mrb[26].mxu1  ;;  %v2725_v56 = vpop.f32.mrb[30].mxu0 }
 0x68e   :  { %5961 = vtanh.f32 %v2750_v10  ;;  %v2756_v44 = vadd.f32 %v2654_v59, %v2446_v57  ;;  %v2656_v9 = vpop.f32.mrb[27].mxu1  ;;  %v4631_v40 = vpop.f32.mrb[31].mxu0 }
 0x68f   :  { %v2766_v32 = vadd.f32 %v2764_v30, %v2656_v9  ;;  %v2775_v40 = vrot.slane %v2446_v57, 4 }
 0x690   :  { %v3883_v15 = vmul.f32 -1.442695, %v2756_v44  ;;  %v2773_v44 = vadd.f32 %v7072_v39, %v2725_v56 }
 0x691   :  { %v3884_v47 = vmul.f32 -1.442695, %v2766_v32 }
 0x692   :  { %5963 = vpow2.f32 %v3883_v15 }
 0x693   :  { %5965 = vpow2.f32 %v3884_v47 }
 0x698   :  { %v5962_v50 = vpop.eup %5961 }
 0x699   :  { %v2753_v24 = vmul.f32 %v5962_v50, %v2752_v60  ;;  %v2786_v50 = vld [vmem:[#allocation4] sm:$0x3] }
 0x69b   :  { %v7138_v61 = vadd.f32 %v2754_v6, %v2753_v24 }
 0x69c   :  { %v5964_v54 = vpop.eup %5963 }
 0x69d   :  { %v2760_v34 = vadd.f32 1.0, %v5964_v54  ;;  %v2784_v10 = vadd.f32 %v2783_v0, %v7138_v61  ;;  %2856 = vmatmul.mubr.f32.vlgmr.msra.gmra.mrb[28].mxu1 %v7138_v61  ;;  %4665 = vmatmul.mubr.f32.vlgmr.msra.gmra.mrb[32].mxu0 %v7138_v61  ;;  %v5966_v41 = vpop.eup %5965 }
 0x69e   :  { %5615 = vmatpush1.bf16.msra.mxu1 %v6543_v21  ;;  %5646 = vmatpush3.bf16.msra.mxu0 %v6577_v58  ;;  %v2770_v59 = vadd.f32 1.0, %v5966_v41 }
 0x69f   :  { %5967 = vrcp.f32 %v2760_v34  ;;  %2785 = vst [vmem:[#allocation3] sm:$0x3] %v2784_v10  ;;  %5617 = vmatprep.subr.bf16.mxu1 %v6546_v22  ;;  %5647 = vmatprep.subr.bf16.mxu0 %v7493_v31 }
 0x6a0   :  { %2996 = vmatprep.mubr.f32.mxu1 %v7494_v27  ;;  %4699 = vmatprep.mubr.msk.f32.mxu0 %vm6169_vm1, %v7494_v27  ;;  %5969 = vrcp.f32 %v2770_v59 }
 0x6a2   :  { %5619 = vmatpush1.bf16.msra.mxu1 %v6560_v35  ;;  %5649 = vmatpush3.bf16.msra.mxu0 %v6588_v12 }
 0x6a3   :  { %5621 = vmatprep.subr.bf16.mxu1 %v6564_v37  ;;  %5650 = vmatprep.subr.bf16.mxu0 %v7493_v31 }
 0x6a6   :  { %5623 = vmatpush1.bf16.msra.mxu1 %v6571_v49  ;;  %5652 = vmatpush3.bf16.msra.mxu0 %v6600_v33 }
 0x6a7   :  { %5625 = vmatprep.subr.bf16.mxu1 %v6574_v53  ;;  %5653 = vmatprep.subr.bf16.mxu0 %v7493_v31 }
 0x6a9   :  { %v5968_v9 = vpop.eup %5967 }
 0x6aa   :  { %v2774_v30 = vmul.f32 %v5968_v9, %v2773_v44  ;;  %5627 = vmatpush1.bf16.msra.mxu1 %v6581_v2  ;;  %5655 = vmatpush3.bf16.msra.mxu0 %v6610_v55  ;;  %v5970_v56 = vpop.eup %5969 }
 0x6ab   :  { %5629 = vmatprep.subr.bf16.mxu1 %v6585_v4  ;;  %5656 = vmatprep.subr.bf16.mxu0 %v7493_v31  ;;  %v2779_v57 = vsub.f32 1.0, %v5970_v56  ;;  %v2781_v47 = vmul.f32 %v5970_v56, %v7094_v17 }
 0x6ac   :  { %v2777_v15 = vadd.f32 %v2775_v40, %v2774_v30 }
 0x6ae   :  { %5971 = vtanh.f32 %v2777_v15  ;;  %5631 = vmatpush1.bf16.msra.mxu1 %v6594_v20  ;;  %5658 = vmatpush3.bf16.msra.mxu0 %v6620_v14 }
 0x6af   :  { %5633 = vmatprep.subr.bf16.mxu1 %v6597_v23  ;;  %5659 = vmatprep.subr.bf16.mxu0 %v7493_v31 }
 0x6b2   :  { %5635 = vmatpush1.bf16.msra.mxu1 %v6604_v42  ;;  %5661 = vmatpush3.bf16.msra.mxu0 %v6628_v26 }
 0x6b3   :  { %5637 = vmatprep.subr.bf16.mxu1 %v6607_v45  ;;  %5662 = vmatprep.subr.bf16.mxu0 %v7493_v31 }
 0x6b6   :  { %5639 = vmatpush1.bf16.msra.mxu1 %v6614_v63  ;;  %5664 = vmatpush3.bf16.msra.mxu0 %v6633_v38 }
 0x6b7   :  { %5641 = vmatprep.subr.bf16.mxu1 %v6617_v5  ;;  %5665 = vmatprep.subr.bf16.mxu0 %v7493_v31 }
 0x6b8   :  { %v5972_v32 = vpop.eup %5971 }
 0x6b9   :  { %v2780_v62 = vmul.f32 %v5972_v32, %v2779_v57  ;;  %v2790_v57 = vld [vmem:[#allocation2 + $0x12] sm:$0x3f] }
 0x6ba   :  { %5643 = vmatpush1.bf16.msra.mxu1 %v6624_v25  ;;  %5667 = vmatpush3.bf16.msra.mxu0 %v6641_v48 }
 0x6bb   :  { %v7178_v60 = vadd.f32 %v2781_v47, %v2780_v62  ;;  %5669 = vmatprep.subr.bf16.mxu1 %v6322_v43  ;;  %5700 = vmatprep.subr.bf16.mxu0 %v7493_v31  ;;  %v7548_v43 = vld [vmem:[#allocation21_spill] sm:$0xff] }
 0x6bd   :  { %v2787_v24 = vadd.f32 %v2786_v50, %v7178_v60  ;;  %2997 = vmatmul.mubr.f32.vlgmr.msra.gmra.mrb[30].mxu1 %v7178_v60  ;;  %4700 = vmatmul.mubr.f32.vlgmr.msra.gmra.mrb[34].mxu0 %v7178_v60 }
 0x6be   :  { %5671 = vmatpush1.bf16.msra.mxu1 %v6332_v52  ;;  %5702 = vmatpush3.bf16.msra.mxu0 %v6408_v28  ;;  %v7549_v52 = vld [vmem:[#allocation22_spill] sm:$0xff]  ;;  %v7555_v28 = vld [vmem:[#allocation28_spill] sm:$0xff] }
 0x6bf   :  { %2788 = vst [vmem:[#allocation4] sm:$0x3] %v2787_v24  ;;  %5673 = vmatprep.subr.bf16.mxu1 %v6341_v1  ;;  %5703 = vmatprep.subr.bf16.mxu0 %v7493_v31  ;;  %v7550_v1 = vld [vmem:[#allocation30_spill] sm:$0xff] }
 0x6c0   :  { %3199 = vmatprep.mubr.f32.mxu1 %v7494_v27  ;;  %4734 = vmatprep.mubr.msk.f32.mxu0 %vm6169_vm1, %v7494_v27 }
 0x6c2   :  { %5675 = vmatpush1.bf16.msra.mxu1 %v6359_v11  ;;  %5705 = vmatpush3.bf16.msra.mxu0 %v6433_v36  ;;  %v7551_v11 = vld [vmem:[#allocation23_spill] sm:$0xff]  ;;  %v7557_v36 = vld [vmem:[#allocation29_spill] sm:$0xff] }
 0x6c3   :  { %5677 = vmatprep.subr.bf16.mxu1 %v6362_v13  ;;  %5706 = vmatprep.subr.bf16.mxu0 %v7493_v31  ;;  %v7552_v13 = vld [vmem:[#allocation25_spill] sm:$0xff] }
 0x6c6   :  { %5679 = vmatpush1.bf16.msra.mxu1 %v6381_v18  ;;  %5708 = vmatpush3.bf16.msra.mxu0 %v6464_v46  ;;  %v7553_v18 = vld [vmem:[#allocation31_spill] sm:$0xff]  ;;  %v2789_v46 = vld [vmem:[#allocation2 + $0x48] sm:$0x3f] }
 0x6c7   :  { %5681 = vmatprep.subr.bf16.mxu1 %v6385_v19  ;;  %5709 = vmatprep.subr.bf16.mxu0 %v7493_v31  ;;  %v7554_v19 = vld [vmem:[#allocation26_spill] sm:$0xff]  ;;  %v3081_v6 = vrot.slane %v2789_v46, 2  ;;  %v3092_v30 = vrot.slane %v2789_v46, 4 }
 0x6ca   :  { %5683 = vmatpush1.bf16.msra.mxu1 %v6411_v29  ;;  %5711 = vmatpush3.bf16.msra.mxu0 %v7495_v8  ;;  %v7556_v29 = vld [vmem:[#allocation32_spill] sm:$0xff] }
 0x6cb   :  { %5685 = vmatprep.subr.bf16.mxu1 %v7496_v3  ;;  %5712 = vmatprep.subr.bf16.mxu0 %v7493_v31 }
 0x6ce   :  { %5687 = vmatpush1.bf16.msra.mxu1 %v7497_v16  ;;  %5714 = vmatpush3.bf16.msra.mxu0 %v7498_v51 }
 0x6cf   :  { %5689 = vmatprep.subr.bf16.mxu1 %v7548_v43  ;;  %5715 = vmatprep.subr.bf16.mxu0 %v7493_v31  ;;  %v3108_v43 = vrot.slane %v2790_v57, 2 }
 0x6d2   :  { %5691 = vmatpush1.bf16.msra.mxu1 %v7549_v52  ;;  %5717 = vmatpush3.bf16.msra.mxu0 %v7550_v1 }
 0x6d3   :  { %5693 = vmatprep.subr.bf16.mxu1 %v7551_v11  ;;  %5718 = vmatprep.subr.bf16.mxu0 %v7493_v31 }
 0x6d6   :  { %5695 = vmatpush1.bf16.msra.mxu1 %v7552_v13  ;;  %5720 = vmatpush3.bf16.msra.mxu0 %v7553_v18 }
 0x6d7   :  { %5697 = vmatprep.subr.bf16.mxu1 %v7554_v19  ;;  %5721 = vmatprep.subr.bf16.mxu0 %v7493_v31 }
 0x6da   :  { %5699 = vmatpush1.bf16.msra.mxu1 %v7555_v28  ;;  %5723 = vmatpush3.bf16.msra.mxu0 %v7556_v29 }
 0x6db   :  { %5725 = vmatprep.subr.bf16.mxu1 %v7557_v36  ;;  %5756 = vmatprep.subr.bf16.mxu0 %v7493_v31 }
 0x770   :  { %v2857_v8 = vpop.f32.mrb[28].mxu1  ;;  %v2928_v3 = vpop.f32.mrb[32].mxu0 }
 0x771   :  { %v3073_v16 = vadd.f32 %v2857_v8, %v2789_v46  ;;  %v2859_v51 = vpop.f32.mrb[29].mxu1  ;;  %v4666_v17 = vpop.f32.mrb[33].mxu0  ;;  %v3090_v9 = vadd.f32 %v7045_v7, %v2928_v3  ;;  %v3127_v8 = vld [vmem:[#allocation3] sm:$0x3] }
 0x772   :  { %v3083_v0 = vadd.f32 %v3081_v6, %v2859_v51  ;;  %v3489_v6 = vld [vmem:[%s7438_s7 + $0x40] sm:$0xff] }
 0x773   :  { %v3885_v54 = vmul.f32 -1.442695, %v3073_v16 }
 0x774   :  { %v3886_v34 = vmul.f32 -1.442695, %v3083_v0 }
 0x775   :  { %5973 = vpow2.f32 %v3885_v54  ;;  %v3490_v54 = vld [vmem:[%s7438_s7 + $0x48] sm:$0xff] }
 0x776   :  { %5975 = vpow2.f32 %v3886_v34  ;;  %v5817_v0 = vpack.c.bf16 %v3490_v54, %v3489_v6  ;;  %v3491_v34 = vld [vmem:[%s7438_s7 + $0x50] sm:$0xff] }
 0x77f   :  { %v5974_v10 = vpop.eup %5973 }
 0x780   :  { %v3077_v41 = vadd.f32 1.0, %v5974_v10  ;;  %v5976_v59 = vpop.eup %5975  ;;  %v3492_v10 = vld [vmem:[%s7438_s7 + $0x58] sm:$0xff] }
 0x781   :  { %v3087_v44 = vadd.f32 1.0, %v5976_v59  ;;  %v3493_v59 = vld [vmem:[%s7438_s7 + $0x60] sm:$0xff] }
 0x782   :  { %5977 = vrcp.f32 %v3077_v41  ;;  %v5820_v41 = vpack.c.bf16 %v3492_v10, %v3491_v34 }
 0x783   :  { %5979 = vrcp.f32 %v3087_v44  ;;  %v3494_v44 = vld [vmem:[%s7438_s7 + $0x68] sm:$0xff] }
 0x78c   :  { %v5978_v40 = vpop.eup %5977 }
 0x78d   :  { %v3091_v15 = vmul.f32 %v5978_v40, %v3090_v9  ;;  %v5980_v11 = vpop.eup %5979  ;;  %v5823_v9 = vpack.c.bf16 %v3494_v44, %v3493_v59  ;;  %v3495_v40 = vld [vmem:[%s7438_s7 + $0x70] sm:$0xff] }
 0x78e   :  { %v3096_v18 = vsub.f32 1.0, %v5980_v11  ;;  %v3098_v29 = vmul.f32 %v5980_v11, %v7138_v61  ;;  %v3504_v11 = vld [vmem:[%s7439_s8 + $0x38] sm:$0xff] }
 0x78f   :  { %v3094_v56 = vadd.f32 %v3092_v30, %v3091_v15  ;;  %v3496_v30 = vld [vmem:[%s7438_s7 + $0x78] sm:$0xff] }
 0x790   :  { %v2998_v32 = vpop.f32.mrb[30].mxu1  ;;  %v3069_v62 = vpop.f32.mrb[34].mxu0  ;;  %v5826_v15 = vpack.c.bf16 %v3496_v30, %v3495_v40 }
 0x791   :  { %5981 = vtanh.f32 %v3094_v56  ;;  %v3100_v47 = vadd.f32 %v2998_v32, %v2790_v57  ;;  %v3000_v50 = vpop.f32.mrb[31].mxu1  ;;  %v4701_v24 = vpop.f32.mrb[35].mxu0  ;;  %v3497_v56 = vld [vmem:[%s7439_s8] sm:$0xff] }
 0x792   :  { %v3110_v1 = vadd.f32 %v3108_v43, %v3000_v50  ;;  %v3501_v24 = vld [vmem:[%s7439_s8 + $0x20] sm:$0xff]  ;;  %v3502_v43 = vld [vmem:[%s7439_s8 + $0x28] sm:$0xff] }
 0x793   :  { %v3887_v52 = vmul.f32 -1.442695, %v3100_v47  ;;  %v3500_v47 = vld [vmem:[%s7439_s8 + $0x18] sm:$0xff] }
 0x794   :  { %v3888_v13 = vmul.f32 -1.442695, %v3110_v1  ;;  %v3503_v1 = vld [vmem:[%s7439_s8 + $0x30] sm:$0xff] }
 0x795   :  { %5983 = vpow2.f32 %v3887_v52  ;;  %v5787_v52 = vpack.c.bf16 %v3502_v43, %v3501_v24 }
 0x796   :  { %5985 = vpow2.f32 %v3888_v13  ;;  %v5790_v13 = vpack.c.bf16 %v3504_v11, %v3503_v1 }
 0x79b   :  { %v5982_v19 = vpop.eup %5981 }
 0x79c   :  { %v3097_v28 = vmul.f32 %v5982_v19, %v3096_v18  ;;  %v3505_v18 = vld [vmem:[%s7439_s8 + $0x40] sm:$0xff]  ;;  %v3506_v19 = vld [vmem:[%s7439_s8 + $0x48] sm:$0xff] }
 0x79e   :  { %v7222_v36 = vadd.f32 %v3098_v29, %v3097_v28  ;;  %v5793_v28 = vpack.c.bf16 %v3506_v19, %v3505_v18  ;;  %v3507_v29 = vld [vmem:[%s7439_s8 + $0x50] sm:$0xff] }
 0x79f   :  { %v5984_v46 = vpop.eup %5983 }
 0x7a0   :  { %v3104_v3 = vadd.f32 1.0, %v5984_v46  ;;  %v3128_v16 = vadd.f32 %v3127_v8, %v7222_v36  ;;  %3200 = vmatmul.mubr.f32.vlgmr.msra.gmra.mrb[32].mxu1 %v7222_v36  ;;  %4735 = vmatmul.mubr.f32.vlgmr.msra.gmra.mrb[36].mxu0 %v7222_v36  ;;  %v5986_v61 = vpop.eup %5985  ;;  %v3508_v46 = vld [vmem:[%s7439_s8 + $0x58] sm:$0xff] }
 0x7a1   :  { %5727 = vmatpush1.bf16.msra.mxu1 %v6543_v21  ;;  %5758 = vmatpush3.bf16.msra.mxu0 %v6577_v58  ;;  %v3114_v21 = vadd.f32 1.0, %v5986_v61  ;;  %v5796_v8 = vpack.c.bf16 %v3508_v46, %v3507_v29 }
 0x7a2   :  { %5987 = vrcp.f32 %v3104_v3  ;;  %3129 = vst [vmem:[#allocation3] sm:$0x3] %v3128_v16  ;;  %5729 = vmatprep.subr.bf16.mxu1 %v6546_v22  ;;  %5759 = vmatprep.subr.bf16.mxu0 %v7493_v31  ;;  %v3117_v22 = vadd.f32 %v7072_v39, %v3069_v62  ;;  %v3499_v62 = vld [vmem:[%s7439_s8 + $0x10] sm:$0xff]  ;;  %v3509_v3 = vld [vmem:[%s7439_s8 + $0x60] sm:$0xff]  ;;  %v3510_v16 = vld [vmem:[%s7439_s8 + $0x68] sm:$0xff] }
 0x7a3   :  { %3340 = vmatprep.mubr.f32.mxu1 %v7494_v27  ;;  %4769 = vmatprep.mubr.msk.f32.mxu0 %vm6169_vm1, %v7494_v27  ;;  %5989 = vrcp.f32 %v3114_v21  ;;  %v5784_v50 = vpack.c.bf16 %v3500_v47, %v3499_v62  ;;  %v5799_v61 = vpack.c.bf16 %v3510_v16, %v3509_v3  ;;  %v3511_v21 = vld [vmem:[%s7439_s8 + $0x70] sm:$0xff] }
 0x7a5   :  { %5731 = vmatpush1.bf16.msra.mxu1 %v6560_v35  ;;  %5761 = vmatpush3.bf16.msra.mxu0 %v6588_v12  ;;  %v3119_v35 = vrot.slane %v2790_v57, 4  ;;  %v3498_v57 = vld [vmem:[%s7439_s8 + $0x8] sm:$0xff] }
 0x7a6   :  { %5733 = vmatprep.subr.bf16.mxu1 %v6564_v37  ;;  %5762 = vmatprep.subr.bf16.mxu0 %v7493_v31  ;;  %v5781_v32 = vpack.c.bf16 %v3498_v57, %v3497_v56 }
 0x7a9   :  { %5735 = vmatpush1.bf16.msra.mxu1 %v6571_v49  ;;  %5764 = vmatpush3.bf16.msra.mxu0 %v6600_v33  ;;  %v3471_v57 = vld [vmem:[#allocation3] sm:$0x3] }
 0x7aa   :  { %5737 = vmatprep.subr.bf16.mxu1 %v6574_v53  ;;  %5765 = vmatprep.subr.bf16.mxu0 %v7493_v31 }
 0x7ac   :  { %v5988_v58 = vpop.eup %5987 }
 0x7ad   :  { %v3118_v51 = vmul.f32 %v5988_v58, %v3117_v22  ;;  %5739 = vmatpush1.bf16.msra.mxu1 %v6581_v2  ;;  %5767 = vmatpush3.bf16.msra.mxu0 %v6610_v55  ;;  %v5990_v49 = vpop.eup %5989  ;;  %v3512_v22 = vld [vmem:[%s7439_s8 + $0x78] sm:$0xff] }
 0x7ae   :  { %5741 = vmatprep.subr.bf16.mxu1 %v6585_v4  ;;  %5768 = vmatprep.subr.bf16.mxu0 %v7493_v31  ;;  %v3123_v53 = vsub.f32 1.0, %v5990_v49  ;;  %v3125_v12 = vmul.f32 %v5990_v49, %v7178_v60  ;;  %v3488_v60 = vld [vmem:[%s7438_s7 + $0x38] sm:$0xff]  ;;  %v5802_v58 = vpack.c.bf16 %v3512_v22, %v3511_v21  ;;  %v3662_v21 = vld [vmem:[%s7441_s10] sm:$0xff]  ;;  %v3663_v22 = vld [vmem:[%s7441_s10 + $0x8] sm:$0xff] }
 0x7af   :  { %v3121_v37 = vadd.f32 %v3119_v35, %v3118_v51  ;;  %v3133_v35 = vld [vmem:[#allocation2 + $0x54] sm:$0x3f] }
 0x7b1   :  { %5991 = vtanh.f32 %v3121_v37  ;;  %5743 = vmatpush1.bf16.msra.mxu1 %v6594_v20  ;;  %5770 = vmatpush3.bf16.msra.mxu0 %v6620_v14 }
 0x7b2   :  { %5745 = vmatprep.subr.bf16.mxu1 %v6597_v23  ;;  %5771 = vmatprep.subr.bf16.mxu0 %v7493_v31  ;;  %v3130_v23 = vld [vmem:[#allocation4] sm:$0x3] }
 0x7b5   :  { %5747 = vmatpush1.bf16.msra.mxu1 %v6604_v42  ;;  %5773 = vmatpush3.bf16.msra.mxu0 %v6628_v26  ;;  %v3481_v42 = vld [vmem:[%s7438_s7] sm:$0xff]  ;;  %v3486_v26 = vld [vmem:[%s7438_s7 + $0x28] sm:$0xff] }
 0x7b6   :  { %5749 = vmatprep.subr.bf16.mxu1 %v6607_v45  ;;  %5774 = vmatprep.subr.bf16.mxu0 %v7493_v31  ;;  %v3482_v45 = vld [vmem:[%s7438_s7 + $0x8] sm:$0xff] }
 0x7b7   :  { %v5805_v55 = vpack.c.bf16 %v3482_v45, %v3481_v42 }
 0x7b9   :  { %5751 = vmatpush1.bf16.msra.mxu1 %v6614_v63  ;;  %5776 = vmatpush3.bf16.msra.mxu0 %v6633_v38  ;;  %v3483_v63 = vld [vmem:[%s7438_s7 + $0x10] sm:$0xff] }
 0x7ba   :  { %5753 = vmatprep.subr.bf16.mxu1 %v6617_v5  ;;  %5777 = vmatprep.subr.bf16.mxu0 %v7493_v31  ;;  %v3484_v5 = vld [vmem:[%s7438_s7 + $0x18] sm:$0xff] }
 0x7bb   :  { %v5992_v2 = vpop.eup %5991  ;;  %v5808_v14 = vpack.c.bf16 %v3484_v5, %v3483_v63 }
 0x7bc   :  { %v3124_v4 = vmul.f32 %v5992_v2, %v3123_v53 }
 0x7bd   :  { %5755 = vmatpush1.bf16.msra.mxu1 %v6624_v25  ;;  %5779 = vmatpush3.bf16.msra.mxu0 %v6641_v48  ;;  %v3485_v25 = vld [vmem:[%s7438_s7 + $0x20] sm:$0xff]  ;;  %v3487_v48 = vld [vmem:[%s7438_s7 + $0x30] sm:$0xff] }
 0x7be   :  { %v7262_v20 = vadd.f32 %v3125_v12, %v3124_v4  ;;  %5804 = vmatprep.subr.bf16.mxu0 %v7493_v31  ;;  %5780 = vmatprep.subr.bf16.mxu1 %v7493_v31  ;;  %v5811_v38 = vpack.c.bf16 %v3486_v26, %v3485_v25  ;;  %v5814_v17 = vpack.c.bf16 %v3488_v60, %v3487_v48  ;;  %v3425_v4 = vrot.slane %v3133_v35, 2  ;;  %v3134_v48 = vld [vmem:[#allocation2 + $0x6] sm:$0x3f] }
 0x7bf   :  { %v3436_v25 = vrot.slane %v3133_v35, 4  ;;  %v3452_v34 = vrot.slane %v3134_v48, 2  ;;  %v3463_v11 = vrot.slane %v3134_v48, 4 }
 0x7c0   :  { %v3131_v33 = vadd.f32 %v3130_v23, %v7262_v20  ;;  %3341 = vmatmul.mubr.f32.vlgmr.msra.gmra.mrb[34].mxu1 %v7262_v20  ;;  %4770 = vmatmul.mubr.f32.vlgmr.msra.gmra.mrb[38].mxu0 %v7262_v20 }
 0x7c1   :  { %4839 = vmatprep.mubr.msk.f32.mxu0 %vm6169_vm1, %v7494_v27  ;;  %4804 = vmatprep.mubr.msk.f32.mxu1 %vm6169_vm1, %v7494_v27 }
 0x7c2   :  { %3132 = vst [vmem:[#allocation4] sm:$0x3] %v3131_v33  ;;  %5806 = vmatpush3.bf16.msra.mxu0 %v5805_v55  ;;  %5782 = vmatpush3.bf16.msra.mxu1 %v5781_v32 }
 0x7c3   :  { %5807 = vmatprep.subr.bf16.mxu0 %v7493_v31  ;;  %5783 = vmatprep.subr.bf16.mxu1 %v7493_v31 }
 0x7c6   :  { %5809 = vmatpush3.bf16.msra.mxu0 %v5808_v14  ;;  %5785 = vmatpush3.bf16.msra.mxu1 %v5784_v50 }
 0x7c7   :  { %5810 = vmatprep.subr.bf16.mxu0 %v7493_v31  ;;  %5786 = vmatprep.subr.bf16.mxu1 %v7493_v31 }
 0x7c9   :  { %v3474_v3 = vld [vmem:[#allocation4] sm:$0x3] }
 0x7ca   :  { %5812 = vmatpush3.bf16.msra.mxu0 %v5811_v38  ;;  %5788 = vmatpush3.bf16.msra.mxu1 %v5787_v52 }
 0x7cb   :  { %5813 = vmatprep.subr.bf16.mxu0 %v7493_v31  ;;  %5789 = vmatprep.subr.bf16.mxu1 %v7493_v31 }
 0x7ce   :  { %5815 = vmatpush3.bf16.msra.mxu0 %v5814_v17  ;;  %5791 = vmatpush3.bf16.msra.mxu1 %v5790_v13 }
 0x7cf   :  { %5816 = vmatprep.subr.bf16.mxu0 %v7493_v31  ;;  %5792 = vmatprep.subr.bf16.mxu1 %v7493_v31 }
 0x7d2   :  { %5818 = vmatpush3.bf16.msra.mxu0 %v5817_v0  ;;  %5794 = vmatpush3.bf16.msra.mxu1 %v5793_v28 }
 0x7d3   :  { %5819 = vmatprep.subr.bf16.mxu0 %v7493_v31  ;;  %5795 = vmatprep.subr.bf16.mxu1 %v7493_v31 }
 0x7d6   :  { %5821 = vmatpush3.bf16.msra.mxu0 %v5820_v41  ;;  %5797 = vmatpush3.bf16.msra.mxu1 %v5796_v8 }
 0x7d7   :  { %5822 = vmatprep.subr.bf16.mxu0 %v7493_v31  ;;  %5798 = vmatprep.subr.bf16.mxu1 %v7493_v31 }
 0x7da   :  { %5824 = vmatpush3.bf16.msra.mxu0 %v5823_v9  ;;  %5800 = vmatpush3.bf16.msra.mxu1 %v5799_v61 }
 0x7db   :  { %5825 = vmatprep.subr.bf16.mxu0 %v7493_v31  ;;  %5801 = vmatprep.subr.bf16.mxu1 %v7493_v31 }
 0x7de   :  { %5827 = vmatpush3.bf16.msra.mxu0 %v5826_v15  ;;  %5803 = vmatpush3.bf16.msra.mxu1 %v5802_v58  ;;  %v5829_v58 = vpack.c.bf16 %v3663_v22, %v3662_v21 }
 0x7df   :  { %5834 = vmatprep.subr.bf16.mxu0 %v7493_v31  ;;  %5828 = vmatprep.subr.bf16.mxu1 %v7493_v31 }
 0x873   :  { %v3201_v51 = vpop.f32.mrb[32].mxu1  ;;  %v3272_v37 = vpop.f32.mrb[36].mxu0 }
 0x874   :  { %v3417_v49 = vadd.f32 %v3201_v51, %v3133_v35  ;;  %v3203_v53 = vpop.f32.mrb[33].mxu1  ;;  %v4736_v2 = vpop.f32.mrb[37].mxu0  ;;  %v3434_v5 = vadd.f32 %v7045_v7, %v3272_v37 }
 0x875   :  { %v3427_v23 = vadd.f32 %v3425_v4, %v3203_v53  ;;  %v3893_v53 = vld [vmem:[#allocation13] ss:$0 sm:$0xff] }
 0x876   :  { %v3889_v12 = vmul.f32 -1.442695, %v3417_v49 }
 0x877   :  { %v3890_v33 = vmul.f32 -1.442695, %v3427_v23 }
 0x878   :  { %5993 = vpow2.f32 %v3889_v12 }
 0x879   :  { %5995 = vpow2.f32 %v3890_v33  ;;  %v3748_v33 = vld [vmem:[%s7443_s12 + $0x8] sm:$0xff] }
 0x882   :  { %v5994_v42 = vpop.eup %5993 }
 0x883   :  { %v3421_v45 = vadd.f32 1.0, %v5994_v42  ;;  %v5996_v55 = vpop.eup %5995 }
 0x884   :  { %v3431_v63 = vadd.f32 1.0, %v5996_v55 }
 0x885   :  { %5997 = vrcp.f32 %v3421_v45  ;;  %v3894_v45 = vld [vmem:[%s7442_s11] ss:$0 sm:$0xff] }
 0x886   :  { %5999 = vrcp.f32 %v3431_v63 }
 0x88f   :  { %v5998_v14 = vpop.eup %5997 }
 0x890   :  { %v3435_v26 = vmul.f32 %v5998_v14, %v3434_v5  ;;  %v6000_v59 = vpop.eup %5999 }
 0x891   :  { %v3440_v9 = vsub.f32 1.0, %v6000_v59  ;;  %v3442_v30 = vmul.f32 %v6000_v59, %v7222_v36 }
 0x892   :  { %v3438_v38 = vadd.f32 %v3436_v25, %v3435_v26  ;;  %v3896_v25 = vld [vmem:[%s7444_s13] ss:$0 sm:$0xff] }
 0x893   :  { %v3342_v60 = vpop.f32.mrb[34].mxu1  ;;  %v3413_v17 = vpop.f32.mrb[38].mxu0 }
 0x894   :  { %6001 = vtanh.f32 %v3438_v38  ;;  %v3444_v6 = vadd.f32 %v3342_v60, %v3134_v48  ;;  %v3344_v54 = vpop.f32.mrb[35].mxu1  ;;  %v4771_v0 = vpop.f32.mrb[39].mxu0  ;;  %v3461_v52 = vadd.f32 %v7072_v39, %v3413_v17 }
 0x895   :  { %v3454_v41 = vadd.f32 %v3452_v34, %v3344_v54 }
 0x896   :  { %v3891_v10 = vmul.f32 -1.442695, %v3444_v6 }
 0x897   :  { %v3892_v44 = vmul.f32 -1.442695, %v3454_v41 }
 0x898   :  { %6003 = vpow2.f32 %v3891_v10 }
 0x899   :  { %6005 = vpow2.f32 %v3892_v44 }
 0x89e   :  { %v6002_v7 = vpop.eup %6001 }
 0x89f   :  { %v3441_v40 = vmul.f32 %v6002_v7, %v3440_v9 }
 0x8a1   :  { %v3443_v15 = vadd.f32 %v3442_v30, %v3441_v40 }
 0x8a2   :  { %v6004_v56 = vpop.eup %6003 }
 0x8a3   :  { %v3472_v32 = vadd.f32 %v3471_v57, %v3443_v15  ;;  %v3448_v62 = vadd.f32 1.0, %v6004_v56  ;;  %v6006_v47 = vpop.eup %6005 }
 0x8a4   :  { %v3458_v50 = vadd.f32 1.0, %v6006_v47 }
 0x8a5   :  { %3473 = vst [vmem:[#allocation3] sm:$0x3] %v3472_v32  ;;  %6007 = vrcp.f32 %v3448_v62 }
 0x8a6   :  { %6009 = vrcp.f32 %v3458_v50 }
 0x8ac   :  { %v3477_v24 = vld [vmem:[#allocation3] sm:$0x3] }
 0x8ad   :  { %v3478_v43 = vmul.f32 0.125, %v3477_v24 }
 0x8af   :  { %v6008_v1 = vpop.eup %6007  ;;  %4840 = vmatmul.mubr.f32.vlgmr.msra.gmra.mrb[40].mxu0 %v3478_v43 }
 0x8b0   :  { %v3462_v13 = vmul.f32 %v6008_v1, %v3461_v52  ;;  %4857 = vmatprep.mubr.msk.f32.mxu0 %vm6169_vm1, %v7494_v27  ;;  %v6010_v18 = vpop.eup %6009 }
 0x8b1   :  { %v3467_v19 = vsub.f32 1.0, %v6010_v18  ;;  %v3469_v46 = vmul.f32 %v6010_v18, %v7262_v20  ;;  %v3664_v20 = vld [vmem:[%s7441_s10 + $0x10] sm:$0xff] }
 0x8b2   :  { %v3465_v36 = vadd.f32 %v3463_v11, %v3462_v13 }
 0x8b4   :  { %6011 = vtanh.f32 %v3465_v36 }
 0x8be   :  { %v6012_v28 = vpop.eup %6011 }
 0x8bf   :  { %v3468_v29 = vmul.f32 %v6012_v28, %v3467_v19 }
 0x8c1   :  { %v3470_v8 = vadd.f32 %v3469_v46, %v3468_v29 }
 0x8c3   :  { %v3475_v16 = vadd.f32 %v3474_v3, %v3470_v8 }
 0x8c5   :  { %3476 = vst [vmem:[#allocation4] sm:$0x3] %v3475_v16 }
 0x8cc   :  { %v3479_v39 = vld [vmem:[#allocation4] sm:$0x3] }
 0x8cd   :  { %v3480_v61 = vmul.f32 0.125, %v3479_v39 }
 0x8cf   :  { %4805 = vmatmul.mubr.f32.vlgmr.msra.gmra.mrb[36].mxu1 %v3480_v61 }
 0x8d0   :  { %4850 = vmatprep.mubr.msk.f32.mxu1 %vm6169_vm1, %v7494_v27  ;;  %5830 = vmatpush3.bf16.msra.mxu1 %v5829_v58  ;;  %v3665_v27 = vld [vmem:[%s7441_s10 + $0x18] sm:$0xff] }
 0x8d1   :  { %5831 = vmatprep.subr.bf16.mxu1 %v7493_v31  ;;  %v5832_v35 = vpack.c.bf16 %v3665_v27, %v3664_v20  ;;  %v3747_v31 = vld [vmem:[%s7443_s12] sm:$0xff]  ;;  %s6125_s12 = scalar_lea.vmem %s3839_s23, 32 }
 0x8d2   :  { %v5835_v42 = vpack.c.bf16 %v3748_v33, %v3747_v31  ;;  %p6126_p12 = scmp.ne.s32.totalorder %s3839_s23, %s6125_s12  ;;  %p6131_p0 = scmp.lt.s32.totalorder %s6125_s12, %s6125_s12 }
 0x8d4   :  { %5833 = vmatpush3.bf16.msra.mxu1 %v5832_v35  ;;  %5836 = vmatpush3.bf16.msra.mxu0 %v5835_v42  ;;  %p6132_p1 = por %p6131_p0, %p6130_p13 }
 0x8d6   :  { %p6133_p2 = pnand %p6132_p1, %p6126_p12 }
 0x982   :  { %v3649_v51 = vpop.f32.mrb[40].mxu0 }
 0x983   :  { %v4841_v37 = vpop.f32.mrb[41].mxu0 }
 0x9a2   :  { %v3579_v49 = vpop.f32.mrb[36].mxu1 }
 0x9a3   :  { %v3650_v2 = vadd.f32 %v3649_v51, %v3579_v49  ;;  %v4806_v4 = vpop.f32.mrb[37].mxu1 }
 0x9a5   :  { %v3660_v12 = vadd.f32 %v3893_v53, %v3650_v2 }
 0x9a7   :  { %v3661_v23 = vmax.f32 %v3660_v12, 0.0 }
 0x9a9   :  { %4851 = vmatmul.mubr.msk.f32.vlgmr.msra.gmra.mrb[38].mxu1 %vm218_vm0, %v3661_v23 }
 0xa7c   :  { %v3742_v55 = vpop.f32.mrb[38].mxu1 }
 0xa7d   :  { %v3743_v63 = vadd.f32 %v3894_v45, %v3742_v55  ;;  %v4852_v5 = vpop.f32.mrb[39].mxu1 }
 0xa7f   :  { %v3746_v14 = vmax.f32 %v3743_v63, 0.0 }
 0xa81   :  { %4858 = vmatmul.mubr.msk.f32.vlgmr.msra.gmra.mrb[42].mxu0 %vm3756_vm2, %v3746_v14 }
 0xb54   :  { %v3826_v26 = vpop.f32.mrb[42].mxu0 }
 0xb55   :  { %v3827_v38 = vadd.f32 %v3896_v25, %v3826_v26  ;;  %v4859_v48 = vpop.f32.mrb[43].mxu0 }
 0xb57   :  { %3831 = vst.msk [vmem:[#allocation14] sm:$0x3] %vm3830_vm3, %v3827_v38 }
 0xb58   :  { %6136 = shalt.err (!%p6133_p2)
}
 0xb59   :  { %s6137_s29 = scalar_lea.hbm %s7445_s14, 32 }
 0xb5a   :  { %p6138_p3 = scmp.ne.s32.totalorder %s7445_s14, %s6137_s29  ;;  %p6141_p4 = scmp.lt.u32.totalorder %s6137_s29, %s7445_s14 }
 0xb5c   :  { %p6143_p5 = pnand %p6141_p4, %p6138_p3 }
 0xb5e   :  { %6146 = shalt.err (!%p6143_p5)
}
 0xb5f   :  { %3841 = dma.vmem_to_hbm [thread:$0]  %s3839_s23, 32, %s7445_s14, [#allocation7]  }
 0xb60   :  { %6153 = dma.done.wait [#allocation7], 32  }
 0xb61   :  { %6154 = vsyncadd [#allocation7], 4294967264 }
 0xb62   :  { %3845 = vsyncpa [#allocation6], 1 }
 0xb63   :  { %3846 = vsyncpa [#allocation9], 1 }
 0xb64   :  { %3847 = vsyncpa [#allocation12], 1 }
 0xb65   :  { %3848 = vsyncpa [#allocation7], 1 }

</bundles_post_ra>
